<compile_context>
chip_gen: v7x
topology: tpu7x:2x2x1
jax: 0.10.0
libtpu: 0.0.40
codegen_flags: <defaults>
</compile_context>

<pallas_src>
import random

import jax
import jax.numpy as jnp
import numpy as np
from jax.experimental import pallas as pl
from jax.experimental.pallas import tpu as pltpu

# Shapes dictated by the torch module's hard-coded reshapes.
N, C, H, W = 128, 128, 28, 28
HW = H * W                      # 784: flattened (h, w) position -> lane axis
J, KK = 32, 3                   # output channels, taps (unfold kernel (3,1), padding (1,0))
BLK = 16                        # images per grid step -> 8 grid steps

# shift_direction = (random.random() > 0.5) * 2 - 1, made deterministic here.
# TODO(synk): wire the module instance's actual RNG draw through at integration time.
random.seed(0)
SHIFT = int((random.random() > 0.5) * 2 - 1)   # == +1 for seed 0


def _conv_kernel(x_ref, w_hi_ref, w_lo_ref, o_ref):
    """Fused: bf16-split matmul + (post-matmul) tap shifts, pad mask, H-roll.

    x_ref:   (BLK, C, HW) f32   one image per leading index, (c, h*W + w) tile.
    w_*_ref: (KK*J, C)   bf16   hi/lo split of weight, tap-major rows.
    o_ref:   (BLK, J, HW) f32   rows already in NCHW order.
    """
    w_hi = w_hi_ref[...]
    w_lo = w_lo_ref[...]

    # w coordinate of every output lane; masks hoisted out of the image loop
    # (JAX does not CSE broadcast_in_dim).
    w_pos = jax.lax.broadcasted_iota(jnp.int32, (1, HW), 1) % W

    # Static per-tap plan.  Tap k (unfold offset d = k-1) on the W-rolled
    # input, followed by the output H-roll, needs at output lane p = h*W + w:
    #     Zk[((h - SHIFT) % H) * W + ((w + d - SHIFT) % W)],  zero if w+d out of [0, W)
    # Both circular wraps are realised with full-(H*W) lane rolls: the H wrap
    # is exact because W | HW; the W wrap needs one alternate roll + a select.
    taps = []
    for k in range(KK):
        d = k - 1
        dp = d - SHIFT                              # net within-row offset
        s_main = (W * SHIFT - dp) % HW              # pulls from lane p + dp - W*SHIFT
        if dp > 0:
            s_alt, wrap = (s_main + W) % HW, (w_pos >= W - dp)
        elif dp < 0:
            s_alt, wrap = (s_main - W) % HW, (w_pos < -dp)
        else:
            s_alt, wrap = None, None
        if d > 0:
            valid = w_pos < W - d                   # unfold zero padding
        elif d < 0:
            valid = w_pos >= -d
        else:
            valid = None
        taps.append((s_main, s_alt, wrap, valid))

    def body(n, carry):
        xs = x_ref[n]                               # (C, HW) f32
        # f32 matmul as three guaranteed-single-pass bf16 MXU contractions.
        x_hi = xs.astype(jnp.bfloat16)
        x_lo = (xs - x_hi.astype(jnp.float32)).astype(jnp.bfloat16)
        z = jnp.dot(w_hi, x_hi, preferred_element_type=jnp.float32)
        z = z + jnp.dot(w_hi, x_lo, preferred_element_type=jnp.float32)
        z = z + jnp.dot(w_lo, x_hi, preferred_element_type=jnp.float32)

        acc = None
        for k, (s_main, s_alt, wrap, valid) in enumerate(taps):
            zk = z[k * J:(k + 1) * J, :]            # (32, 784) aligned row slice
            g = pltpu.roll(zk, s_main, axis=1)
            if s_alt is not None:
                g = jnp.where(wrap, pltpu.roll(zk, s_alt, axis=1), g)
            if valid is not None:
                g = jnp.where(valid, g, 0.0)
            acc = g if acc is None else acc + g
        o_ref[n] = acc
        return carry

    jax.lax.fori_loop(0, BLK, body, 0)


def forward(x, weight):
    """Pallas equivalent of kernel_generated_1.forward.  x: (N, C, H, W) f32."""
    xf = x.reshape(N, C, HW)                        # free reshape; NCHW stays put
    # (J, KK, C) -> (KK*J, C): tap-major rows so each tap is an aligned 32-row
    # slice of the fused (96, 128) x (128, 784) matmul result.
    w96 = jnp.transpose(weight, (1, 0, 2)).reshape(KK * J, C)
    w_hi = w96.astype(jnp.bfloat16)
    w_lo = (w96 - w_hi.astype(jnp.float32)).astype(jnp.bfloat16)

    out = pl.pallas_call(
        _conv_kernel,
        out_shape=jax.ShapeDtypeStruct((N, J, HW), jnp.float32),
        grid_spec=pltpu.PrefetchScalarGridSpec(
            num_scalar_prefetch=0,
            grid=(N // BLK,),
            in_specs=[
                pl.BlockSpec((BLK, C, HW), lambda i: (i, 0, 0)),
                pl.BlockSpec((KK * J, C), lambda i: (0, 0)),
                pl.BlockSpec((KK * J, C), lambda i: (0, 0)),
            ],
            out_specs=pl.BlockSpec((BLK, J, HW), lambda i: (i, 0, 0)),
        ),
        compiler_params=pltpu.CompilerParams(
            dimension_semantics=("parallel",),
            vmem_limit_bytes=40 * 1024 * 1024,
        ),
    )(xf, w_hi, w_lo)

    return out.reshape(N, J, H, W)                  # free reshape; already NCHW


def reference(x, weight):
    """Direct jnp transcription of the torch module (verification only)."""
    xr = jnp.roll(x, SHIFT, axis=3)
    xp = jnp.pad(xr, ((0, 0), (0, 0), (0, 0), (1, 1)))
    cols = jnp.stack([xp[..., k:k + W] for k in range(KK)], axis=2)  # (N, C, 3, H, W)
    y = jnp.einsum('nckhw,jkc->njhw', cols, weight,
                   precision=jax.lax.Precision.HIGHEST)
    return jnp.roll(y, SHIFT, axis=2)


if __name__ == "__main__":
    key = jax.random.PRNGKey(0)
    kx, kw = jax.random.split(key)
    # Shapes are fixed by the module's hard-coded reshapes: (128, 128, 28, 28).
    x = jax.random.normal(kx, (N, C, H, W), dtype=jnp.float32)
    weight = jax.random.normal(kw, (J, KK, C), dtype=jnp.float32)

    y = jax.jit(forward)(x, weight)
    jax.block_until_ready(y)
    assert y.shape == (N, J, H, W) and y.dtype == jnp.float32

    y_ref = reference(x, weight)
    np.testing.assert_allclose(np.asarray(y), np.asarray(y_ref), rtol=2e-2, atol=2e-2)
    print("KERNEL_OK")
</pallas_src>

<mosaic_0001>
module attributes {stable_mosaic.version = 11 : i64} {
  func.func @_conv_kernel(%arg0: i32, %arg1: memref<16x128x784xf32, #tpu.memory_space<vmem>>, %arg2: memref<96x128xbf16, #tpu.memory_space<vmem>>, %arg3: memref<96x128xbf16, #tpu.memory_space<vmem>>, %arg4: memref<16x32x784xf32, #tpu.memory_space<vmem>>) attributes {dimension_semantics = [#tpu.dimension_semantics<parallel>], iteration_bounds = array<i64: 8>, scalar_prefetch = 0 : i64, scratch_operands = 0 : i64, tpu.core_type = #tpu.core_type<tc>, window_params = [{transform_indices = @transform_0, window_bounds = array<i64: 16, 128, 784>}, {pipeline_mode = #tpu.pipeline_mode<synchronous>, transform_indices = @transform_1, window_bounds = array<i64: 96, 128>}, {pipeline_mode = #tpu.pipeline_mode<synchronous>, transform_indices = @transform_2, window_bounds = array<i64: 96, 128>}, {transform_indices = @transform_3, window_bounds = array<i64: 16, 32, 784>}]} {
    %c0 = arith.constant 0 : index
    %c0_0 = arith.constant 0 : index
    %0 = vector.load %arg2[%c0, %c0_0] : memref<96x128xbf16, #tpu.memory_space<vmem>>, vector<96x128xbf16>
    %c0_1 = arith.constant 0 : index
    %c0_2 = arith.constant 0 : index
    %1 = vector.load %arg3[%c0_1, %c0_2] : memref<96x128xbf16, #tpu.memory_space<vmem>>, vector<96x128xbf16>
    %2 = tpu.iota {dimensions = array<i32: 1>} : vector<1x784xi32>
    %c28_i32 = arith.constant 28 : i32
    %c0_i32 = arith.constant 0 : i32
    %3 = arith.cmpi eq, %c28_i32, %c0_i32 : i32
    %c1_i32 = arith.constant 1 : i32
    %4 = arith.select %3, %c1_i32, %c28_i32 : i32
    %5 = vector.broadcast %4 : i32 to vector<1x784xi32>
    %6 = arith.remsi %2, %5 : vector<1x784xi32>
    %c0_i32_3 = arith.constant 0 : i32
    %7 = vector.broadcast %c0_i32_3 : i32 to vector<1x784xi32>
    %8 = arith.cmpi ne, %6, %7 : vector<1x784xi32>
    %c0_i32_4 = arith.constant 0 : i32
    %9 = vector.broadcast %c0_i32_4 : i32 to vector<1x784xi32>
    %10 = arith.cmpi slt, %6, %9 : vector<1x784xi32>
    %c0_i32_5 = arith.constant 0 : i32
    %11 = arith.cmpi slt, %4, %c0_i32_5 : i32
    %12 = vector.broadcast %11 : i1 to vector<1x784xi1>
    %13 = vector.broadcast %12 : vector<1x784xi1> to vector<1x784xi1>
    %14 = arith.xori %10, %13 : vector<1x784xi1>
    %15 = arith.andi %14, %8 : vector<1x784xi1>
    %16 = vector.broadcast %4 : i32 to vector<1x784xi32>
    %17 = arith.addi %6, %16 : vector<1x784xi32>
    %18 = arith.select %15, %17, %6 : vector<1x784xi1>, vector<1x784xi32>
    %c2_i32 = arith.constant 2 : i32
    %19 = vector.broadcast %c2_i32 : i32 to vector<1x784xi32>
    %20 = arith.cmpi slt, %18, %19 : vector<1x784xi32>
    %c1_i32_6 = arith.constant 1 : i32
    %21 = vector.broadcast %c1_i32_6 : i32 to vector<1x784xi32>
    %22 = arith.cmpi sge, %18, %21 : vector<1x784xi32>
    %c1_i32_7 = arith.constant 1 : i32
    %23 = vector.broadcast %c1_i32_7 : i32 to vector<1x784xi32>
    %24 = arith.cmpi slt, %18, %23 : vector<1x784xi32>
    %c27_i32 = arith.constant 27 : i32
    %25 = vector.broadcast %c27_i32 : i32 to vector<1x784xi32>
    %26 = arith.cmpi slt, %18, %25 : vector<1x784xi32>
    %c0_i32_8 = arith.constant 0 : i32
    %c16_i32 = arith.constant 16 : i32
    %27 = arith.addi %c0_i32_8, %c16_i32 : i32
    %c1_i32_9 = arith.constant 1 : i32
    scf.for %arg5 = %c0_i32_8 to %27 step %c1_i32_9  : i32 {
      %28 = arith.index_cast %arg5 : i32 to index
      %c0_11 = arith.constant 0 : index
      %c0_12 = arith.constant 0 : index
      %29 = vector.load %arg1[%28, %c0_11, %c0_12] : memref<16x128x784xf32, #tpu.memory_space<vmem>>, vector<1x128x784xf32>
      %30 = vector.shape_cast %29 : vector<1x128x784xf32> to vector<128x784xf32>
      %31 = arith.truncf %30 : vector<128x784xf32> to vector<128x784xbf16>
      %32 = arith.extf %31 : vector<128x784xbf16> to vector<128x784xf32>
      %33 = arith.subf %30, %32 : vector<128x784xf32>
      %34 = arith.truncf %33 : vector<128x784xf32> to vector<128x784xbf16>
      %cst = arith.constant dense<0.000000e+00> : vector<96x784xf32>
      %35 = tpu.matmul %0, %31, %cst {dimension_numbers = #tpu.dot_dimension_numbers<[1], [0], [0], [1], [0, 0, 1, 1], [], []>} : vector<96x128xbf16>, vector<128x784xbf16>, vector<96x784xf32> -> vector<96x784xf32>
      %cst_13 = arith.constant dense<0.000000e+00> : vector<96x784xf32>
      %36 = tpu.matmul %0, %34, %cst_13 {dimension_numbers = #tpu.dot_dimension_numbers<[1], [0], [0], [1], [0, 0, 1, 1], [], []>} : vector<96x128xbf16>, vector<128x784xbf16>, vector<96x784xf32> -> vector<96x784xf32>
      %37 = arith.addf %35, %36 : vector<96x784xf32>
      %cst_14 = arith.constant dense<0.000000e+00> : vector<96x784xf32>
      %38 = tpu.matmul %1, %31, %cst_14 {dimension_numbers = #tpu.dot_dimension_numbers<[1], [0], [0], [1], [0, 0, 1, 1], [], []>} : vector<96x128xbf16>, vector<128x784xbf16>, vector<96x784xf32> -> vector<96x784xf32>
      %39 = arith.addf %37, %38 : vector<96x784xf32>
      %40 = vector.extract_strided_slice %39 {offsets = [0, 0], sizes = [32, 784], strides = [1, 1]} : vector<96x784xf32> to vector<32x784xf32>
      %c30_i32 = arith.constant 30 : i32
      %41 = tpu.dynamic_rotate %40 by %c30_i32 dim 1 : vector<32x784xf32>, i32 -> vector<32x784xf32>
      %c2_i32_15 = arith.constant 2 : i32
      %42 = tpu.dynamic_rotate %40 by %c2_i32_15 dim 1 : vector<32x784xf32>, i32 -> vector<32x784xf32>
      %43 = vector.shape_cast %20 : vector<1x784xi1> to vector<1x784xi1>
      %44 = vector.broadcast %43 : vector<1x784xi1> to vector<32x784xi1>
      %45 = arith.select %44, %42, %41 : vector<32x784xi1>, vector<32x784xf32>
      %cst_16 = arith.constant 0.000000e+00 : f32
      %46 = vector.shape_cast %22 : vector<1x784xi1> to vector<1x784xi1>
      %47 = vector.broadcast %46 : vector<1x784xi1> to vector<32x784xi1>
      %48 = vector.broadcast %cst_16 : f32 to vector<32x784xf32>
      %49 = arith.select %47, %45, %48 : vector<32x784xi1>, vector<32x784xf32>
      %50 = vector.extract_strided_slice %39 {offsets = [32, 0], sizes = [32, 784], strides = [1, 1]} : vector<96x784xf32> to vector<32x784xf32>
      %c29_i32 = arith.constant 29 : i32
      %51 = tpu.dynamic_rotate %50 by %c29_i32 dim 1 : vector<32x784xf32>, i32 -> vector<32x784xf32>
      %c1_i32_17 = arith.constant 1 : i32
      %52 = tpu.dynamic_rotate %50 by %c1_i32_17 dim 1 : vector<32x784xf32>, i32 -> vector<32x784xf32>
      %53 = vector.shape_cast %24 : vector<1x784xi1> to vector<1x784xi1>
      %54 = vector.broadcast %53 : vector<1x784xi1> to vector<32x784xi1>
      %55 = arith.select %54, %52, %51 : vector<32x784xi1>, vector<32x784xf32>
      %56 = arith.addf %49, %55 : vector<32x784xf32>
      %57 = vector.extract_strided_slice %39 {offsets = [64, 0], sizes = [32, 784], strides = [1, 1]} : vector<96x784xf32> to vector<32x784xf32>
      %c28_i32_18 = arith.constant 28 : i32
      %58 = tpu.dynamic_rotate %57 by %c28_i32_18 dim 1 : vector<32x784xf32>, i32 -> vector<32x784xf32>
      %cst_19 = arith.constant 0.000000e+00 : f32
      %59 = vector.shape_cast %26 : vector<1x784xi1> to vector<1x784xi1>
      %60 = vector.broadcast %59 : vector<1x784xi1> to vector<32x784xi1>
      %61 = vector.broadcast %cst_19 : f32 to vector<32x784xf32>
      %62 = arith.select %60, %58, %61 : vector<32x784xi1>, vector<32x784xf32>
      %63 = arith.addf %56, %62 : vector<32x784xf32>
      %64 = arith.index_cast %arg5 : i32 to index
      %c0_20 = arith.constant 0 : index
      %c0_21 = arith.constant 0 : index
      %65 = vector.load %arg4[%64, %c0_20, %c0_21] : memref<16x32x784xf32, #tpu.memory_space<vmem>>, vector<1x32x784xf32>
      %66 = vector.shape_cast %65 : vector<1x32x784xf32> to vector<32x784xf32>
      %67 = vector.shape_cast %63 : vector<32x784xf32> to vector<1x32x784xf32>
      tpu.vector_store %arg4[%64, %c0_20, %c0_21], %67 {strides = array<i32>} : memref<16x32x784xf32, #tpu.memory_space<vmem>>, vector<1x32x784xf32>,
    }
    %c16_i32_10 = arith.constant 16 : i32
    return
  }
  func.func @transform_0(%arg0: i32) -> (i32, i32, i32) {
    %c0_i32 = arith.constant 0 : i32
    %c0_i32_0 = arith.constant 0 : i32
    %c0_i32_1 = arith.constant 0 : i32
    return %arg0, %c0_i32, %c0_i32_0 : i32, i32, i32
  }
  func.func @transform_1(%arg0: i32) -> (i32, i32) {
    %c0_i32 = arith.constant 0 : i32
    %c0_i32_0 = arith.constant 0 : i32
    %c0_i32_1 = arith.constant 0 : i32
    return %c0_i32, %c0_i32_0 : i32, i32
  }
  func.func @transform_2(%arg0: i32) -> (i32, i32) {
    %c0_i32 = arith.constant 0 : i32
    %c0_i32_0 = arith.constant 0 : i32
    %c0_i32_1 = arith.constant 0 : i32
    return %c0_i32, %c0_i32_0 : i32, i32
  }
  func.func @transform_3(%arg0: i32) -> (i32, i32, i32) {
    %c0_i32 = arith.constant 0 : i32
    %c0_i32_0 = arith.constant 0 : i32
    %c0_i32_1 = arith.constant 0 : i32
    return %arg0, %c0_i32, %c0_i32_0 : i32, i32, i32
  }
}

</mosaic_0001>

<bundles_post_ra>
// kernel: forward.1
= control target key start
LH: loop header
LB: loop body
LE: loop exit
PB: predicated region body
PF: predicated region fallthrough
CT: control target
= control target key end

     0   :  { %8 = vsyncpa [#allocation3], 0  ;;  %s6501_s0 = inlined_call_operand.hbm [shape: f32[128,128,784], index: 0, kind: input, shape index: {}]   ;;  %s6502_s1 = inlined_call_operand.vmem [shape: bf16[96,128], index: 1, kind: input, shape index: {}]   ;;  %s6503_s2 = inlined_call_operand.vmem [shape: bf16[96,128], index: 2, kind: input, shape index: {}]   ;;  %s6504_s3 = inlined_call_operand.vmem [shape: f32[128,32,784], index: 3, kind: output, shape index: {}]  }
   0x1   :  { %10 = vsyncpa [#allocation3 + $0x1], 0  ;;  %s3865_s12 = smov 0   ;;  %s3867_s13 = smov 0  }
   0x2   :  { %s3869_s14 = smov 0   ;;  %s3871_s15 = smov 0  }
   0x3 LB: > { %s3347_s16 = sadd.s32 4294967295, %s3828_s15   ;;  %s3885_s17 = sadd.s32 1, %s3828_s15   ;;  %s3828_s15 = sphi %s3871_s15, %s6879_s15   ;;  %s3824_s14 = sphi %s3869_s14, %s6878_s14   ;;  %s3820_s13 = sphi %s3867_s13, %s6877_s13   ;;  %s3816_s12 = sphi %s3865_s12, %s6876_s12  }
   0x4   : > { %s20_s18 = ssub.s32 %s3828_s15, %s3885_s17  ;;  %s23_s19 = sadd.s32 1, %s3824_s14 }
   0x5   : > { %p21_p0 = scmp.eq.s32.totalorder %s20_s18, 0  ;;  %p30_p1 = scmp.ne.s32.totalorder %s3824_s14, %s3820_s13 }
   0x6   : > { %p31_p2 = scmp.eq.s32.totalorder %s3828_s15, 0  ;;  %p36_p3 = scmp.ne.s32.totalorder %s3820_s13, %s3816_s12 }
   0x7   : > { %s3895_s20 = scalar_select %p21_p0, %s3824_s14, %s23_s19  }
   0x8   : > { %p32_p4 = por %p31_p2, %p30_p1  ;;  %p37_p5 = scmp.eq.s32.totalorder %s3347_s16, 0 }
   0x9   : > { %p3709_p6 = scmp.lt.s32.totalorder %s3828_s15, 8  ;;  %s134_s22 = sand.u32 1, %s3824_s14  }
   0xa   : > { %p3900_p7 = por %p37_p5, %p36_p3  ;;  %s3685_s23 = smul.u32 14336, %s134_s22 }
   0xb   : > { %s3686_s24 = smul.u32 229376, %s3828_s15  ;;  %p3906_p8 = pnand %p3709_p6, %p32_p4 }
   0xc   : > { %s138_s29 = scalar_lea.vmem [#allocation2], %s3685_s23  ;;  %s3918_s4 = scalar_lea.sflag [#allocation3], %s134_s22 }
   0xd   : > { %s3913_s28 = scalar_lea.hbm %s6501_s0, %s3686_s24  ;;  %s146_s30 = sshll.u32 %s138_s29, 4  ;;  %s3915_s30 = int_to_ptr.vmem [resolvable:$true] %s146_s30 }
   0xe   : > { %s3760_s5 = scalar_lea.hbm %s3913_s28, 229376  ;;  %p3762_p11 = pneg %p3906_p8 }
   0xf   : > { %p3761_p10 = scmp.ne.s32.totalorder %s3913_s28, %s3760_s5  ;;  %s3765_s8 = scalar_lea.hbm %s6501_s0, 1835008 }
  0x10   : > { %p3766_p0 = scmp.lt.u32.totalorder %s3913_s28, %s6501_s0  ;;  %p3767_p1 = scmp.lt.u32.totalorder %s3765_s8, %s3760_s5 }
  0x11   : > { %p3763_p12 = pnand %p3762_p11, %p3761_p10  ;;  %p3769_p3 = scmp.lt.u32.totalorder %s3760_s5, %s3913_s28 }
  0x12   : > { %p3768_p2 = por %p3767_p1, %p3766_p0 }
  0x13   : > { %p3764_p13 = pneg %p3763_p12 }
  0x14   : > { %p3770_p4 = por %p3769_p3, %p3768_p2 }
  0x16   : > { %p3771_p5 = pnand %p3770_p4, %p3764_p13 }
  0x18   : > { %3774 = shalt.err (!%p3771_p5)
}
  0x19   : > { %s3775_s11 = scalar_lea.vmem %s3915_s30, 229376  ;;  %s3834_s12 = smov [#allocation2]  }
  0x1a   : > { %p3776_p6 = scmp.ne.s32.totalorder %s3915_s30, %s3775_s11  ;;  %s3780_s18 = sshll.u32 %s3834_s12, 4  ;;  %s3781_s18 = int_to_ptr.vmem [resolvable:$false] %s3780_s18 }
  0x1b   : > { %s3782_s19 = scalar_lea.vmem %s3781_s18, 458752  ;;  %p3783_p9 = scmp.lt.s32.totalorder %s3915_s30, %s3781_s18 }
  0x1c   : > { %p3778_p10 = pnand %p3776_p6, %p3762_p11  ;;  %p3784_p0 = scmp.lt.s32.totalorder %s3782_s19, %s3775_s11 }
  0x1e   : > { %p3779_p12 = pneg %p3778_p10  ;;  %p3785_p1 = por %p3784_p0, %p3783_p9 }
  0x20   : > { %p3786_p2 = pnand %p3785_p1, %p3779_p12 }
  0x22   : > { %3789 = shalt.err (!%p3786_p2)
}
  0x23   : > { %s3835_s22 = smov 896   ;;  %s3836_s23 = smov 56  }
  0x24   : > { %3708 = dma.hbm_to_vmem [thread:$0]  (!%p3906_p8), %s3913_s28, 229376, %s3915_s30, %s3918_s4, %s3835_s22, %s3835_s22, %s3836_s23  }
  0x25   : > { %p154_p11 = scmp.lt.s32.totalorder %s3828_s15, 9  ;;  %p6605_p13 = scmp.ge.s32.totalorder %s3828_s15, 1 }
  0x27   : > { %p155_p3 = pnand %p6605_p13, %p154_p11 }
  0x28   : > { %s160_s24 = sand.u32 (!%p155_p3), 1, %s3820_s13  }
  0x29   : > { %158 = sbr.rel (%p155_p3) target bundleno = 1125 (0x465), region = 32  ;;  %s161_s27 = scalar_lea.sflag (!%p155_p3), [#allocation3], %s160_s24 }
  0x2a   : > { %s3950_s26 = smul.u32 (!%p155_p3), 14336, %s160_s24 }
  0x2c   : > { %s164_s29 = scalar_lea.vmem (!%p155_p3), [#allocation2], %s3950_s26 }
  0x30   : > { %3811 = dma.done.wait (%p3900_p7), %s161_s27, 229376  }
  0x31   : > { %3813 = vsyncadd (%p3900_p7), %s161_s27, 4294737920  ;;  %s3355_s25 = sshll.u32 %s3347_s16, 4  ;;  %v221_v0 = vlaneseq  ;;  %v3993_v12 = vld [vmem:[%s6502_s1] sm:$0xf]  ;;  %v3998_v13 = vld [vmem:[%s6502_s1 + $0x4] sm:$0xf] }
  0x32   : > { %p190_p8 = scmp.lt.s32.totalorder %s3355_s25, 127  ;;  %6606 = vst [vmem:[#allocation5_spill] sm:$0xff] %v3993_v12  ;;  %6607 = vst [vmem:[#allocation6_spill] sm:$0xff] %v3998_v13  ;;  %v4003_v14 = vld [vmem:[%s6502_s1 + $0x8] sm:$0xf]  ;;  %v3837_v37 = vmov 0  }
  0x33   : > { %v3959_v1 = vand.u32 127, %v221_v0  ;;  %6608 = vst [vmem:[#allocation7_spill] sm:$0xff] %v4003_v14  ;;  %v4008_v15 = vld [vmem:[%s6502_s1 + $0xc] sm:$0xf]  ;;  %v4013_v16 = vld [vmem:[%s6502_s1 + $0x10] sm:$0xf] }
  0x34   : > { %s6881_s25 = smov (!%p190_p8, %s3355_s25), 127  ;;  %6609 = vst [vmem:[#allocation8_spill] sm:$0xff] %v4008_v15  ;;  %6610 = vst [vmem:[#allocation9_spill] sm:$0xff] %v4013_v16  ;;  %v4018_v17 = vld [vmem:[%s6502_s1 + $0x14] sm:$0xf]  ;;  %s4200_s11 = smov 0  }
  0x35   : > { %v3962_v2 = vadd.s32 128, %v3959_v1  ;;  %v3965_v3 = vadd.s32 256, %v3959_v1  ;;  %s3688_s28 = smul.u32 224, %s6881_s25  ;;  %v3968_v4 = vadd.s32 384, %v3959_v1  ;;  %v3971_v5 = vadd.s32 512, %v3959_v1  ;;  %6611 = vst [vmem:[#allocation10_spill] sm:$0xff] %v4018_v17 }
  0x36   : > { %v3974_v6 = vmul.u32.u64.low 2454267026, %v3959_v1  ;;  %v3975_v7 = vmul.u32.u64.high 2454267026, %v3959_v1, %v3974_v6  ;;  %v4023_v18 = vld [vmem:[%s6502_s1 + $0x18] sm:$0xf]  ;;  %v4028_v19 = vld [vmem:[%s6502_s1 + $0x1c] sm:$0xf] }
  0x37   : > { %v3978_v8 = vmul.u32.u64.low 2454267026, %v3962_v2  ;;  %v3979_v9 = vmul.u32.u64.high 2454267026, %v3962_v2, %v3978_v8  ;;  %v3982_v10 = vmul.u32.u64.low 2454267026, %v3965_v3  ;;  %v3983_v11 = vmul.u32.u64.high 2454267026, %v3965_v3, %v3982_v10  ;;  %s3988_s21 = scalar_lea.vmem %s6504_s3, %s3688_s28  ;;  %6612 = vst [vmem:[#allocation11_spill] sm:$0xff] %v4023_v18  ;;  %6613 = vst [vmem:[#allocation12_spill] sm:$0xff] %v4028_v19 }
  0x38   : > { %v4033_v20 = vld [vmem:[%s6502_s1 + $0x20] sm:$0xf]  ;;  %v4038_v21 = vld [vmem:[%s6502_s1 + $0x24] sm:$0xf]  ;;  %v4043_v22 = vld [vmem:[%s6502_s1 + $0x28] sm:$0xf] }
  0x39   : > { %6614 = vst [vmem:[#allocation13_spill] sm:$0xff] %v4033_v20  ;;  %6615 = vst [vmem:[#allocation14_spill] sm:$0xff] %v4038_v21  ;;  %v4048_v23 = vld [vmem:[%s6502_s1 + $0x2c] sm:$0xf]  ;;  %v4053_v24 = vld [vmem:[%s6503_s2] sm:$0xf] }
  0x3a   : > { %6616 = vst [vmem:[#allocation15_spill] sm:$0xff] %v4043_v22  ;;  %6617 = vst [vmem:[#allocation16_spill] sm:$0xff] %v4048_v23  ;;  %v4058_v25 = vld [vmem:[%s6503_s2 + $0x4] sm:$0xf]  ;;  %v4063_v26 = vld [vmem:[%s6503_s2 + $0x8] sm:$0xf] }
  0x3b   : > { %6618 = vst [vmem:[#allocation17_spill] sm:$0xff] %v4053_v24  ;;  %6619 = vst [vmem:[#allocation18_spill] sm:$0xff] %v4058_v25  ;;  %v4068_v27 = vld [vmem:[%s6503_s2 + $0xc] sm:$0xf]  ;;  %v4073_v28 = vld [vmem:[%s6503_s2 + $0x10] sm:$0xf] }
  0x3c   : > { %6620 = vst [vmem:[#allocation19_spill] sm:$0xff] %v4063_v26  ;;  %6621 = vst [vmem:[#allocation20_spill] sm:$0xff] %v4068_v27  ;;  %v4078_v29 = vld [vmem:[%s6503_s2 + $0x14] sm:$0xf]  ;;  %v4083_v30 = vld [vmem:[%s6503_s2 + $0x18] sm:$0xf] }
  0x3d   : > { %6622 = vst [vmem:[#allocation21_spill] sm:$0xff] %v4073_v28  ;;  %6623 = vst [vmem:[#allocation22_spill] sm:$0xff] %v4078_v29  ;;  %v4088_v31 = vld [vmem:[%s6503_s2 + $0x1c] sm:$0xf]  ;;  %v4093_v32 = vld [vmem:[%s6503_s2 + $0x20] sm:$0xf] }
  0x3e   : > { %6624 = vst [vmem:[#allocation23_spill] sm:$0xff] %v4083_v30  ;;  %6625 = vst [vmem:[#allocation24_spill] sm:$0xff] %v4088_v31  ;;  %v4098_v33 = vld [vmem:[%s6503_s2 + $0x24] sm:$0xf]  ;;  %v4103_v34 = vld [vmem:[%s6503_s2 + $0x28] sm:$0xf] }
  0x3f   : > { %6626 = vst [vmem:[#allocation25_spill] sm:$0xff] %v4093_v32  ;;  %6627 = vst [vmem:[#allocation26_spill] sm:$0xff] %v4098_v33  ;;  %v4108_v35 = vld [vmem:[%s6503_s2 + $0x2c] sm:$0xf]  ;;  %vm235_vm0 = vc.u32 %v3974_v6, 2454267026 }
  0x40   : > { %6628 = vst [vmem:[#allocation27_spill] sm:$0xff] %v4103_v34  ;;  %6629 = vst [vmem:[#allocation28_spill] sm:$0xff] %v4108_v35  ;;  %vm249_vm1 = vc.u32 %v3978_v8, 2454267026  ;;  %vm263_vm2 = vc.u32 %v3982_v10, 2454267026 }
  0x41   : > { %v227_v36 = vadd.s32 640, %v3959_v1  ;;  %v236_v38 = vsel %vm235_vm0, 1, %v3837_v37  ;;  %v250_v39 = vsel %vm249_vm1, 1, %v3837_v37  ;;  %v264_v40 = vsel %vm263_vm2, 1, %v3837_v37 }
  0x42   : > { %v237_v41 = vadd.s32 %v3975_v7, %v236_v38  ;;  %v251_v42 = vadd.s32 %v3979_v9, %v250_v39  ;;  %v265_v43 = vadd.s32 %v3983_v11, %v264_v40  ;;  %v4123_v48 = vadd.s32 768, %v3959_v1 }
  0x43   : > { %v4115_v44 = vmul.u32.u64.low 2454267026, %v3968_v4  ;;  %v4116_v45 = vmul.u32.u64.high 2454267026, %v3968_v4, %v4115_v44  ;;  %v4119_v46 = vmul.u32.u64.low 2454267026, %v3971_v5  ;;  %v4120_v47 = vmul.u32.u64.high 2454267026, %v3971_v5, %v4119_v46 }
  0x44   : > { %v238_v49 = vshrl.u32 %v237_v41, 4  ;;  %v252_v50 = vshrl.u32 %v251_v42, 4  ;;  %v266_v51 = vshrl.u32 %v265_v43, 4 }
  0x45   : > { %vm277_vm3 = vc.u32 %v4115_v44, 2454267026  ;;  %vm291_vm4 = vc.u32 %v4119_v46, 2454267026  ;;  %v4125_v52 = vmul.u32.u64.low 2454267026, %v227_v36  ;;  %v4126_v53 = vmul.u32.u64.high 2454267026, %v227_v36, %v4125_v52 }
  0x46   : > { %v239_v54 = vmul.u32 28, %v238_v49  ;;  %v253_v55 = vmul.u32 28, %v252_v50  ;;  %v278_v56 = vsel %vm277_vm3, 1, %v3837_v37  ;;  %v292_v57 = vsel %vm291_vm4, 1, %v3837_v37 }
  0x47   : > { %v267_v58 = vmul.u32 28, %v266_v51  ;;  %v279_v59 = vadd.s32 %v4116_v45, %v278_v56  ;;  %v293_v60 = vadd.s32 %v4120_v47, %v292_v57  ;;  %vm305_vm5 = vc.u32 %v4125_v52, 2454267026 }
  0x48   : > { %v240_v61 = vsub.s32 %v3959_v1, %v239_v54  ;;  %v254_v62 = vsub.s32 %v3962_v2, %v253_v55  ;;  %v306_v63 = vsel %vm305_vm5, 1, %v3837_v37 }
  0x49   : > { %v268_v0 = vsub.s32 %v3965_v3, %v267_v58  ;;  %v280_v6 = vshrl.u32 %v279_v59, 4  ;;  %v294_v7 = vshrl.u32 %v293_v60, 4  ;;  %v307_v8 = vadd.s32 %v4126_v53, %v306_v63 }
  0x4a   : > { %v4135_v9 = vmul.u32.u64.low 2454267026, %v4123_v48  ;;  %v4136_v10 = vmul.u32.u64.high 2454267026, %v4123_v48, %v4135_v9  ;;  %vm327_vm6 = vcmp.ne.s32.totalorder %v240_v61, 0  ;;  %vm328_vm7 = vcmp.ne.s32.totalorder %v254_v62, 0 }
  0x4b   : > { %v281_v11 = vmul.u32 28, %v280_v6  ;;  %v295_v38 = vmul.u32 28, %v294_v7  ;;  %v308_v39 = vshrl.u32 %v307_v8, 4  ;;  %vm329_vm8 = vcmp.ne.s32.totalorder %v268_v0, 0 }
  0x4c   : > { %vm319_vm9 = vc.u32 %v4135_v9, 2454267026  ;;  %vm334_vm10 = vcmp.lt.s32.totalorder %v240_v61, 0  ;;  %vm335_vm11 = vcmp.lt.s32.totalorder %v254_v62, 0  ;;  %vm336_vm12 = vcmp.lt.s32.totalorder %v268_v0, 0 }
  0x4d   : > { %v282_v1 = vsub.s32 %v3968_v4, %v281_v11  ;;  %v296_v2 = vsub.s32 %v3971_v5, %v295_v38  ;;  %v309_v3 = vmul.u32 28, %v308_v39  ;;  %v320_v40 = vsel %vm319_vm9, 1, %v3837_v37  ;;  %vm4141_vm13 = vmand %vm334_vm10, %vm327_vm6 }
  0x4e   : > { %v321_v42 = vadd.s32 %v4136_v10, %v320_v40  ;;  %vm4147_vm14 = vmand %vm335_vm11, %vm328_vm7  ;;  %v348_v44 = vadd.s32 28, %v240_v61  ;;  %v349_v45 = vadd.s32 28, %v254_v62  ;;  %v350_v46 = vadd.s32 28, %v268_v0 }
  0x4f   : > { %v310_v4 = vsub.s32 %v227_v36, %v309_v3  ;;  %vm330_vm15 = vcmp.ne.s32.totalorder %v282_v1, 0  ;;  %vm331_vm0 = vcmp.ne.s32.totalorder %v296_v2, 0  ;;  %vm337_vm1 = vcmp.lt.s32.totalorder %v282_v1, 0  ;;  %vm343_vm2 = vmand %vm336_vm12, %vm329_vm8 }
  0x50   : > { %v322_v5 = vshrl.u32 %v321_v42, 4  ;;  %vm338_vm3 = vcmp.lt.s32.totalorder %v296_v2, 0  ;;  %vm344_vm4 = vmand %vm337_vm1, %vm330_vm15  ;;  %v351_v37 = vadd.s32 28, %v282_v1  ;;  %v352_v47 = vadd.s32 28, %v296_v2 }
  0x51   : > { %vm332_vm5 = vcmp.ne.s32.totalorder %v310_v4, 0  ;;  %vm339_vm6 = vcmp.lt.s32.totalorder %v310_v4, 0  ;;  %vm345_vm7 = vmand %vm338_vm3, %vm331_vm0  ;;  %v353_v49 = vadd.s32 28, %v310_v4  ;;  %v4155_v50 = vsel %vm4141_vm13, %v348_v44, %v240_v61 }
  0x52   : > { %6634 = vst [vmem:[#allocation29_spill] sm:$0xff] %v4155_v50  ;;  %v323_v36 = vmul.u32 28, %v322_v5  ;;  %vm346_vm9 = vmand %vm339_vm6, %vm332_vm5  ;;  %v4159_v51 = vsel %vm4147_vm14, %v349_v45, %v254_v62  ;;  %v4161_v52 = vsel %vm343_vm2, %v350_v46, %v268_v0  ;;  %v4163_v53 = vsel %vm344_vm4, %v351_v37, %v282_v1 }
  0x53   : > { %6635 = vst [vmem:[#allocation30_spill] sm:$0xff] %v4159_v51  ;;  %6636 = vst [vmem:[#allocation31_spill] sm:$0xff] %v4161_v52  ;;  %v4165_v54 = vsel %vm345_vm7, %v352_v47, %v296_v2  ;;  %v4167_v55 = vsel %vm346_vm9, %v353_v49, %v310_v4  ;;  %vm363_vm10 = vcmp.lt.s32.totalorder %v4159_v51, 2  ;;  %vm364_vm11 = vcmp.lt.s32.totalorder %v4161_v52, 2 }
  0x54   : > { %6637 = vst [vmem:[#allocation32_spill] sm:$0xff] %v4163_v53  ;;  %6638 = vst [vmem:[#allocation33_spill] sm:$0xff] %v4165_v54  ;;  %v324_v56 = vsub.s32 %v4123_v48, %v323_v36  ;;  %vm369_vm15 = vcmp.ge.s32.totalorder %v4155_v50, 1  ;;  %vm377_vm14 = vcmp.lt.s32.totalorder %v4159_v51, 1  ;;  %vm386_vm13 = vcmp.lt.s32.totalorder %v4163_v53, 27 }
  0x55   : > { %6639 = vst [vmem:[#allocation34_spill] sm:$0xff] %v4167_v55 }
  0x56   : > { %vm333_vm2 = vcmp.ne.s32.totalorder %v324_v56, 0  ;;  %vm340_vm3 = vcmp.lt.s32.totalorder %v324_v56, 0  ;;  %v354_v57 = vadd.s32 28, %v324_v56 }
  0x57   : > { %vm347_vm5 = vmand %vm340_vm3, %vm333_vm2 }
  0x58   : > { %v4184_v48 = vsel %vm347_vm5, %v354_v57, %v324_v56  ;;  %vm385_vm5 = vcmp.lt.s32.totalorder %v4161_v52, 27 }
  0x59   : > { %6640 = vst [vmem:[#allocation35_spill] sm:$0xff] %v4184_v48 }
  0x5a LB: >> { %v6505_v58 = vmov 0   ;;  %s3373_s12 = smul.u32 896, %s3832_s11  ;;  %v6641_v13 = vld [vmem:[#allocation6_spill] sm:$0xff]  ;;  %v6642_v12 = vld [vmem:[#allocation5_spill] sm:$0xff]  ;;  %v6645_v15 = vld [vmem:[#allocation8_spill] sm:$0xff]  ;;  %s3839_s19 = smov 16   ;;  %s3832_s11 = sphi %s4200_s11, %s395_s11  }
  0x5b   : >> { %915 = vmatprep.mubr.bf16.mxu0 %v6505_v58  ;;  %955 = vmatprep.mubr.bf16.mxu1 %v6505_v58  ;;  %v4222_v7 = vcombine.low %v6642_v12, %v6641_v13  ;;  %v6643_v21 = vld [vmem:[#allocation14_spill] sm:$0xff]  ;;  %v6644_v20 = vld [vmem:[#allocation13_spill] sm:$0xff]  ;;  %v6646_v14 = vld [vmem:[#allocation7_spill] sm:$0xff]  ;;  %s3840_s22 = smov 14   ;;  %s3841_s23 = smov 13   ;;  %vm2083_vm0 = vcmask 1047680  }
  0x5c   : >> { %s4210_s18 = scalar_lea.vmem %s164_s29, %s3373_s12 [#allocation2]  ;;  %v4226_v8 = vcombine.low %v6644_v20, %v6643_v21  ;;  %v4230_v9 = vcombine.low %v6646_v14, %v6645_v15  ;;  %v6647_v17 = vld [vmem:[#allocation10_spill] sm:$0xff]  ;;  %v6648_v16 = vld [vmem:[#allocation9_spill] sm:$0xff]  ;;  %v6649_v19 = vld [vmem:[#allocation12_spill] sm:$0xff]  ;;  %s3842_s24 = smov 114   ;;  %vm2266_vm7 = vcmask 932864   ;;  %vm2696_vm2 = vcmask 924672  }
  0x5d   : >> { %v400_v59 = vld [vmem:[%s4210_s18 + $0x8] sm:$0xff]  ;;  %v407_v60 = vld [vmem:[%s4210_s18 + $0x40] sm:$0xff]  ;;  %v406_v63 = vld [vmem:[%s4210_s18 + $0x38] sm:$0xff]  ;;  %v4240_v1 = vcombine.low %v6648_v16, %v6647_v17  ;;  %s3843_s27 = smov 12   ;;  %s3844_s25 = smov 113   ;;  %vm2387_vm1 = vcmask 113664  }
  0x5e   : >> { %v399_v61 = vld [vmem:[%s4210_s18] sm:$0xff]  ;;  %v4215_v62 = vpack.c.bf16 %v407_v60, %v400_v59  ;;  %v414_v0 = vld [vmem:[%s4210_s18 + $0x78] sm:$0xff]  ;;  %v421_v6 = vld [vmem:[%s4210_s18 + $0xb0] sm:$0xff]  ;;  %vm2817_vm3 = vcmask 105472   ;;  %vm3124_vm12 = vcmask 97280   ;;  %s3374_s28 = smul.u32 224, %s3832_s11 }
  0x5f   : >> { %v4232_v10 = vpack.c.bf16 %v406_v63, %v399_v61  ;;  %v4234_v11 = vpack.c.bf16 %v421_v6, %v414_v0  ;;  %v413_v38 = vld [vmem:[%s4210_s18 + $0x70] sm:$0xff]  ;;  %v420_v39 = vld [vmem:[%s4210_s18 + $0xa8] sm:$0xff]  ;;  %v6651_v23 = vld [vmem:[#allocation16_spill] sm:$0xff]  ;;  %s395_s11 = sadd.s32 1, %s3832_s11  }
  0x60   : >> { %v6650_v18 = vld [vmem:[#allocation11_spill] sm:$0xff]  ;;  %v568_v3 = vunpack.c.l.bf16 %v4215_v62  ;;  %v575_v40 = vunpack.c.h.bf16 %v4215_v62  ;;  %v4248_v41 = vpack.c.bf16 %v420_v39, %v413_v38  ;;  %v428_v4 = vld [vmem:[%s4210_s18 + $0xe8] sm:$0xff]  ;;  %v435_v5 = vld [vmem:[%s4210_s18 + $0x120] sm:$0xff]  ;;  %s5614_s15 = scalar_lea.vmem %s3988_s21, %s3374_s28  ;;  %p392_p7 = scmp.ge.s32.totalorder %s395_s11, 16  }
  0x61   : >> { %v4244_v2 = vcombine.low %v6650_v18, %v6649_v19  ;;  %v6652_v22 = vld [vmem:[#allocation15_spill] sm:$0xff]  ;;  %v567_v43 = vunpack.c.l.bf16 %v4232_v10  ;;  %v574_v44 = vunpack.c.h.bf16 %v4232_v10  ;;  %v582_v45 = vunpack.c.l.bf16 %v4234_v11  ;;  %v427_v37 = vld [vmem:[%s4210_s18 + $0xe0] sm:$0xff]  ;;  %v434_v57 = vld [vmem:[%s4210_s18 + $0x118] sm:$0xff] }
  0x62   : >> { %v4252_v42 = vcombine.low %v6652_v22, %v6651_v23  ;;  %v589_v46 = vunpack.c.h.bf16 %v4234_v11  ;;  %v680_v47 = vsub.f32 %v400_v59, %v568_v3  ;;  %v687_v49 = vsub.f32 %v407_v60, %v575_v40  ;;  %v442_v58 = vld [vmem:[%s4210_s18 + $0x158] sm:$0xff]  ;;  %v449_v12 = vld [vmem:[%s4210_s18 + $0x190] sm:$0xff]  ;;  %v448_v18 = vld [vmem:[%s4210_s18 + $0x188] sm:$0xff] }
  0x63   : >> { %v581_v36 = vunpack.c.l.bf16 %v4248_v41  ;;  %v588_v56 = vunpack.c.h.bf16 %v4248_v41  ;;  %v679_v13 = vsub.f32 %v399_v61, %v567_v43  ;;  %v686_v14 = vsub.f32 %v406_v63, %v574_v44  ;;  %v441_v17 = vld [vmem:[%s4210_s18 + $0x150] sm:$0xff]  ;;  %v455_v44 = vld [vmem:[%s4210_s18 + $0x1c0] sm:$0xff]  ;;  %v410_v32 = vld [vmem:[%s4210_s18 + $0x58] sm:$0xff] }
  0x64   : >> { %v694_v15 = vsub.f32 %v414_v0, %v582_v45  ;;  %v701_v16 = vsub.f32 %v421_v6, %v589_v46  ;;  %v792_v19 = vpack.c.bf16 %v687_v49, %v680_v47  ;;  %v4268_v22 = vpack.c.bf16 %v435_v5, %v428_v4  ;;  %v462_v45 = vld [vmem:[%s4210_s18 + $0x1f8] sm:$0xff]  ;;  %v469_v23 = vld [vmem:[%s4210_s18 + $0x230] sm:$0xff]  ;;  %v491_v55 = vld [vmem:[%s4210_s18 + $0x2e0] sm:$0xff] }
  0x65   : >> { %v693_v20 = vsub.f32 %v413_v38, %v581_v36  ;;  %v700_v21 = vsub.f32 %v420_v39, %v588_v56  ;;  %v791_v59 = vpack.c.bf16 %v686_v14, %v679_v13  ;;  %v4270_v3 = vpack.c.bf16 %v434_v57, %v427_v37  ;;  %v470_v56 = vld [vmem:[%s4210_s18 + $0x238] sm:$0xff]  ;;  %v409_v35 = vld [vmem:[%s4210_s18 + $0x50] sm:$0xff]  ;;  %v416_v33 = vld [vmem:[%s4210_s18 + $0x88] sm:$0xff] }
  0x66   : >> { %v799_v60 = vpack.c.bf16 %v701_v16, %v694_v15  ;;  %v4272_v40 = vpack.c.bf16 %v449_v12, %v442_v58  ;;  %883 = vmatprep.subr.bf16.mxu0 %v792_v19  ;;  %3501 = vmatprep.subr.bf16.mxu1 %v792_v19  ;;  %v596_v63 = vunpack.c.l.bf16 %v4268_v22  ;;  %v603_v0 = vunpack.c.h.bf16 %v4268_v22  ;;  %v456_v19 = vld [vmem:[%s4210_s18 + $0x1c8] sm:$0xff]  ;;  %v423_v30 = vld [vmem:[%s4210_s18 + $0xc0] sm:$0xff]  ;;  %v430_v28 = vld [vmem:[%s4210_s18 + $0xf8] sm:$0xff] }
  0x67   : >> { %v798_v61 = vpack.c.bf16 %v700_v21, %v693_v20  ;;  %v4276_v6 = vpack.c.bf16 %v448_v18, %v441_v17  ;;  %884 = vmatpush1.bf16.msra.mxu0 %v791_v59  ;;  %3509 = vmatpush1.bf16.msra.mxu1 %v791_v59  ;;  %v595_v13 = vunpack.c.l.bf16 %v4270_v3  ;;  %v602_v14 = vunpack.c.h.bf16 %v4270_v3  ;;  %v463_v20 = vld [vmem:[%s4210_s18 + $0x200] sm:$0xff]  ;;  %v477_v59 = vld [vmem:[%s4210_s18 + $0x270] sm:$0xff]  ;;  %v436_v25 = vld [vmem:[%s4210_s18 + $0x128] sm:$0xff] }
  0x68   : >> { %v610_v15 = vunpack.c.l.bf16 %v4272_v40  ;;  %v617_v16 = vunpack.c.h.bf16 %v4272_v40  ;;  %885 = vmatprep.subr.bf16.mxu0 %v799_v60  ;;  %3502 = vmatprep.subr.bf16.mxu1 %v799_v60  ;;  %v708_v21 = vsub.f32 %v428_v4, %v596_v63  ;;  %v715_v38 = vsub.f32 %v435_v5, %v603_v0  ;;  %v476_v63 = vld [vmem:[%s4210_s18 + $0x268] sm:$0xff]  ;;  %v437_v29 = vld [vmem:[%s4210_s18 + $0x130] sm:$0xff]  ;;  %v439_v27 = vld [vmem:[%s4210_s18 + $0x140] sm:$0xff] }
  0x69   : >> { %v609_v39 = vunpack.c.l.bf16 %v4276_v6  ;;  %v616_v43 = vunpack.c.h.bf16 %v4276_v6  ;;  %v707_v46 = vsub.f32 %v427_v37, %v595_v13  ;;  %v714_v47 = vsub.f32 %v434_v57, %v602_v14  ;;  %v484_v0 = vld [vmem:[%s4210_s18 + $0x2a8] sm:$0xff]  ;;  %v429_v24 = vld [vmem:[%s4210_s18 + $0xf0] sm:$0xff] }
  0x6a   : >> { %v722_v49 = vsub.f32 %v442_v58, %v610_v15  ;;  %v729_v36 = vsub.f32 %v449_v12, %v617_v16  ;;  %v806_v48 = vpack.c.bf16 %v715_v38, %v708_v21  ;;  %v4291_v5 = vpack.c.bf16 %v463_v20, %v456_v19  ;;  %v483_v38 = vld [vmem:[%s4210_s18 + $0x2a0] sm:$0xff] }
  0x6b   : >> { %v721_v60 = vsub.f32 %v441_v17, %v609_v39  ;;  %v728_v4 = vsub.f32 %v448_v18, %v616_v43  ;;  %886 = vmatpush1.bf16.msra.mxu0 %v798_v61  ;;  %3510 = vmatpush1.bf16.msra.mxu1 %v798_v61  ;;  %v805_v54 = vpack.c.bf16 %v714_v47, %v707_v46 }
  0x6c   : >> { %v813_v53 = vpack.c.bf16 %v729_v36, %v722_v49  ;;  %v4296_v37 = vpack.c.bf16 %v462_v45, %v455_v44  ;;  %887 = vmatprep.subr.bf16.mxu0 %v806_v48  ;;  %3503 = vmatprep.subr.bf16.mxu1 %v806_v48  ;;  %v624_v58 = vunpack.c.l.bf16 %v4291_v5  ;;  %v631_v17 = vunpack.c.h.bf16 %v4291_v5  ;;  %v490_v49 = vld [vmem:[%s4210_s18 + $0x2d8] sm:$0xff] }
  0x6d   : >> { %v812_v12 = vpack.c.bf16 %v728_v4, %v721_v60  ;;  %v4300_v18 = vpack.c.bf16 %v477_v59, %v470_v56  ;;  %v4304_v13 = vpack.c.bf16 %v476_v63, %v469_v23  ;;  %v4306_v14 = vpack.c.bf16 %v491_v55, %v484_v0  ;;  %v498_v36 = vld [vmem:[%s4210_s18 + $0x318] sm:$0xff]  ;;  %v505_v60 = vld [vmem:[%s4210_s18 + $0x350] sm:$0xff] }
  0x6e   : >> { %v623_v57 = vunpack.c.l.bf16 %v4296_v37  ;;  %v630_v61 = vunpack.c.h.bf16 %v4296_v37  ;;  %v736_v15 = vsub.f32 %v456_v19, %v624_v58  ;;  %v743_v48 = vsub.f32 %v463_v20, %v631_v17  ;;  %v497_v17 = vld [vmem:[%s4210_s18 + $0x310] sm:$0xff] }
  0x6f   : >> { %v638_v16 = vunpack.c.l.bf16 %v4300_v18  ;;  %v645_v21 = vunpack.c.h.bf16 %v4300_v18  ;;  %888 = vmatpush1.bf16.msra.mxu0 %v805_v54  ;;  %3511 = vmatpush1.bf16.msra.mxu1 %v805_v54  ;;  %v637_v46 = vunpack.c.l.bf16 %v4304_v13  ;;  %v644_v47 = vunpack.c.h.bf16 %v4304_v13  ;;  %v504_v54 = vld [vmem:[%s4210_s18 + $0x348] sm:$0xff] }
  0x70   : >> { %v735_v39 = vsub.f32 %v455_v44, %v623_v57  ;;  %v742_v43 = vsub.f32 %v462_v45, %v630_v61  ;;  %889 = vmatprep.subr.bf16.mxu0 %v813_v53  ;;  %3504 = vmatprep.subr.bf16.mxu1 %v813_v53  ;;  %v820_v19 = vpack.c.bf16 %v743_v48, %v736_v15  ;;  %v652_v58 = vunpack.c.l.bf16 %v4306_v14  ;;  %v402_v53 = vld [vmem:[%s4210_s18 + $0x18] sm:$0xff] }
  0x71   : >> { %v750_v20 = vsub.f32 %v470_v56, %v638_v16  ;;  %v757_v4 = vsub.f32 %v477_v59, %v645_v21  ;;  %v749_v45 = vsub.f32 %v469_v23, %v637_v46  ;;  %v756_v57 = vsub.f32 %v476_v63, %v644_v47 }
  0x72   : >> { %v819_v44 = vpack.c.bf16 %v742_v43, %v735_v39  ;;  %v659_v61 = vunpack.c.h.bf16 %v4306_v14  ;;  %v764_v51 = vsub.f32 %v484_v0, %v652_v58  ;;  %v4320_v50 = vpack.c.bf16 %v490_v49, %v483_v38  ;;  %v404_v39 = vld [vmem:[%s4210_s18 + $0x28] sm:$0xff]  ;;  %v411_v43 = vld [vmem:[%s4210_s18 + $0x60] sm:$0xff] }
  0x73   : >> { %v827_v52 = vpack.c.bf16 %v757_v4, %v750_v20  ;;  %v4322_v34 = vpack.c.bf16 %v505_v60, %v498_v36  ;;  %890 = vmatpush1.bf16.msra.mxu0 %v812_v12  ;;  %3512 = vmatpush1.bf16.msra.mxu1 %v812_v12  ;;  %v826_v56 = vpack.c.bf16 %v756_v57, %v749_v45  ;;  %v401_v4 = vld [vmem:[%s4210_s18 + $0x10] sm:$0xff]  ;;  %v408_v58 = vld [vmem:[%s4210_s18 + $0x48] sm:$0xff]  ;;  %v403_v45 = vld [vmem:[%s4210_s18 + $0x20] sm:$0xff] }
  0x74   : >> { %v771_v59 = vsub.f32 %v491_v55, %v659_v61  ;;  %v4326_v15 = vpack.c.bf16 %v504_v54, %v497_v17  ;;  %891 = vmatprep.subr.bf16.mxu0 %v820_v19  ;;  %3505 = vmatprep.subr.bf16.mxu1 %v820_v19  ;;  %v651_v23 = vunpack.c.l.bf16 %v4320_v50  ;;  %v658_v63 = vunpack.c.h.bf16 %v4320_v50 }
  0x75   : >> { %v666_v0 = vunpack.c.l.bf16 %v4322_v34  ;;  %v673_v48 = vunpack.c.h.bf16 %v4322_v34  ;;  %v4334_v21 = vpack.c.bf16 %v409_v35, %v402_v53 }
  0x76   : >> { %v834_v16 = vpack.c.bf16 %v771_v59, %v764_v51  ;;  %v665_v12 = vunpack.c.l.bf16 %v4326_v15  ;;  %v672_v55 = vunpack.c.h.bf16 %v4326_v15  ;;  %v763_v46 = vsub.f32 %v483_v38, %v651_v23  ;;  %v425_v23 = vld [vmem:[%s4210_s18 + $0xd0] sm:$0xff] }
  0x77   : >> { %v770_v47 = vsub.f32 %v490_v49, %v658_v63  ;;  %v778_v19 = vsub.f32 %v498_v36, %v666_v0  ;;  %v785_v20 = vsub.f32 %v505_v60, %v673_v48  ;;  %892 = vmatpush1.bf16.msra.mxu0 %v819_v44  ;;  %3513 = vmatpush1.bf16.msra.mxu1 %v819_v44  ;;  %v570_v61 = vunpack.c.l.bf16 %v4334_v21  ;;  %v418_v60 = vld [vmem:[%s4210_s18 + $0x98] sm:$0xff] }
  0x78   : >> { %v777_v51 = vsub.f32 %v497_v17, %v665_v12  ;;  %v784_v57 = vsub.f32 %v504_v54, %v672_v55  ;;  %v577_v59 = vunpack.c.h.bf16 %v4334_v21  ;;  %893 = vmatprep.subr.bf16.mxu0 %v827_v52  ;;  %3506 = vmatprep.subr.bf16.mxu1 %v827_v52  ;;  %v4346_v36 = vpack.c.bf16 %v411_v43, %v404_v39 }
  0x79   : >> { %v833_v38 = vpack.c.bf16 %v770_v47, %v763_v46  ;;  %v841_v49 = vpack.c.bf16 %v785_v20, %v778_v19  ;;  %v682_v0 = vsub.f32 %v402_v53, %v570_v61  ;;  %v4350_v17 = vpack.c.bf16 %v408_v58, %v401_v4 }
  0x7a   : >> { %v840_v63 = vpack.c.bf16 %v784_v57, %v777_v51  ;;  %v689_v44 = vsub.f32 %v409_v35, %v577_v59  ;;  %v572_v54 = vunpack.c.l.bf16 %v4346_v36  ;;  %v579_v48 = vunpack.c.h.bf16 %v4346_v36  ;;  %v415_v51 = vld [vmem:[%s4210_s18 + $0x80] sm:$0xff] }
  0x7b   : >> { %v4354_v12 = vpack.c.bf16 %v410_v32, %v403_v45  ;;  %v4356_v55 = vpack.c.bf16 %v423_v30, %v416_v33  ;;  %894 = vmatpush1.bf16.msra.mxu0 %v826_v56  ;;  %3514 = vmatpush1.bf16.msra.mxu1 %v826_v56  ;;  %v569_v46 = vunpack.c.l.bf16 %v4350_v17  ;;  %v576_v35 = vunpack.c.h.bf16 %v4350_v17 }
  0x7c   : >> { %v794_v52 = vpack.c.bf16 %v689_v44, %v682_v0  ;;  %v4360_v53 = vpack.c.bf16 %v425_v23, %v418_v60  ;;  %895 = vmatprep.subr.bf16.mxu0 %v834_v16  ;;  %3507 = vmatprep.subr.bf16.mxu1 %v834_v16  ;;  %v684_v47 = vsub.f32 %v404_v39, %v572_v54  ;;  %v422_v44 = vld [vmem:[%s4210_s18 + $0xb8] sm:$0xff]  ;;  %v417_v16 = vld [vmem:[%s4210_s18 + $0x90] sm:$0xff]  ;;  %v424_v39 = vld [vmem:[%s4210_s18 + $0xc8] sm:$0xff] }
  0x7d   : >> { %v691_v19 = vsub.f32 %v411_v43, %v579_v48  ;;  %v571_v20 = vunpack.c.l.bf16 %v4354_v12  ;;  %v578_v56 = vunpack.c.h.bf16 %v4354_v12  ;;  %v4365_v57 = vsub.f32 %v401_v4, %v569_v46  ;;  %v432_v4 = vld [vmem:[%s4210_s18 + $0x108] sm:$0xff] }
  0x7e   : >> { %v688_v61 = vsub.f32 %v408_v58, %v576_v35  ;;  %v584_v59 = vunpack.c.l.bf16 %v4356_v55  ;;  %v591_v0 = vunpack.c.h.bf16 %v4356_v55  ;;  %v586_v31 = vunpack.c.l.bf16 %v4360_v53 }
  0x7f   : >> { %v796_v43 = vpack.c.bf16 %v691_v19, %v684_v47  ;;  %v683_v54 = vsub.f32 %v403_v45, %v571_v20  ;;  %v690_v48 = vsub.f32 %v410_v32, %v578_v56  ;;  %896 = vmatpush1.bf16.msra.mxu0 %v833_v38  ;;  %3515 = vmatpush1.bf16.msra.mxu1 %v833_v38  ;;  %v593_v26 = vunpack.c.h.bf16 %v4360_v53 }
  0x80   : >> { %v793_v58 = vpack.c.bf16 %v688_v61, %v4365_v57  ;;  %v696_v46 = vsub.f32 %v416_v33, %v584_v59  ;;  %v703_v35 = vsub.f32 %v423_v30, %v591_v0  ;;  %897 = vmatprep.subr.bf16.mxu0 %v841_v49  ;;  %3508 = vmatprep.subr.bf16.mxu1 %v841_v49 }
  0x81   : >> { %v795_v45 = vpack.c.bf16 %v690_v48, %v683_v54  ;;  %v698_v32 = vsub.f32 %v418_v60, %v586_v31  ;;  %v4381_v47 = vpack.c.bf16 %v422_v44, %v415_v51  ;;  %v705_v20 = vsub.f32 %v425_v23, %v593_v26  ;;  %v431_v48 = vld [vmem:[%s4210_s18 + $0x100] sm:$0xff] }
  0x82   : >> { %v801_v19 = vpack.c.bf16 %v703_v35, %v696_v46  ;;  %v4383_v56 = vpack.c.bf16 %v424_v39, %v417_v16  ;;  %v4385_v38 = vpack.c.bf16 %v437_v29, %v430_v28  ;;  %v4389_v57 = vpack.c.bf16 %v439_v27, %v432_v4 }
  0x83   : >> { %6653 = vst [vmem:[#allocation36_spill] sm:$0xff] %v4381_v47  ;;  %v583_v33 = vunpack.c.l.bf16 %v4381_v47  ;;  %v590_v30 = vunpack.c.h.bf16 %v4381_v47  ;;  %v4391_v61 = vpack.c.bf16 %v436_v25, %v429_v24  ;;  %898 = vmatpush1.bf16.msra.mxu0 %v840_v63  ;;  %3516 = vmatpush1.bf16.msra.mxu1 %v840_v63  ;;  %v803_v31 = vpack.c.bf16 %v705_v20, %v698_v32  ;;  %v438_v63 = vld [vmem:[%s4210_s18 + $0x138] sm:$0xff]  ;;  %v451_v47 = vld [vmem:[%s4210_s18 + $0x1a0] sm:$0xff] }
  0x84   : >> { %6654 = vst [vmem:[#allocation37_spill] sm:$0xff] %v4383_v56  ;;  %v585_v26 = vunpack.c.l.bf16 %v4383_v56  ;;  %v592_v49 = vunpack.c.h.bf16 %v4383_v56  ;;  %v598_v60 = vunpack.c.l.bf16 %v4385_v38  ;;  %976 = vmatprep.subr.bf16.mxu1 %v794_v52  ;;  %1069 = vmatprep.subr.bf16.mxu0 %v796_v43  ;;  %v605_v0 = vunpack.c.h.bf16 %v4385_v38  ;;  %v444_v56 = vld [vmem:[%s4210_s18 + $0x168] sm:$0xff] }
  0x85   : >> { %v695_v23 = vsub.f32 %v415_v51, %v583_v33  ;;  %v702_v59 = vsub.f32 %v422_v44, %v590_v30  ;;  %v600_v54 = vunpack.c.l.bf16 %v4389_v57  ;;  %v607_v20 = vunpack.c.h.bf16 %v4389_v57  ;;  %v446_v33 = vld [vmem:[%s4210_s18 + $0x178] sm:$0xff] }
  0x86   : >> { %v697_v46 = vsub.f32 %v417_v16, %v585_v26  ;;  %v704_v35 = vsub.f32 %v424_v39, %v592_v49  ;;  %v710_v32 = vsub.f32 %v430_v28, %v598_v60  ;;  %916 = vmatmul.mubr.bf16.vlgmr.msra.gmra.mrb[0].mxu0 %v4222_v7  ;;  %956 = vmatmul.mubr.bf16.vlgmr.msra.gmra.mrb[0].mxu1 %v4226_v8  ;;  %v597_v43 = vunpack.c.l.bf16 %v4391_v61  ;;  %v453_v26 = vld [vmem:[%s4210_s18 + $0x1b0] sm:$0xff]  ;;  %v443_v49 = vld [vmem:[%s4210_s18 + $0x160] sm:$0xff]  ;;  %v450_v60 = vld [vmem:[%s4210_s18 + $0x198] sm:$0xff] }
  0x87   : >> { %v800_v52 = vpack.c.bf16 %v702_v59, %v695_v23  ;;  %v717_v51 = vsub.f32 %v437_v29, %v605_v0  ;;  %v712_v44 = vsub.f32 %v432_v4, %v600_v54  ;;  %977 = vmatpush1.bf16.msra.mxu1 %v793_v58  ;;  %1070 = vmatpush1.bf16.msra.mxu0 %v795_v45  ;;  %v604_v39 = vunpack.c.h.bf16 %v4391_v61 }
  0x88   : >> { %v802_v28 = vpack.c.bf16 %v704_v35, %v697_v46  ;;  %v719_v16 = vsub.f32 %v439_v27, %v607_v20  ;;  %v4408_v30 = vpack.c.bf16 %v438_v63, %v431_v48  ;;  %978 = vmatprep.subr.bf16.mxu1 %v801_v19  ;;  %1071 = vmatprep.subr.bf16.mxu0 %v803_v31  ;;  %v6657_v59 = vmov 0   ;;  %v445_v46 = vld [vmem:[%s4210_s18 + $0x170] sm:$0xff]  ;;  %v452_v35 = vld [vmem:[%s4210_s18 + $0x1a8] sm:$0xff] }
  0x89   : >> { %v808_v29 = vpack.c.bf16 %v717_v51, %v710_v32  ;;  %v709_v4 = vsub.f32 %v429_v24, %v597_v43  ;;  %v4413_v23 = vpack.c.bf16 %v451_v47, %v444_v56  ;;  %925 = vmatprep.mubr.bf16.mxu0 %v6657_v59  ;;  %v716_v27 = vsub.f32 %v436_v25, %v604_v39  ;;  %v458_v51 = vld [vmem:[%s4210_s18 + $0x1d8] sm:$0xff] }
  0x8a   : >> { %6655 = vst [vmem:[#allocation38_spill] sm:$0xff] %v4408_v30  ;;  %v810_v58 = vpack.c.bf16 %v719_v16, %v712_v44  ;;  %v599_v45 = vunpack.c.l.bf16 %v4408_v30  ;;  %v606_v0 = vunpack.c.h.bf16 %v4408_v30  ;;  %965 = vmatprep.mubr.bf16.mxu1 %v6657_v59  ;;  %v4421_v54 = vpack.c.bf16 %v453_v26, %v446_v33  ;;  %v465_v44 = vld [vmem:[%s4210_s18 + $0x210] sm:$0xff] }
  0x8b   : >> { %6656 = vst [vmem:[#allocation39_spill] sm:$0xff] %v4413_v23  ;;  %v612_v19 = vunpack.c.l.bf16 %v4413_v23  ;;  %v619_v31 = vunpack.c.h.bf16 %v4413_v23  ;;  %v4423_v24 = vpack.c.bf16 %v450_v60, %v443_v49  ;;  %979 = vmatpush1.bf16.msra.mxu1 %v800_v52  ;;  %1072 = vmatpush1.bf16.msra.mxu0 %v802_v28  ;;  %v807_v25 = vpack.c.bf16 %v716_v27, %v709_v4  ;;  %v457_v27 = vld [vmem:[%s4210_s18 + $0x1d0] sm:$0xff] }
  0x8c   : >> { %v711_v32 = vsub.f32 %v431_v48, %v599_v45  ;;  %v718_v20 = vsub.f32 %v438_v63, %v606_v0  ;;  %980 = vmatprep.subr.bf16.mxu1 %v808_v29  ;;  %1073 = vmatprep.subr.bf16.mxu0 %v810_v58  ;;  %v614_v39 = vunpack.c.l.bf16 %v4421_v54  ;;  %v621_v30 = vunpack.c.h.bf16 %v4421_v54  ;;  %v460_v48 = vld [vmem:[%s4210_s18 + $0x1e8] sm:$0xff]  ;;  %v467_v63 = vld [vmem:[%s4210_s18 + $0x220] sm:$0xff] }
  0x8d   : >> { %6658 = vst [vmem:[#allocation40_spill] sm:$0xff] %v4423_v24  ;;  %v724_v43 = vsub.f32 %v444_v56, %v612_v19  ;;  %v731_v16 = vsub.f32 %v451_v47, %v619_v31  ;;  %v611_v52 = vunpack.c.l.bf16 %v4423_v24  ;;  %v618_v28 = vunpack.c.h.bf16 %v4423_v24  ;;  %v464_v45 = vld [vmem:[%s4210_s18 + $0x208] sm:$0xff] }
  0x8e   : >> { %v809_v23 = vpack.c.bf16 %v718_v20, %v711_v32  ;;  %v4433_v4 = vpack.c.bf16 %v452_v35, %v445_v46  ;;  %926 = vmatmul.mubr.bf16.gmra.mrb[4].mxu0 %v4230_v9  ;;  %v726_v58 = vsub.f32 %v446_v33, %v614_v39  ;;  %v733_v56 = vsub.f32 %v453_v26, %v621_v30  ;;  %v472_v39 = vld [vmem:[%s4210_s18 + $0x248] sm:$0xff] }
  0x8f   : >> { %v815_v29 = vpack.c.bf16 %v731_v16, %v724_v43  ;;  %v4438_v47 = vpack.c.bf16 %v465_v44, %v458_v51  ;;  %981 = vmatpush1.bf16.msra.mxu1 %v807_v25  ;;  %v723_v0 = vsub.f32 %v443_v49, %v611_v52  ;;  %v730_v19 = vsub.f32 %v450_v60, %v618_v28  ;;  %v459_v25 = vld [vmem:[%s4210_s18 + $0x1e0] sm:$0xff] }
  0x90   : >> { %6659 = vst [vmem:[#allocation41_spill] sm:$0xff] %v4433_v4  ;;  %1074 = vmatpush1.bf16.msra.mxu0 %v809_v23  ;;  %v613_v31 = vunpack.c.l.bf16 %v4433_v4  ;;  %v620_v32 = vunpack.c.h.bf16 %v4433_v4  ;;  %v817_v20 = vpack.c.bf16 %v733_v56, %v726_v58  ;;  %935 = vmatprep.mubr.bf16.mxu0 %v6657_v59  ;;  %v4447_v26 = vpack.c.bf16 %v467_v63, %v460_v48  ;;  %v466_v23 = vld [vmem:[%s4210_s18 + $0x218] sm:$0xff]  ;;  %v479_v52 = vld [vmem:[%s4210_s18 + $0x280] sm:$0xff] }
  0x91   : >> { %6660 = vst [vmem:[#allocation42_spill] sm:$0xff] %v4438_v47  ;;  %982 = vmatprep.subr.bf16.mxu1 %v815_v29  ;;  %v626_v33 = vunpack.c.l.bf16 %v4438_v47  ;;  %v633_v30 = vunpack.c.h.bf16 %v4438_v47  ;;  %v814_v49 = vpack.c.bf16 %v730_v19, %v723_v0  ;;  %v4451_v16 = vpack.c.bf16 %v464_v45, %v457_v27  ;;  %966 = vmatmul.mubr.bf16.gmra.mrb[4].mxu1 %v4252_v42 }
  0x92   : >> { %6661 = vst [vmem:[#allocation43_spill] sm:$0xff] %v4447_v26  ;;  %v725_v43 = vsub.f32 %v445_v46, %v613_v31  ;;  %v732_v60 = vsub.f32 %v452_v35, %v620_v32  ;;  %1075 = vmatprep.subr.bf16.mxu0 %v817_v20  ;;  %v628_v58 = vunpack.c.l.bf16 %v4447_v26  ;;  %v635_v56 = vunpack.c.h.bf16 %v4447_v26  ;;  %1008 = vmatprep.mubr.bf16.mxu1 %v6657_v59  ;;  %v474_v31 = vld [vmem:[%s4210_s18 + $0x258] sm:$0xff]  ;;  %v481_v32 = vld [vmem:[%s4210_s18 + $0x290] sm:$0xff] }
  0x93   : >> { %6662 = vst [vmem:[#allocation44_spill] sm:$0xff] %v4451_v16  ;;  %v738_v28 = vsub.f32 %v458_v51, %v626_v33  ;;  %v745_v29 = vsub.f32 %v465_v44, %v633_v30  ;;  %983 = vmatpush1.bf16.msra.mxu1 %v814_v49  ;;  %v625_v35 = vunpack.c.l.bf16 %v4451_v16  ;;  %v632_v0 = vunpack.c.h.bf16 %v4451_v16  ;;  %v471_v30 = vld [vmem:[%s4210_s18 + $0x240] sm:$0xff]  ;;  %v478_v26 = vld [vmem:[%s4210_s18 + $0x278] sm:$0xff] }
  0x94   : >> { %v816_v46 = vpack.c.bf16 %v732_v60, %v725_v43  ;;  %v4461_v19 = vpack.c.bf16 %v466_v23, %v459_v25  ;;  %v740_v20 = vsub.f32 %v460_v48, %v628_v58  ;;  %v747_v44 = vsub.f32 %v467_v63, %v635_v56  ;;  %v473_v58 = vld [vmem:[%s4210_s18 + $0x250] sm:$0xff]  ;;  %v480_v56 = vld [vmem:[%s4210_s18 + $0x288] sm:$0xff] }
  0x95   : >> { %v822_v51 = vpack.c.bf16 %v745_v29, %v738_v28  ;;  %v4465_v33 = vpack.c.bf16 %v479_v52, %v472_v39  ;;  %v737_v49 = vsub.f32 %v457_v27, %v625_v35  ;;  %v744_v43 = vsub.f32 %v464_v45, %v632_v0  ;;  %v486_v0 = vld [vmem:[%s4210_s18 + $0x2b8] sm:$0xff] }
  0x96   : >> { %6663 = vst [vmem:[#allocation45_spill] sm:$0xff] %v4461_v19  ;;  %1076 = vmatpush1.bf16.msra.mxu0 %v816_v46  ;;  %v627_v60 = vunpack.c.l.bf16 %v4461_v19  ;;  %v634_v16 = vunpack.c.h.bf16 %v4461_v19  ;;  %v824_v48 = vpack.c.bf16 %v747_v44, %v740_v20  ;;  %v4474_v29 = vpack.c.bf16 %v481_v32, %v474_v31 }
  0x97   : >> { %6664 = vst [vmem:[#allocation46_spill] sm:$0xff] %v4465_v33  ;;  %936 = vmatmul.mubr.bf16.gmra.mrb[8].mxu0 %v4240_v1  ;;  %984 = vmatprep.subr.bf16.mxu1 %v822_v51  ;;  %v640_v63 = vunpack.c.l.bf16 %v4465_v33  ;;  %v647_v28 = vunpack.c.h.bf16 %v4465_v33  ;;  %v821_v27 = vpack.c.bf16 %v744_v43, %v737_v49  ;;  %v4478_v35 = vpack.c.bf16 %v478_v26, %v471_v30  ;;  %v493_v51 = vld [vmem:[%s4210_s18 + $0x2f0] sm:$0xff]  ;;  %v488_v43 = vld [vmem:[%s4210_s18 + $0x2c8] sm:$0xff] }
  0x98   : >> { %6665 = vst [vmem:[#allocation47_spill] sm:$0xff] %v4474_v29  ;;  %v739_v45 = vsub.f32 %v459_v25, %v627_v60  ;;  %v746_v46 = vsub.f32 %v466_v23, %v634_v16  ;;  %945 = vmatprep.mubr.bf16.mxu0 %v6657_v59  ;;  %1077 = vmatprep.subr.bf16.mxu0 %v824_v48  ;;  %v642_v19 = vunpack.c.l.bf16 %v4474_v29  ;;  %v649_v33 = vunpack.c.h.bf16 %v4474_v29  ;;  %v495_v60 = vld [vmem:[%s4210_s18 + $0x300] sm:$0xff] }
  0x99   : >> { %6666 = vst [vmem:[#allocation48_spill] sm:$0xff] %v4478_v35  ;;  %v752_v20 = vsub.f32 %v472_v39, %v640_v63  ;;  %v759_v44 = vsub.f32 %v479_v52, %v647_v28  ;;  %985 = vmatpush1.bf16.msra.mxu1 %v821_v27  ;;  %v639_v23 = vunpack.c.l.bf16 %v4478_v35  ;;  %v646_v16 = vunpack.c.h.bf16 %v4478_v35  ;;  %v485_v63 = vld [vmem:[%s4210_s18 + $0x2b0] sm:$0xff]  ;;  %v492_v28 = vld [vmem:[%s4210_s18 + $0x2e8] sm:$0xff] }
  0x9a   : >> { %v823_v25 = vpack.c.bf16 %v746_v46, %v739_v45  ;;  %v4487_v49 = vpack.c.bf16 %v480_v56, %v473_v58  ;;  %v754_v48 = vsub.f32 %v474_v31, %v642_v19  ;;  %v761_v39 = vsub.f32 %v481_v32, %v649_v33  ;;  %v487_v32 = vld [vmem:[%s4210_s18 + $0x2c0] sm:$0xff]  ;;  %v494_v33 = vld [vmem:[%s4210_s18 + $0x2f8] sm:$0xff] }
  0x9b   : >> { %v829_v4 = vpack.c.bf16 %v759_v44, %v752_v20  ;;  %v4491_v52 = vpack.c.bf16 %v493_v51, %v486_v0  ;;  %v751_v27 = vsub.f32 %v471_v30, %v639_v23  ;;  %v758_v45 = vsub.f32 %v478_v26, %v646_v16  ;;  %v500_v23 = vld [vmem:[%s4210_s18 + $0x328] sm:$0xff]  ;;  %v507_v16 = vld [vmem:[%s4210_s18 + $0x360] sm:$0xff] }
  0x9c   : >> { %6667 = vst [vmem:[#allocation49_spill] sm:$0xff] %v4487_v49  ;;  %1078 = vmatpush1.bf16.msra.mxu0 %v823_v25  ;;  %v641_v46 = vunpack.c.l.bf16 %v4487_v49  ;;  %v648_v35 = vunpack.c.h.bf16 %v4487_v49  ;;  %v831_v29 = vpack.c.bf16 %v761_v39, %v754_v48  ;;  %v4499_v31 = vpack.c.bf16 %v495_v60, %v488_v43 }
  0x9d   : >> { %6668 = vst [vmem:[#allocation50_spill] sm:$0xff] %v4491_v52  ;;  %986 = vmatprep.subr.bf16.mxu1 %v829_v4  ;;  %v654_v20 = vunpack.c.l.bf16 %v4491_v52  ;;  %v661_v19 = vunpack.c.h.bf16 %v4491_v52  ;;  %v828_v44 = vpack.c.bf16 %v758_v45, %v751_v27  ;;  %v4503_v26 = vpack.c.bf16 %v492_v28, %v485_v63  ;;  %v502_v45 = vld [vmem:[%s4210_s18 + $0x338] sm:$0xff] }
  0x9e   : >> { %6669 = vst [vmem:[#allocation51_spill] sm:$0xff] %v4499_v31  ;;  %v753_v25 = vsub.f32 %v473_v58, %v641_v46  ;;  %v760_v30 = vsub.f32 %v480_v56, %v648_v35  ;;  %1079 = vmatprep.subr.bf16.mxu0 %v831_v29  ;;  %v656_v39 = vunpack.c.l.bf16 %v4499_v31  ;;  %v663_v49 = vunpack.c.h.bf16 %v4499_v31  ;;  %v509_v29 = vld [vmem:[%s4210_s18 + $0x370] sm:$0xff] }
  0x9f   : >> { %6670 = vst [vmem:[#allocation52_spill] sm:$0xff] %v4503_v26  ;;  %946 = vmatmul.mubr.bf16.gmra.mrb[12].mxu0 %v4244_v2  ;;  %v766_v4 = vsub.f32 %v486_v0, %v654_v20  ;;  %v773_v48 = vsub.f32 %v493_v51, %v661_v19  ;;  %987 = vmatpush1.bf16.msra.mxu1 %v828_v44  ;;  %v653_v56 = vunpack.c.l.bf16 %v4503_v26  ;;  %v660_v35 = vunpack.c.h.bf16 %v4503_v26  ;;  %v499_v19 = vld [vmem:[%s4210_s18 + $0x320] sm:$0xff]  ;;  %v506_v44 = vld [vmem:[%s4210_s18 + $0x358] sm:$0xff] }
  0xa0   : >> { %v830_v58 = vpack.c.bf16 %v760_v30, %v753_v25  ;;  %v4512_v27 = vpack.c.bf16 %v494_v33, %v487_v32  ;;  %1101 = vmatprep.mubr.bf16.mxu0 %v6657_v59  ;;  %v768_v51 = vsub.f32 %v488_v43, %v656_v39  ;;  %v775_v46 = vsub.f32 %v495_v60, %v663_v49  ;;  %v501_v60 = vld [vmem:[%s4210_s18 + $0x330] sm:$0xff] }
  0xa1   : >> { %v836_v0 = vpack.c.bf16 %v773_v48, %v766_v4  ;;  %v4517_v20 = vpack.c.bf16 %v507_v16, %v500_v23  ;;  %v765_v25 = vsub.f32 %v485_v63, %v653_v56  ;;  %v772_v30 = vsub.f32 %v492_v28, %v660_v35  ;;  %v508_v48 = vld [vmem:[%s4210_s18 + $0x368] sm:$0xff]  ;;  %v405_v56 = vld [vmem:[%s4210_s18 + $0x30] sm:$0xff] }
  0xa2   : >> { %6671 = vst [vmem:[#allocation53_spill] sm:$0xff] %v4512_v27  ;;  %1080 = vmatpush1.bf16.msra.mxu0 %v830_v58  ;;  %v655_v26 = vunpack.c.l.bf16 %v4512_v27  ;;  %v662_v31 = vunpack.c.h.bf16 %v4512_v27  ;;  %v838_v52 = vpack.c.bf16 %v775_v46, %v768_v51  ;;  %v4525_v49 = vpack.c.bf16 %v509_v29, %v502_v45  ;;  %v412_v35 = vld [vmem:[%s4210_s18 + $0x68] sm:$0xff] }
  0xa3   : >> { %6672 = vst [vmem:[#allocation54_spill] sm:$0xff] %v4517_v20  ;;  %988 = vmatprep.subr.bf16.mxu1 %v836_v0  ;;  %v668_v4 = vunpack.c.l.bf16 %v4517_v20  ;;  %v675_v43 = vunpack.c.h.bf16 %v4517_v20  ;;  %v835_v39 = vpack.c.bf16 %v772_v30, %v765_v25  ;;  %v4529_v28 = vpack.c.bf16 %v506_v44, %v499_v19 }
  0xa4   : >> { %6673 = vst [vmem:[#allocation55_spill] sm:$0xff] %v4525_v49  ;;  %v767_v58 = vsub.f32 %v487_v32, %v655_v26  ;;  %v774_v63 = vsub.f32 %v494_v33, %v662_v31  ;;  %1081 = vmatprep.subr.bf16.mxu0 %v838_v52  ;;  %v670_v46 = vunpack.c.l.bf16 %v4525_v49  ;;  %v677_v27 = vunpack.c.h.bf16 %v4525_v49  ;;  %v419_v33 = vld [vmem:[%s4210_s18 + $0xa0] sm:$0xff]  ;;  %v426_v26 = vld [vmem:[%s4210_s18 + $0xd8] sm:$0xff] }
  0xa5   : >> { %6674 = vst [vmem:[#allocation56_spill] sm:$0xff] %v4529_v28  ;;  %v780_v0 = vsub.f32 %v500_v23, %v668_v4  ;;  %v787_v51 = vsub.f32 %v507_v16, %v675_v43  ;;  %989 = vmatpush1.bf16.msra.mxu1 %v835_v39  ;;  %v667_v25 = vunpack.c.l.bf16 %v4529_v28  ;;  %v674_v32 = vunpack.c.h.bf16 %v4529_v28  ;;  %v433_v4 = vld [vmem:[%s4210_s18 + $0x110] sm:$0xff]  ;;  %v440_v43 = vld [vmem:[%s4210_s18 + $0x148] sm:$0xff] }
  0xa6   : >> { %v837_v20 = vpack.c.bf16 %v774_v63, %v767_v58  ;;  %v4537_v31 = vpack.c.bf16 %v508_v48, %v501_v60  ;;  %v782_v52 = vsub.f32 %v502_v45, %v670_v46  ;;  %v789_v23 = vsub.f32 %v509_v29, %v677_v27  ;;  %v447_v29 = vld [vmem:[%s4210_s18 + $0x180] sm:$0xff] }
  0xa7   : >> { %v843_v30 = vpack.c.bf16 %v787_v51, %v780_v0  ;;  %v4541_v16 = vpack.c.bf16 %v412_v35, %v405_v56  ;;  %v779_v39 = vsub.f32 %v499_v19, %v667_v25  ;;  %v786_v58 = vsub.f32 %v506_v44, %v674_v32  ;;  %v454_v51 = vld [vmem:[%s4210_s18 + $0x1b8] sm:$0xff] }
  0xa8   : >> { %6675 = vst [vmem:[#allocation57_spill] sm:$0xff] %v4537_v31  ;;  %1082 = vmatpush1.bf16.msra.mxu0 %v837_v20  ;;  %v669_v63 = vunpack.c.l.bf16 %v4537_v31  ;;  %v676_v28 = vunpack.c.h.bf16 %v4537_v31  ;;  %v845_v49 = vpack.c.bf16 %v789_v23, %v782_v52  ;;  %v4549_v27 = vpack.c.bf16 %v426_v26, %v419_v33  ;;  %v461_v23 = vld [vmem:[%s4210_s18 + $0x1f0] sm:$0xff]  ;;  %v468_v31 = vld [vmem:[%s4210_s18 + $0x228] sm:$0xff] }
  0xa9   : >> { %6676 = vst [vmem:[#allocation58_spill] sm:$0xff] %v4541_v16  ;;  %990 = vmatprep.subr.bf16.mxu1 %v843_v30  ;;  %v573_v0 = vunpack.c.l.bf16 %v4541_v16  ;;  %v580_v45 = vunpack.c.h.bf16 %v4541_v16  ;;  %v842_v46 = vpack.c.bf16 %v786_v58, %v779_v39  ;;  %v4553_v44 = vpack.c.bf16 %v440_v43, %v433_v4 }
  0xaa   : >> { %v781_v20 = vsub.f32 %v501_v60, %v669_v63  ;;  %v788_v19 = vsub.f32 %v508_v48, %v676_v28  ;;  %1083 = vmatprep.subr.bf16.mxu0 %v845_v49  ;;  %v587_v30 = vunpack.c.l.bf16 %v4549_v27  ;;  %v594_v52 = vunpack.c.h.bf16 %v4549_v27 }
  0xab   : >> { %v685_v25 = vsub.f32 %v405_v56, %v573_v0  ;;  %v692_v32 = vsub.f32 %v412_v35, %v580_v45  ;;  %991 = vmatpush1.bf16.msra.mxu1 %v842_v46  ;;  %v601_v47 = vunpack.c.l.bf16 %v4553_v44  ;;  %v608_v24 = vunpack.c.h.bf16 %v4553_v44  ;;  %v489_v46 = vld [vmem:[%s4210_s18 + $0x2d0] sm:$0xff] }
  0xac   : >> { %v844_v16 = vpack.c.bf16 %v788_v19, %v781_v20  ;;  %v4561_v60 = vpack.c.bf16 %v454_v51, %v447_v29  ;;  %v699_v49 = vsub.f32 %v419_v33, %v587_v30  ;;  %v706_v28 = vsub.f32 %v426_v26, %v594_v52  ;;  %v475_v33 = vld [vmem:[%s4210_s18 + $0x260] sm:$0xff]  ;;  %v482_v26 = vld [vmem:[%s4210_s18 + $0x298] sm:$0xff]  ;;  %v496_v20 = vld [vmem:[%s4210_s18 + $0x308] sm:$0xff] }
  0xad   : >> { %v797_v48 = vpack.c.bf16 %v692_v32, %v685_v25  ;;  %v713_v56 = vsub.f32 %v433_v4, %v601_v47  ;;  %v720_v35 = vsub.f32 %v440_v43, %v608_v24  ;;  %v4563_v39 = vpack.c.bf16 %v468_v31, %v461_v23  ;;  %v503_v52 = vld [vmem:[%s4210_s18 + $0x340] sm:$0xff] }
  0xae   : >> { %1084 = vmatpush1.bf16.msra.mxu0 %v844_v16  ;;  %1009 = vmatmul.mubr.bf16.vlgmr.msra.gmra.mrb[8].mxu1 %v4222_v7  ;;  %v804_v58 = vpack.c.bf16 %v706_v28, %v699_v49  ;;  %v615_v63 = vunpack.c.l.bf16 %v4561_v60  ;;  %v622_v0 = vunpack.c.h.bf16 %v4561_v60  ;;  %v4578_v45 = vpack.c.bf16 %v482_v26, %v475_v33 }
  0xaf   : >> { %1243 = vmatprep.subr.bf16.mxu0 %v4215_v62  ;;  %3417 = vmatprep.subr.bf16.mxu1 %v797_v48  ;;  %v811_v24 = vpack.c.bf16 %v720_v35, %v713_v56  ;;  %v629_v47 = vunpack.c.l.bf16 %v4563_v39  ;;  %v636_v16 = vunpack.c.h.bf16 %v4563_v39  ;;  %v4583_v32 = vpack.c.bf16 %v496_v20, %v489_v46 }
  0xb0   : >> { %1018 = vmatprep.mubr.bf16.mxu1 %v6657_v59  ;;  %3418 = vmatpush3.bf16.msra.mxu1 %v797_v48  ;;  %v727_v4 = vsub.f32 %v447_v29, %v615_v63  ;;  %v734_v43 = vsub.f32 %v454_v51, %v622_v0  ;;  %v643_v51 = vunpack.c.l.bf16 %v4578_v45  ;;  %v650_v30 = vunpack.c.h.bf16 %v4578_v45  ;;  %v510_v48 = vld [vmem:[%s4210_s18 + $0x378] sm:$0xff] }
  0xb1   : >> { %1102 = vmatmul.mubr.bf16.vlgmr.msra.gmra.mrb[16].mxu0 %v4222_v7  ;;  %3419 = vmatprep.subr.bf16.mxu1 %v804_v58  ;;  %v741_v19 = vsub.f32 %v461_v23, %v629_v47  ;;  %v748_v25 = vsub.f32 %v468_v31, %v636_v16  ;;  %v657_v23 = vunpack.c.l.bf16 %v4583_v32  ;;  %v664_v49 = vunpack.c.h.bf16 %v4583_v32 }
  0xb2   : >> { %1244 = vmatpush1.bf16.msra.mxu0 %v4232_v10  ;;  %1111 = vmatprep.mubr.bf16.mxu0 %v6657_v59  ;;  %v818_v29 = vpack.c.bf16 %v734_v43, %v727_v4  ;;  %v755_v28 = vsub.f32 %v475_v33, %v643_v51  ;;  %v762_v56 = vsub.f32 %v482_v26, %v650_v30  ;;  %v6677_v43 = vld [vmem:[#allocation36_spill] sm:$0xff]  ;;  %v6683_v51 = vld [vmem:[#allocation41_spill] sm:$0xff]  ;;  %v6684_v30 = vld [vmem:[#allocation43_spill] sm:$0xff] }
  0xb3   : >> { %1245 = vmatprep.subr.bf16.mxu0 %v4234_v11  ;;  %v825_v31 = vpack.c.bf16 %v748_v25, %v741_v19  ;;  %v4598_v35 = vpack.c.bf16 %v510_v48, %v503_v52  ;;  %v776_v63 = vsub.f32 %v496_v20, %v664_v49  ;;  %v6679_v20 = vld [vmem:[#allocation39_spill] sm:$0xff]  ;;  %v6680_v19 = vld [vmem:[#allocation38_spill] sm:$0xff]  ;;  %v6681_v25 = vld [vmem:[#allocation40_spill] sm:$0xff] }
  0xb4   : >> { %3420 = vmatpush3.bf16.msra.mxu1 %v804_v58  ;;  %v769_v58 = vsub.f32 %v489_v46, %v657_v23  ;;  %v832_v0 = vpack.c.bf16 %v762_v56, %v755_v28  ;;  %v6678_v46 = vld [vmem:[#allocation37_spill] sm:$0xff]  ;;  %v6688_v23 = vld [vmem:[#allocation47_spill] sm:$0xff]  ;;  %v6689_v49 = vld [vmem:[#allocation48_spill] sm:$0xff] }
  0xb5   : >> { %3421 = vmatprep.subr.bf16.mxu1 %v811_v24  ;;  %v678_v47 = vunpack.c.h.bf16 %v4598_v35  ;;  %v6690_v28 = vld [vmem:[#allocation50_spill] sm:$0xff]  ;;  %v6691_v56 = vld [vmem:[#allocation49_spill] sm:$0xff] }
  0xb6   : >> { %1246 = vmatpush1.bf16.msra.mxu0 %v4248_v41  ;;  %1019 = vmatmul.mubr.bf16.gmra.mrb[12].mxu1 %v4230_v9  ;;  %v839_v33 = vpack.c.bf16 %v776_v63, %v769_v58  ;;  %v6692_v58 = vld [vmem:[#allocation51_spill] sm:$0xff]  ;;  %v6693_v63 = vld [vmem:[#allocation52_spill] sm:$0xff] }
  0xb7   : >> { %1247 = vmatprep.subr.bf16.mxu0 %v4268_v22  ;;  %1028 = vmatprep.mubr.bf16.mxu1 %v6657_v59  ;;  %v790_v16 = vsub.f32 %v510_v48, %v678_v47  ;;  %v6686_v48 = vld [vmem:[#allocation46_spill] sm:$0xff]  ;;  %v6696_v47 = vld [vmem:[#allocation55_spill] sm:$0xff] }
  0xb8   : >> { %3422 = vmatpush3.bf16.msra.mxu1 %v811_v24  ;;  %v671_v24 = vunpack.c.l.bf16 %v4598_v35 }
  0xb9   : >> { %1112 = vmatmul.mubr.bf16.gmra.mrb[20].mxu0 %v4230_v9  ;;  %3423 = vmatprep.subr.bf16.mxu1 %v818_v29 }
  0xba   : >> { %1248 = vmatpush1.bf16.msra.mxu0 %v4270_v3  ;;  %1121 = vmatprep.mubr.bf16.mxu0 %v6657_v59  ;;  %v783_v26 = vsub.f32 %v503_v52, %v671_v24  ;;  %v6685_v52 = vld [vmem:[#allocation44_spill] sm:$0xff]  ;;  %v6695_v24 = vld [vmem:[#allocation53_spill] sm:$0xff] }
  0xbb   : >> { %1249 = vmatprep.subr.bf16.mxu0 %v4272_v40 }
  0xbc   : >> { %3424 = vmatpush3.bf16.msra.mxu1 %v818_v29  ;;  %v846_v4 = vpack.c.bf16 %v790_v16, %v783_v26  ;;  %v6682_v29 = vld [vmem:[#allocation42_spill] sm:$0xff]  ;;  %v6699_v16 = vld [vmem:[#allocation57_spill] sm:$0xff] }
  0xbd   : >> { %3425 = vmatprep.subr.bf16.mxu1 %v825_v31  ;;  %v6698_v26 = vld [vmem:[#allocation58_spill] sm:$0xff] }
  0xbe   : >> { %1250 = vmatpush1.bf16.msra.mxu0 %v4276_v6  ;;  %1029 = vmatmul.mubr.bf16.gmra.mrb[16].mxu1 %v4240_v1 }
  0xbf   : >> { %1251 = vmatprep.subr.bf16.mxu0 %v4291_v5  ;;  %1038 = vmatprep.mubr.bf16.mxu1 %v6657_v59 }
  0xc0   : >> { %3426 = vmatpush3.bf16.msra.mxu1 %v825_v31  ;;  %v6687_v31 = vld [vmem:[#allocation45_spill] sm:$0xff] }
  0xc1   : >> { %1122 = vmatmul.mubr.bf16.gmra.mrb[24].mxu0 %v4240_v1  ;;  %3427 = vmatprep.subr.bf16.mxu1 %v832_v0 }
  0xc2   : >> { %1131 = vmatprep.mubr.bf16.mxu0 %v6657_v59  ;;  %1252 = vmatpush1.bf16.msra.mxu0 %v4296_v37 }
  0xc3   : >> { %1253 = vmatprep.subr.bf16.mxu0 %v4300_v18 }
  0xc4   : >> { %3428 = vmatpush3.bf16.msra.mxu1 %v832_v0  ;;  %v6694_v0 = vld [vmem:[#allocation54_spill] sm:$0xff] }
  0xc5   : >> { %3429 = vmatprep.subr.bf16.mxu1 %v839_v33 }
  0xc6   : >> { %1254 = vmatpush1.bf16.msra.mxu0 %v4304_v13  ;;  %1039 = vmatmul.mubr.bf16.gmra.mrb[20].mxu1 %v4244_v2 }
  0xc7   : >> { %1255 = vmatprep.subr.bf16.mxu0 %v4306_v14  ;;  %1048 = vmatprep.mubr.bf16.mxu1 %v6657_v59 }
  0xc8   : >> { %3430 = vmatpush3.bf16.msra.mxu1 %v839_v33  ;;  %v6697_v33 = vld [vmem:[#allocation56_spill] sm:$0xff] }
  0xc9   : >> { %1132 = vmatmul.mubr.bf16.gmra.mrb[28].mxu0 %v4244_v2  ;;  %3431 = vmatprep.subr.bf16.mxu1 %v846_v4 }
  0xca   : >> { %1141 = vmatprep.mubr.bf16.mxu0 %v6657_v59  ;;  %1256 = vmatpush1.bf16.msra.mxu0 %v4320_v50 }
  0xcb   : >> { %1257 = vmatprep.subr.bf16.mxu0 %v4322_v34 }
  0xcc   : >> { %3432 = vmatpush3.bf16.msra.mxu1 %v846_v4 }
  0xcd   : >> { %1336 = vmatprep.subr.bf16.mxu1 %v4334_v21 }
  0xce   : >> { %1258 = vmatpush1.bf16.msra.mxu0 %v4326_v15  ;;  %1049 = vmatmul.mubr.bf16.gmra.mrb[24].mxu1 %v4226_v8 }
  0xcf   : >> { %1429 = vmatprep.subr.bf16.mxu0 %v4346_v36  ;;  %1058 = vmatprep.mubr.bf16.mxu1 %v6657_v59 }
  0xd1   : >> { %1142 = vmatmul.mubr.bf16.gmra.mrb[32].mxu0 %v4226_v8 }
  0xd2   : >> { %1151 = vmatprep.mubr.bf16.mxu0 %v6657_v59 }
  0xd6   : >> { %1059 = vmatmul.mubr.bf16.gmra.mrb[28].mxu1 %v4252_v42 }
  0xd7   : >> { %3433 = vmatprep.mubr.bf16.mxu1 %v4222_v7 }
  0xd9   : >> { %1152 = vmatmul.mubr.bf16.gmra.mrb[36].mxu0 %v4252_v42 }
  0xda   : >> { %1275 = vmatprep.mubr.bf16.mxu0 %v6657_v59 }
  0xde   : >> { %3434 = vmatmul.mubr.bf16.vlgmr.msra.gmra.mrb[32].mxu1 %v4230_v9 }
  0xdf   : >> { %1337 = vmatpush1.bf16.msra.mxu1 %v4350_v17  ;;  %3437 = vmatprep.mubr.bf16.mxu1 %v4240_v1 }
  0xe0   : >> { %1338 = vmatprep.subr.bf16.mxu1 %v4356_v55 }
  0xe1   : >> { %1276 = vmatmul.mubr.bf16.vlgmr.msra.gmra.mrb[0].mxu0 %v4222_v7 }
  0xe2   : >> { %1430 = vmatpush1.bf16.msra.mxu0 %v4354_v12  ;;  %1285 = vmatprep.mubr.bf16.mxu0 %v6657_v59 }
  0xe3   : >> { %1431 = vmatprep.subr.bf16.mxu0 %v4360_v53  ;;  %1339 = vmatpush1.bf16.msra.mxu1 %v6677_v43 }
  0xe4   : >> { %1340 = vmatprep.subr.bf16.mxu1 %v4385_v38 }
  0xe6   : >> { %1432 = vmatpush1.bf16.msra.mxu0 %v6678_v46  ;;  %3438 = vmatmul.mubr.bf16.gmra.mrb[36].mxu1 %v4244_v2 }
  0xe7   : >> { %1433 = vmatprep.subr.bf16.mxu0 %v4389_v57  ;;  %1341 = vmatpush1.bf16.msra.mxu1 %v4391_v61 }
  0xe8   : >> { %3441 = vmatprep.mubr.bf16.mxu1 %v4226_v8  ;;  %1342 = vmatprep.subr.bf16.mxu1 %v6679_v20 }
  0xe9   : >> { %1286 = vmatmul.mubr.bf16.gmra.mrb[4].mxu0 %v4230_v9 }
  0xea   : >> { %1434 = vmatpush1.bf16.msra.mxu0 %v6680_v19  ;;  %1295 = vmatprep.mubr.bf16.mxu0 %v6657_v59 }
  0xeb   : >> { %1435 = vmatprep.subr.bf16.mxu0 %v4421_v54  ;;  %1343 = vmatpush1.bf16.msra.mxu1 %v6681_v25 }
  0xec   : >> { %1344 = vmatprep.subr.bf16.mxu1 %v6682_v29 }
  0xee   : >> { %1436 = vmatpush1.bf16.msra.mxu0 %v6683_v51  ;;  %3442 = vmatmul.mubr.bf16.gmra.mrb[40].mxu1 %v4252_v42 }
  0xef   : >> { %1437 = vmatprep.subr.bf16.mxu0 %v6684_v30  ;;  %1345 = vmatpush1.bf16.msra.mxu1 %v6685_v52 }
  0xf0   : >> { %1368 = vmatprep.mubr.bf16.mxu1 %v6657_v59  ;;  %1346 = vmatprep.subr.bf16.mxu1 %v6686_v48 }
  0xf1   : >> { %1296 = vmatmul.mubr.bf16.gmra.mrb[8].mxu0 %v4240_v1 }
  0xf2   : >> { %1305 = vmatprep.mubr.bf16.mxu0 %v6657_v59  ;;  %1438 = vmatpush1.bf16.msra.mxu0 %v6687_v31 }
  0xf3   : >> { %1439 = vmatprep.subr.bf16.mxu0 %v6688_v23  ;;  %1347 = vmatpush1.bf16.msra.mxu1 %v6689_v49 }
  0xf4   : >> { %1348 = vmatprep.subr.bf16.mxu1 %v6690_v28 }
  0xf6   : >> { %1440 = vmatpush1.bf16.msra.mxu0 %v6691_v56 }
  0xf7   : >> { %1441 = vmatprep.subr.bf16.mxu0 %v6692_v58  ;;  %1349 = vmatpush1.bf16.msra.mxu1 %v6693_v63 }
  0xf8   : >> { %1350 = vmatprep.subr.bf16.mxu1 %v6694_v0 }
  0xf9   : >> { %1306 = vmatmul.mubr.bf16.gmra.mrb[12].mxu0 %v4244_v2 }
  0xfa   : >> { %1315 = vmatprep.mubr.bf16.mxu0 %v6657_v59  ;;  %1442 = vmatpush1.bf16.msra.mxu0 %v6695_v24 }
  0xfb   : >> { %1443 = vmatprep.subr.bf16.mxu0 %v6696_v47  ;;  %1351 = vmatpush1.bf16.msra.mxu1 %v6697_v33 }
  0xfc   : >> { %3445 = vmatprep.subr.bf16.mxu1 %v6698_v26 }
  0xfe   : >> { %1444 = vmatpush1.bf16.msra.mxu0 %v6699_v16  ;;  %1369 = vmatmul.mubr.bf16.vlgmr.msra.gmra.mrb[8].mxu1 %v4222_v7 }
  0xff   : >> { %1639 = vmatprep.subr.bf16.mxu0 %v4215_v62  ;;  %3446 = vmatpush3.bf16.msra.mxu1 %v6698_v26  ;;  %v6702_v62 = vld [vmem:[#allocation20_spill] sm:$0xff] }
 0x100   : >> { %1378 = vmatprep.mubr.bf16.mxu1 %v6657_v59  ;;  %3447 = vmatprep.subr.bf16.mxu1 %v4549_v27 }
 0x101   : >> { %1316 = vmatmul.mubr.bf16.gmra.mrb[40].mxu0 %v4226_v8 }
 0x102   : >> { %1325 = vmatprep.mubr.bf16.mxu0 %v6657_v59 }
 0x103   : >> { %3448 = vmatpush3.bf16.msra.mxu1 %v4549_v27 }
 0x104   : >> { %3449 = vmatprep.subr.bf16.mxu1 %v4553_v44 }
 0x106   : >> { %1379 = vmatmul.mubr.bf16.gmra.mrb[12].mxu1 %v4230_v9 }
 0x107   : >> { %1388 = vmatprep.mubr.bf16.mxu1 %v6657_v59  ;;  %3450 = vmatpush3.bf16.msra.mxu1 %v4553_v44 }
 0x108   : >> { %3451 = vmatprep.subr.bf16.mxu1 %v4561_v60 }
 0x109   : >> { %1326 = vmatmul.mubr.bf16.gmra.mrb[44].mxu0 %v4252_v42 }
 0x10a   : >> { %1461 = vmatprep.mubr.bf16.mxu0 %v6657_v59 }
 0x10b   : >> { %3452 = vmatpush3.bf16.msra.mxu1 %v4561_v60 }
 0x10c   : >> { %3453 = vmatprep.subr.bf16.mxu1 %v4563_v39 }
 0x10e   : >> { %1389 = vmatmul.mubr.bf16.gmra.mrb[16].mxu1 %v4240_v1 }
 0x10f   : >> { %1398 = vmatprep.mubr.bf16.mxu1 %v6657_v59  ;;  %3454 = vmatpush3.bf16.msra.mxu1 %v4563_v39 }
 0x110   : >> { %3455 = vmatprep.subr.bf16.mxu1 %v4578_v45 }
 0x111   : >> { %1462 = vmatmul.mubr.bf16.vlgmr.msra.gmra.mrb[16].mxu0 %v4222_v7 }
 0x112   : >> { %1640 = vmatpush1.bf16.msra.mxu0 %v4232_v10  ;;  %1471 = vmatprep.mubr.bf16.mxu0 %v6657_v59  ;;  %v6705_v10 = vld [vmem:[#allocation21_spill] sm:$0xff] }
 0x113   : >> { %1641 = vmatprep.subr.bf16.mxu0 %v4234_v11  ;;  %3456 = vmatpush3.bf16.msra.mxu1 %v4578_v45 }
 0x114   : >> { %3457 = vmatprep.subr.bf16.mxu1 %v4583_v32 }
 0x116   : >> { %1642 = vmatpush1.bf16.msra.mxu0 %v4248_v41  ;;  %1399 = vmatmul.mubr.bf16.gmra.mrb[20].mxu1 %v4244_v2 }
 0x117   : >> { %1643 = vmatprep.subr.bf16.mxu0 %v4268_v22  ;;  %1408 = vmatprep.mubr.bf16.mxu1 %v6657_v59  ;;  %v6700_v22 = vld [vmem:[#allocation18_spill] sm:$0xff] }
 0x118   : >> { %3458 = vmatpush3.bf16.msra.mxu1 %v4583_v32 }
 0x119   : >> { %1472 = vmatmul.mubr.bf16.gmra.mrb[20].mxu0 %v4230_v9  ;;  %3459 = vmatprep.subr.bf16.mxu1 %v4598_v35 }
 0x11a   : >> { %1644 = vmatpush1.bf16.msra.mxu0 %v4270_v3  ;;  %1481 = vmatprep.mubr.bf16.mxu0 %v6657_v59 }
 0x11b   : >> { %1645 = vmatprep.subr.bf16.mxu0 %v4272_v40 }
 0x11c   : >> { %3460 = vmatpush3.bf16.msra.mxu1 %v4598_v35 }
 0x11d   : >> { %1732 = vmatprep.subr.bf16.mxu1 %v4334_v21 }
 0x11e   : >> { %1646 = vmatpush1.bf16.msra.mxu0 %v4276_v6  ;;  %1409 = vmatmul.mubr.bf16.gmra.mrb[24].mxu1 %v4226_v8  ;;  %v6708_v6 = vld [vmem:[#allocation26_spill] sm:$0xff] }
 0x11f   : >> { %1647 = vmatprep.subr.bf16.mxu0 %v4291_v5  ;;  %1418 = vmatprep.mubr.bf16.mxu1 %v6657_v59  ;;  %v6709_v5 = vld [vmem:[#allocation25_spill] sm:$0xff] }
 0x121   : >> { %1482 = vmatmul.mubr.bf16.gmra.mrb[24].mxu0 %v4240_v1 }
 0x122   : >> { %1491 = vmatprep.mubr.bf16.mxu0 %v6657_v59  ;;  %1648 = vmatpush1.bf16.msra.mxu0 %v4296_v37  ;;  %v3368_v37 = vcombine.low %v6709_v5, %v6708_v6 }
 0x123   : >> { %1649 = vmatprep.subr.bf16.mxu0 %v4300_v18 }
 0x126   : >> { %1650 = vmatpush1.bf16.msra.mxu0 %v4304_v13  ;;  %1419 = vmatmul.mubr.bf16.gmra.mrb[28].mxu1 %v4252_v42  ;;  %v6710_v13 = vld [vmem:[#allocation28_spill] sm:$0xff] }
 0x127   : >> { %1651 = vmatprep.subr.bf16.mxu0 %v4306_v14  ;;  %3461 = vmatprep.mubr.bf16.mxu1 %v4222_v7  ;;  %v6703_v7 = vld [vmem:[#allocation19_spill] sm:$0xff] }
 0x128   : >> { %v6711_v14 = vld [vmem:[#allocation27_spill] sm:$0xff] }
 0x129   : >> { %1492 = vmatmul.mubr.bf16.gmra.mrb[28].mxu0 %v4244_v2 }
 0x12a   : >> { %1501 = vmatprep.mubr.bf16.mxu0 %v6657_v59  ;;  %1652 = vmatpush1.bf16.msra.mxu0 %v4320_v50 }
 0x12b   : >> { %1653 = vmatprep.subr.bf16.mxu0 %v4322_v34  ;;  %v6701_v34 = vld [vmem:[#allocation17_spill] sm:$0xff] }
 0x12c   : >> { %v4749_v50 = vcombine.low %v6701_v34, %v6700_v22 }
 0x12e   : >> { %1654 = vmatpush1.bf16.msra.mxu0 %v4326_v15  ;;  %3462 = vmatmul.mubr.bf16.vlgmr.msra.gmra.mrb[32].mxu1 %v4230_v9  ;;  %v6704_v9 = vld [vmem:[#allocation22_spill] sm:$0xff]  ;;  %v3369_v15 = vcombine.low %v6711_v14, %v6710_v13 }
 0x12f   : >> { %1825 = vmatprep.subr.bf16.mxu0 %v4346_v36  ;;  %1733 = vmatpush1.bf16.msra.mxu1 %v4350_v17  ;;  %v3366_v11 = vcombine.low %v6705_v10, %v6704_v9 }
 0x130   : >> { %3465 = vmatprep.mubr.bf16.mxu1 %v4240_v1  ;;  %1734 = vmatprep.subr.bf16.mxu1 %v4356_v55  ;;  %v6706_v1 = vld [vmem:[#allocation24_spill] sm:$0xff] }
 0x131   : >> { %1502 = vmatmul.mubr.bf16.gmra.mrb[32].mxu0 %v4226_v8 }
 0x132   : >> { %1511 = vmatprep.mubr.bf16.mxu0 %v6657_v59 }
 0x133   : >> { %1735 = vmatpush1.bf16.msra.mxu1 %v6677_v43 }
 0x134   : >> { %1736 = vmatprep.subr.bf16.mxu1 %v4385_v38 }
 0x136   : >> { %3466 = vmatmul.mubr.bf16.gmra.mrb[36].mxu1 %v4244_v2  ;;  %v6707_v2 = vld [vmem:[#allocation23_spill] sm:$0xff] }
 0x137   : >> { %1737 = vmatpush1.bf16.msra.mxu1 %v4391_v61  ;;  %3469 = vmatprep.mubr.bf16.mxu1 %v4226_v8  ;;  %v4763_v8 = vcombine.low %v6703_v7, %v6702_v62  ;;  %v3367_v41 = vcombine.low %v6707_v2, %v6706_v1 }
 0x138   : >> { %1738 = vmatprep.subr.bf16.mxu1 %v6679_v20 }
 0x139   : >> { %1512 = vmatmul.mubr.bf16.gmra.mrb[36].mxu0 %v4252_v42 }
 0x13a   : >> { %1671 = vmatprep.mubr.bf16.mxu0 %v6657_v59 }
 0x13b   : >> { %1739 = vmatpush1.bf16.msra.mxu1 %v6681_v25 }
 0x13c   : >> { %1740 = vmatprep.subr.bf16.mxu1 %v6682_v29 }
 0x13e   : >> { %3470 = vmatmul.mubr.bf16.gmra.mrb[40].mxu1 %v4252_v42 }
 0x13f   : >> { %1741 = vmatpush1.bf16.msra.mxu1 %v6685_v52  ;;  %1764 = vmatprep.mubr.bf16.mxu1 %v6657_v59 }
 0x140   : >> { %1742 = vmatprep.subr.bf16.mxu1 %v6686_v48 }
 0x141   : >> { %1672 = vmatmul.mubr.bf16.vlgmr.msra.gmra.mrb[0].mxu0 %v4749_v50 }
 0x142   : >> { %1681 = vmatprep.mubr.bf16.mxu0 %v6657_v59  ;;  %1826 = vmatpush1.bf16.msra.mxu0 %v4354_v12 }
 0x143   : >> { %1827 = vmatprep.subr.bf16.mxu0 %v4360_v53  ;;  %1743 = vmatpush1.bf16.msra.mxu1 %v6689_v49 }
 0x144   : >> { %1744 = vmatprep.subr.bf16.mxu1 %v6690_v28 }
 0x146   : >> { %1828 = vmatpush1.bf16.msra.mxu0 %v6678_v46 }
 0x147   : >> { %1829 = vmatprep.subr.bf16.mxu0 %v4389_v57  ;;  %1745 = vmatpush1.bf16.msra.mxu1 %v6693_v63 }
 0x148   : >> { %1746 = vmatprep.subr.bf16.mxu1 %v6694_v0 }
 0x149   : >> { %1682 = vmatmul.mubr.bf16.gmra.mrb[4].mxu0 %v4763_v8 }
 0x14a   : >> { %1691 = vmatprep.mubr.bf16.mxu0 %v6657_v59  ;;  %1830 = vmatpush1.bf16.msra.mxu0 %v6680_v19 }
 0x14b   : >> { %1831 = vmatprep.subr.bf16.mxu0 %v4421_v54  ;;  %1747 = vmatpush1.bf16.msra.mxu1 %v6697_v33 }
 0x14c   : >> { %3473 = vmatprep.subr.bf16.mxu1 %v6698_v26 }
 0x14e   : >> { %1832 = vmatpush1.bf16.msra.mxu0 %v6683_v51  ;;  %1765 = vmatmul.mubr.bf16.vlgmr.msra.gmra.mrb[8].mxu1 %v4749_v50 }
 0x14f   : >> { %1833 = vmatprep.subr.bf16.mxu0 %v6684_v30  ;;  %1774 = vmatprep.mubr.bf16.mxu1 %v6657_v59 }
 0x150   : >> { %3474 = vmatpush3.bf16.msra.mxu1 %v6698_v26 }
 0x151   : >> { %1692 = vmatmul.mubr.bf16.gmra.mrb[8].mxu0 %v3366_v11  ;;  %3475 = vmatprep.subr.bf16.mxu1 %v4549_v27 }
 0x152   : >> { %1701 = vmatprep.mubr.bf16.mxu0 %v6657_v59  ;;  %1834 = vmatpush1.bf16.msra.mxu0 %v6687_v31 }
 0x153   : >> { %1835 = vmatprep.subr.bf16.mxu0 %v6688_v23 }
 0x154   : >> { %3476 = vmatpush3.bf16.msra.mxu1 %v4549_v27 }
 0x155   : >> { %3477 = vmatprep.subr.bf16.mxu1 %v4553_v44 }
 0x156   : >> { %1836 = vmatpush1.bf16.msra.mxu0 %v6691_v56  ;;  %1775 = vmatmul.mubr.bf16.gmra.mrb[12].mxu1 %v4763_v8 }
 0x157   : >> { %1837 = vmatprep.subr.bf16.mxu0 %v6692_v58  ;;  %1784 = vmatprep.mubr.bf16.mxu1 %v6657_v59 }
 0x158   : >> { %3478 = vmatpush3.bf16.msra.mxu1 %v4553_v44 }
 0x159   : >> { %1702 = vmatmul.mubr.bf16.gmra.mrb[12].mxu0 %v3367_v41  ;;  %3479 = vmatprep.subr.bf16.mxu1 %v4561_v60  ;;  %v4797_v42 = vpop.f32.mrb[0].mxu1 }
 0x15a   : >> { %1711 = vmatprep.mubr.bf16.mxu0 %v6657_v59  ;;  %1838 = vmatpush1.bf16.msra.mxu0 %v6695_v24  ;;  %v4800_v3 = vpop.f32.mrb[1].mxu1 }
 0x15b   : >> { %1839 = vmatprep.subr.bf16.mxu0 %v6696_v47  ;;  %v4803_v40 = vpop.f32.mrb[2].mxu1 }
 0x15c   : >> { %3480 = vmatpush3.bf16.msra.mxu1 %v4561_v60  ;;  %v4808_v18 = vpop.f32.mrb[3].mxu1 }
 0x15d   : >> { %3481 = vmatprep.subr.bf16.mxu1 %v4563_v39 }
 0x15e   : >> { %1840 = vmatpush1.bf16.msra.mxu0 %v6699_v16  ;;  %1785 = vmatmul.mubr.bf16.gmra.mrb[16].mxu1 %v3366_v11 }
 0x15f   : >> { %1794 = vmatprep.mubr.bf16.mxu1 %v6657_v59 }
 0x160   : >> { %3482 = vmatpush3.bf16.msra.mxu1 %v4563_v39 }
 0x161   : >> { %1712 = vmatmul.mubr.bf16.gmra.mrb[40].mxu0 %v3368_v37  ;;  %3483 = vmatprep.subr.bf16.mxu1 %v4578_v45 }
 0x162   : >> { %1721 = vmatprep.mubr.bf16.mxu0 %v6657_v59 }
 0x164   : >> { %3484 = vmatpush3.bf16.msra.mxu1 %v4578_v45  ;;  %v4820_v21 = vpop.f32.mrb[4].mxu1 }
 0x165   : >> { %3485 = vmatprep.subr.bf16.mxu1 %v4583_v32  ;;  %v4822_v36 = vpop.f32.mrb[5].mxu1 }
 0x166   : >> { %1795 = vmatmul.mubr.bf16.gmra.mrb[20].mxu1 %v3367_v41  ;;  %v4824_v17 = vpop.f32.mrb[6].mxu1 }
 0x167   : >> { %1804 = vmatprep.mubr.bf16.mxu1 %v6657_v59  ;;  %v4828_v12 = vpop.f32.mrb[7].mxu1 }
 0x168   : >> { %3486 = vmatpush3.bf16.msra.mxu1 %v4583_v32 }
 0x169   : >> { %1722 = vmatmul.mubr.bf16.gmra.mrb[44].mxu0 %v3369_v15  ;;  %3487 = vmatprep.subr.bf16.mxu1 %v4598_v35 }
 0x16a   : >> { %1857 = vmatprep.mubr.bf16.mxu0 %v6657_v59 }
 0x16c   : >> { %3488 = vmatpush3.bf16.msra.mxu1 %v4598_v35 }
 0x16e   : >> { %1805 = vmatmul.mubr.bf16.gmra.mrb[24].mxu1 %v3368_v37 }
 0x16f   : >> { %1814 = vmatprep.mubr.bf16.mxu1 %v6657_v59 }
 0x171   : >> { %1858 = vmatmul.mubr.bf16.vlgmr.msra.gmra.mrb[16].mxu0 %v4749_v50 }
 0x172   : >> { %1867 = vmatprep.mubr.bf16.mxu0 %v6657_v59 }
 0x176   : >> { %1815 = vmatmul.mubr.bf16.gmra.mrb[28].mxu1 %v3369_v15 }
 0x177   : >> { %3489 = vmatprep.mubr.bf16.mxu1 %v4749_v50 }
 0x179   : >> { %1868 = vmatmul.mubr.bf16.gmra.mrb[20].mxu0 %v4763_v8 }
 0x17a   : >> { %1877 = vmatprep.mubr.bf16.mxu0 %v6657_v59 }
 0x17e   : >> { %3490 = vmatmul.mubr.bf16.vlgmr.msra.gmra.mrb[32].mxu1 %v4763_v8 }
 0x17f   : >> { %3493 = vmatprep.mubr.bf16.mxu1 %v3366_v11 }
 0x181   : >> { %1878 = vmatmul.mubr.bf16.gmra.mrb[24].mxu0 %v3366_v11 }
 0x182   : >> { %1887 = vmatprep.mubr.bf16.mxu0 %v6657_v59 }
 0x186   : >> { %3494 = vmatmul.mubr.bf16.gmra.mrb[36].mxu1 %v3367_v41 }
 0x187   : >> { %3497 = vmatprep.mubr.bf16.mxu1 %v3368_v37 }
 0x189   : >> { %1888 = vmatmul.mubr.bf16.gmra.mrb[28].mxu0 %v3367_v41 }
 0x18a   : >> { %1897 = vmatprep.mubr.bf16.mxu0 %v6657_v59 }
 0x18e   : >> { %3498 = vmatmul.mubr.bf16.gmra.mrb[40].mxu1 %v3369_v15 }
 0x191   : >> { %1898 = vmatmul.mubr.bf16.gmra.mrb[32].mxu0 %v3368_v37 }
 0x192   : >> { %1907 = vmatprep.mubr.bf16.mxu0 %v6657_v59 }
 0x199   : >> { %1908 = vmatmul.mubr.bf16.gmra.mrb[36].mxu0 %v3369_v15 }
 0x214   : >> { %v1673_v55 = vpop.f32.mrb[0].mxu0 }
 0x215   : >> { %2084 = vrot.lane.b32.xlu0 %v1673_v55, %s3839_s19  ;;  %v1675_v53 = vpop.f32.mrb[1].mxu0 }
 0x216   : >> { %v1677_v38 = vpop.f32.mrb[2].mxu0 }
 0x217   : >> { %v1679_v57 = vpop.f32.mrb[3].mxu0 }
 0x218   : >> { %2098 = vrot.lane.b32.xlu1 %v1679_v57, %s3839_s19 }
 0x219   : >> { %2096 = vrot.lane.b32.xlu0 %v1675_v53, %s3839_s19 }
 0x21c   : >> { %v1683_v61 = vpop.f32.mrb[4].mxu0 }
 0x21d   : >> { %2087 = vrot.lane.b32.xlu0 %v1677_v38, %s3839_s19  ;;  %2090 = vrot.lane.b32.xlu1 %v1683_v61, %s3839_s19  ;;  %v1685_v54 = vpop.f32.mrb[5].mxu0 }
 0x21e   : >> { %v1687_v27 = vpop.f32.mrb[6].mxu0 }
 0x21f   : >> { %v1689_v59 = vpop.f32.mrb[7].mxu0 }
 0x221   : >> { %2100 = vrot.lane.b32.xlu0 %v1685_v54, %s3839_s19  ;;  %2093 = vrot.lane.b32.xlu1 %v1687_v27, %s3839_s19  ;;  %v1766_v44 = vpop.f32.mrb[8].mxu1 }
 0x222   : >> { %v1768_v60 = vpop.f32.mrb[9].mxu1 }
 0x223   : >> { %v1770_v45 = vpop.f32.mrb[10].mxu1 }
 0x224   : >> { %v1693_v39 = vpop.f32.mrb[8].mxu0  ;;  %v1772_v32 = vpop.f32.mrb[11].mxu1 }
 0x225   : >> { %2104 = vrot.lane.b32.xlu0 %v1766_v44, %s3839_s19  ;;  %2102 = vrot.lane.b32.xlu1 %v1689_v59, %s3839_s19  ;;  %v1695_v35 = vpop.f32.mrb[9].mxu0 }
 0x226   : >> { %v1697_v4 = vpop.f32.mrb[10].mxu0 }
 0x227   : >> { %v1699_v43 = vpop.f32.mrb[11].mxu0 }
 0x229   : >> { %2112 = vrot.lane.b32.xlu0 %v1768_v60, %s3839_s19  ;;  %2106 = vrot.lane.b32.xlu1 %v1770_v45, %s3839_s19  ;;  %v1776_v46 = vpop.f32.mrb[12].mxu1 }
 0x22a   : >> { %v1778_v20 = vpop.f32.mrb[13].mxu1 }
 0x22b   : >> { %v1780_v25 = vpop.f32.mrb[14].mxu1 }
 0x22c   : >> { %v1703_v19 = vpop.f32.mrb[12].mxu0  ;;  %v1782_v29 = vpop.f32.mrb[15].mxu1 }
 0x22d   : >> { %2114 = vrot.lane.b32.xlu1 %v1772_v32, %s3839_s19  ;;  %2514 = vrot.lane.b32.xlu0 %v1693_v39, %s3839_s19  ;;  %v1705_v51 = vpop.f32.mrb[13].mxu0 }
 0x22e   : >> { %v1707_v30 = vpop.f32.mrb[14].mxu0 }
 0x22f   : >> { %v1709_v52 = vpop.f32.mrb[15].mxu0 }
 0x231   : >> { %2526 = vrot.lane.b32.xlu0 %v1695_v35, %s3839_s19  ;;  %2517 = vrot.lane.b32.xlu1 %v1697_v4, %s3839_s19  ;;  %v1786_v48 = vpop.f32.mrb[16].mxu1 }
 0x232   : >> { %v1788_v31 = vpop.f32.mrb[17].mxu1 }
 0x233   : >> { %v1790_v49 = vpop.f32.mrb[18].mxu1 }
 0x234   : >> { %v1713_v23 = vpop.f32.mrb[40].mxu0  ;;  %v1792_v56 = vpop.f32.mrb[19].mxu1 }
 0x235   : >> { %v3517_v28 = vadd.f32 %v1713_v23, %v4797_v42  ;;  %2108 = vrot.lane.b32.xlu0 %v1776_v46, %s3839_s19  ;;  %2528 = vrot.lane.b32.xlu1 %v1699_v43, %s3839_s19  ;;  %v1715_v58 = vpop.f32.mrb[41].mxu0 }
 0x236   : >> { %v3518_v63 = vadd.f32 %v1715_v58, %v4800_v3  ;;  %v1717_v0 = vpop.f32.mrb[42].mxu0 }
 0x237   : >> { %v3519_v24 = vadd.f32 %v1717_v0, %v4803_v40  ;;  %v1719_v47 = vpop.f32.mrb[43].mxu0 }
 0x238   : >> { %v3520_v33 = vadd.f32 %v1719_v47, %v4808_v18 }
 0x239   : >> { %2116 = vrot.lane.b32.xlu0 %v1778_v20, %s3839_s19  ;;  %2110 = vrot.lane.b32.xlu1 %v1780_v25, %s3839_s19  ;;  %v1796_v26 = vpop.f32.mrb[20].mxu1 }
 0x23a   : >> { %v1798_v16 = vpop.f32.mrb[21].mxu1 }
 0x23b   : >> { %v1800_v34 = vpop.f32.mrb[22].mxu1 }
 0x23c   : >> { %v1723_v22 = vpop.f32.mrb[44].mxu0  ;;  %v1802_v62 = vpop.f32.mrb[23].mxu1 }
 0x23d   : >> { %v3521_v50 = vadd.f32 %v1723_v22, %v4820_v21  ;;  %2118 = vrot.lane.b32.xlu1 %v1782_v29, %s3839_s19  ;;  %2520 = vrot.lane.b32.xlu0 %v1703_v19, %s3839_s19  ;;  %v1725_v7 = vpop.f32.mrb[45].mxu0 }
 0x23e   : >> { %v3522_v8 = vadd.f32 %v1725_v7, %v4822_v36  ;;  %v1727_v9 = vpop.f32.mrb[46].mxu0 }
 0x23f   : >> { %v3523_v10 = vadd.f32 %v1727_v9, %v4824_v17  ;;  %v1729_v11 = vpop.f32.mrb[47].mxu0 }
 0x240   : >> { %v3524_v1 = vadd.f32 %v1729_v11, %v4828_v12 }
 0x241   : >> { %2530 = vrot.lane.b32.xlu0 %v1705_v51, %s3839_s19  ;;  %2523 = vrot.lane.b32.xlu1 %v1707_v30, %s3839_s19  ;;  %v1806_v2 = vpop.f32.mrb[24].mxu1 }
 0x242   : >> { %v1808_v41 = vpop.f32.mrb[25].mxu1 }
 0x243   : >> { %v1810_v42 = vpop.f32.mrb[26].mxu1 }
 0x244   : >> { %v1859_v3 = vpop.f32.mrb[16].mxu0  ;;  %v1812_v40 = vpop.f32.mrb[27].mxu1 }
 0x245   : >> { %2534 = vrot.lane.b32.xlu0 %v1786_v48, %s3839_s19  ;;  %2532 = vrot.lane.b32.xlu1 %v1709_v52, %s3839_s19  ;;  %v1861_v6 = vpop.f32.mrb[17].mxu0 }
 0x246   : >> { %v1863_v5 = vpop.f32.mrb[18].mxu0 }
 0x247   : >> { %v1865_v37 = vpop.f32.mrb[19].mxu0 }
 0x249   : >> { %2542 = vrot.lane.b32.xlu0 %v1788_v31, %s3839_s19  ;;  %2536 = vrot.lane.b32.xlu1 %v1790_v49, %s3839_s19  ;;  %v1816_v18 = vpop.f32.mrb[28].mxu1 }
 0x24a   : >> { %v1818_v13 = vpop.f32.mrb[29].mxu1 }
 0x24b   : >> { %v1820_v14 = vpop.f32.mrb[30].mxu1 }
 0x24c   : >> { %v1869_v15 = vpop.f32.mrb[20].mxu0  ;;  %v1822_v21 = vpop.f32.mrb[31].mxu1 }
 0x24d   : >> { %2544 = vrot.lane.b32.xlu1 %v1792_v56, %s3839_s19  ;;  %2930 = vrot.lane.b32.xlu0 %v3517_v28, %s3839_s19  ;;  %v4880_v36 = vpop.f32.mrb[21].mxu0 }
 0x24e   : >> { %v1873_v17 = vpop.f32.mrb[22].mxu0 }
 0x24f   : >> { %v4882_v12 = vpop.f32.mrb[23].mxu0 }
 0x251   : >> { %2942 = vrot.lane.b32.xlu0 %v3518_v63, %s3839_s19  ;;  %2933 = vrot.lane.b32.xlu1 %v3519_v24, %s3839_s19  ;;  %v4886_v55 = vpop.f32.mrb[32].mxu1 }
 0x252   : >> { %v4888_v53 = vpop.f32.mrb[33].mxu1 }
 0x253   : >> { %v4892_v57 = vpop.f32.mrb[34].mxu1 }
 0x254   : >> { %v4890_v38 = vpop.f32.mrb[24].mxu0  ;;  %v4894_v61 = vpop.f32.mrb[35].mxu1 }
 0x255   : >> { %2538 = vrot.lane.b32.xlu0 %v1796_v26, %s3839_s19  ;;  %2944 = vrot.lane.b32.xlu1 %v3520_v33, %s3839_s19  ;;  %v4898_v54 = vpop.f32.mrb[25].mxu0 }
 0x256   : >> { %v1883_v27 = vpop.f32.mrb[26].mxu0 }
 0x257   : >> { %v4900_v59 = vpop.f32.mrb[27].mxu0 }
 0x259   : >> { %2546 = vrot.lane.b32.xlu0 %v1798_v16, %s3839_s19  ;;  %2540 = vrot.lane.b32.xlu1 %v1800_v34, %s3839_s19  ;;  %v4904_v44 = vpop.f32.mrb[36].mxu1 }
 0x25a   : >> { %v4906_v60 = vpop.f32.mrb[37].mxu1 }
 0x25b   : >> { %v4910_v45 = vpop.f32.mrb[38].mxu1 }
 0x25c   : >> { %v4908_v39 = vpop.f32.mrb[28].mxu0  ;;  %v4912_v32 = vpop.f32.mrb[39].mxu1 }
 0x25d   : >> { %2548 = vrot.lane.b32.xlu1 %v1802_v62, %s3839_s19  ;;  %2936 = vrot.lane.b32.xlu0 %v3521_v50, %s3839_s19  ;;  %v4916_v35 = vpop.f32.mrb[29].mxu0 }
 0x25e   : >> { %v1893_v4 = vpop.f32.mrb[30].mxu0 }
 0x25f   : >> { %v4918_v43 = vpop.f32.mrb[31].mxu0 }
 0x261   : >> { %2946 = vrot.lane.b32.xlu0 %v3522_v8, %s3839_s19  ;;  %2939 = vrot.lane.b32.xlu1 %v3523_v10, %s3839_s19  ;;  %v4922_v46 = vpop.f32.mrb[40].mxu1 }
 0x262   : >> { %v4924_v20 = vpop.f32.mrb[41].mxu1 }
 0x263   : >> { %v4928_v25 = vpop.f32.mrb[42].mxu1 }
 0x264   : >> { %v4926_v19 = vpop.f32.mrb[32].mxu0  ;;  %v4930_v29 = vpop.f32.mrb[43].mxu1 }
 0x265   : >> { %2950 = vrot.lane.b32.xlu0 %v1806_v2, %s3839_s19  ;;  %2948 = vrot.lane.b32.xlu1 %v3524_v1, %s3839_s19  ;;  %v4934_v51 = vpop.f32.mrb[33].mxu0 }
 0x266   : >> { %v1903_v30 = vpop.f32.mrb[34].mxu0 }
 0x267   : >> { %v4936_v52 = vpop.f32.mrb[35].mxu0 }
 0x269   : >> { %2958 = vrot.lane.b32.xlu0 %v1808_v41, %s3839_s19  ;;  %2952 = vrot.lane.b32.xlu1 %v1810_v42, %s3839_s19 }
 0x26c   : >> { %v4940_v48 = vpop.f32.mrb[36].mxu0 }
 0x26d   : >> { %2960 = vrot.lane.b32.xlu1 %v1812_v40, %s3839_s19  ;;  %2120 = vrot.lane.b32.xlu0 %v1859_v3, %s3839_s19  ;;  %v4944_v31 = vpop.f32.mrb[37].mxu0 }
 0x26e   : >> { %v1913_v23 = vpop.f32.mrb[38].mxu0 }
 0x26f   : >> { %v4946_v49 = vpop.f32.mrb[39].mxu0 }
 0x271   : >> { %2128 = vrot.lane.b32.xlu0 %v1861_v6, %s3839_s19  ;;  %2122 = vrot.lane.b32.xlu1 %v1863_v5, %s3839_s19 }
 0x275   : >> { %2323 = vrot.lane.b32.xlu0 %v1861_v6, %s3840_s22  ;;  %2130 = vrot.lane.b32.xlu1 %v1865_v37, %s3839_s19 }
 0x279   : >> { %2339 = vrot.lane.b32.xlu0 %v1865_v37, %s3840_s22  ;;  %2956 = vrot.lane.b32.xlu1 %v1820_v14, %s3839_s19 }
 0x27d   : >> { %2954 = vrot.lane.b32.xlu0 %v1816_v18, %s3839_s19  ;;  %2964 = vrot.lane.b32.xlu1 %v1822_v21, %s3839_s19 }
 0x281   : >> { %2962 = vrot.lane.b32.xlu0 %v1818_v13, %s3839_s19  ;;  %2126 = vrot.lane.b32.xlu1 %v1873_v17, %s3839_s19 }
 0x285   : >> { %2124 = vrot.lane.b32.xlu0 %v1869_v15, %s3839_s19  ;;  %2134 = vrot.lane.b32.xlu1 %v4882_v12, %s3839_s19 }
 0x287   : >> { %v2085_v28 = vpop.permute.xlu0 %2084 }
 0x288   : >> { %v2086_v10 = vsel %vm2083_vm0, %v2085_v28, %v4888_v53 }
 0x289   : >> { %2132 = vrot.lane.b32.xlu0 %v4880_v36, %s3839_s19  ;;  %2552 = vrot.lane.b32.xlu1 %v1883_v27, %s3839_s19 }
 0x28a   : >> { %v4964_v56 = vpop.permute.xlu1 %2098 }
 0x28b   : >> { %v4966_v58 = vpop.permute.xlu0 %2096 }
 0x28c   : >> { %v2144_v2 = vsel %vm2083_vm0, %v4966_v58, %v2085_v28 }
 0x28d   : >> { %2355 = vrot.lane.b32.xlu0 %v4880_v36, %s3840_s22  ;;  %2560 = vrot.lane.b32.xlu1 %v4900_v59, %s3839_s19 }
 0x28f   : >> { %v4972_v63 = vpop.permute.xlu0 %2087  ;;  %v2091_v0 = vpop.permute.xlu1 %2090 }
 0x290   : >> { %v2089_v3 = vsel %vm2083_vm0, %v4972_v63, %v4894_v61  ;;  %v2092_v14 = vsel %vm2083_vm0, %v2091_v0, %v4886_v55 }
 0x291   : >> { %2371 = vrot.lane.b32.xlu0 %v4882_v12, %s3840_s22  ;;  %2556 = vrot.lane.b32.xlu1 %v1893_v4, %s3839_s19 }
 0x293   : >> { %v4977_v24 = vpop.permute.xlu0 %2100  ;;  %v4979_v47 = vpop.permute.xlu1 %2093 }
 0x294   : >> { %v2146_v36 = vsel %vm2083_vm0, %v4977_v24, %v2091_v0  ;;  %v2095_v55 = vsel %vm2083_vm0, %v4979_v47, %v4892_v57 }
 0x295   : >> { %2550 = vrot.lane.b32.xlu0 %v4890_v38, %s3839_s19  ;;  %2564 = vrot.lane.b32.xlu1 %v4918_v43, %s3839_s19 }
 0x297   : >> { %v4985_v33 = vpop.permute.xlu0 %2104  ;;  %v4987_v26 = vpop.permute.xlu1 %2102 }
 0x299   : >> { %2558 = vrot.lane.b32.xlu0 %v4898_v54, %s3839_s19  ;;  %2968 = vrot.lane.b32.xlu1 %v1903_v30, %s3839_s19 }
 0x29b   : >> { %v4992_v16 = vpop.permute.xlu0 %2112  ;;  %v4994_v22 = vpop.permute.xlu1 %2106 }
 0x29c   : >> { %v2152_v4 = vsel %vm2083_vm0, %v4992_v16, %v4985_v33 }
 0x29d   : >> { %2753 = vrot.lane.b32.xlu0 %v4898_v54, %s3841_s23  ;;  %2976 = vrot.lane.b32.xlu1 %v4936_v52, %s3839_s19 }
 0x29f   : >> { %v5000_v34 = vpop.permute.xlu1 %2114  ;;  %v5002_v50 = vpop.permute.xlu0 %2514 }
 0x2a1   : >> { %2769 = vrot.lane.b32.xlu0 %v4900_v59, %s3841_s23  ;;  %2972 = vrot.lane.b32.xlu1 %v1913_v23, %s3839_s19  ;;  %v2148_v59 = vsel %vm2083_vm0, %v4985_v33, %v4966_v58  ;;  %v2145_v23 = vsel %vm2083_vm0, %v4964_v56, %v4972_v63 }
 0x2a3   : >> { %v5007_v62 = vpop.permute.xlu0 %2526  ;;  %v5009_v7 = vpop.permute.xlu1 %2517 }
 0x2a4   : >> { %v2574_v0 = vsel %vm2083_vm0, %v5007_v62, %v5002_v50  ;;  %v2519_v63 = vsel %vm2083_vm0, %v5009_v7, %v4912_v32 }
 0x2a5   : >> { %2554 = vrot.lane.b32.xlu0 %v4908_v39, %s3839_s19  ;;  %2980 = vrot.lane.b32.xlu1 %v4946_v49, %s3839_s19 }
 0x2a7   : >> { %v5015_v8 = vpop.permute.xlu0 %2108  ;;  %v5017_v9 = vpop.permute.xlu1 %2528 }
 0x2a9   : >> { %2562 = vrot.lane.b32.xlu0 %v4916_v35, %s3839_s19  ;;  %2325 = vrot.lane.b32.xlu1 %v2086_v10, %s3840_s22 }
 0x2ab   : >> { %v5024_v11 = vpop.permute.xlu0 %2116  ;;  %v5026_v1 = vpop.permute.xlu1 %2110 }
 0x2ad   : >> { %2785 = vrot.lane.b32.xlu0 %v4916_v35, %s3841_s23  ;;  %2212 = vrot.lane.b32.xlu1 %v2144_v2, %s3842_s24 }
 0x2af   : >> { %v5033_v41 = vpop.permute.xlu1 %2118  ;;  %v5035_v42 = vpop.permute.xlu0 %2520 }
 0x2b1   : >> { %2801 = vrot.lane.b32.xlu0 %v4918_v43, %s3841_s23  ;;  %2138 = vrot.lane.b32.xlu1 %v2089_v3, %s3839_s19 }
 0x2b3   : >> { %v5043_v40 = vpop.permute.xlu0 %2530  ;;  %v5045_v6 = vpop.permute.xlu1 %2523 }
 0x2b5   : >> { %2966 = vrot.lane.b32.xlu0 %v4926_v19, %s3839_s19  ;;  %2224 = vrot.lane.b32.xlu1 %v2089_v3, %s3842_s24 }
 0x2b7   : >> { %v5050_v5 = vpop.permute.xlu0 %2534  ;;  %v5052_v37 = vpop.permute.xlu1 %2532 }
 0x2b9   : >> { %2974 = vrot.lane.b32.xlu0 %v4934_v51, %s3839_s19  ;;  %2341 = vrot.lane.b32.xlu1 %v2089_v3, %s3840_s22 }
 0x2bb   : >> { %v5057_v18 = vpop.permute.xlu0 %2542  ;;  %v5059_v13 = vpop.permute.xlu1 %2536 }
 0x2bd   : >> { %3060 = vrot.lane.b32.xlu0 %v4934_v51, %s3843_s27  ;;  %2357 = vrot.lane.b32.xlu1 %v2092_v14, %s3840_s22  ;;  %v2149_v51 = vsel %vm2083_vm0, %v4994_v22, %v4964_v56 }
 0x2bf   : >> { %v5066_v15 = vpop.permute.xlu1 %2544  ;;  %v5068_v21 = vpop.permute.xlu0 %2930 }
 0x2c1   : >> { %3076 = vrot.lane.b32.xlu0 %v4936_v52, %s3843_s27  ;;  %2240 = vrot.lane.b32.xlu1 %v2146_v36, %s3842_s24 }
 0x2c3   : >> { %v5075_v17 = vpop.permute.xlu0 %2942  ;;  %v5077_v12 = vpop.permute.xlu1 %2933 }
 0x2c5   : >> { %2970 = vrot.lane.b32.xlu0 %v4940_v48, %s3839_s19  ;;  %2142 = vrot.lane.b32.xlu1 %v2095_v55, %s3839_s19 }
 0x2c7   : >> { %v5085_v53 = vpop.permute.xlu0 %2538  ;;  %v5087_v38 = vpop.permute.xlu1 %2944 }
 0x2c9   : >> { %2978 = vrot.lane.b32.xlu0 %v4944_v31, %s3839_s19  ;;  %2252 = vrot.lane.b32.xlu1 %v2095_v55, %s3842_s24 }
 0x2cb   : >> { %v5092_v61 = vpop.permute.xlu0 %2546  ;;  %v5094_v54 = vpop.permute.xlu1 %2540 }
 0x2cd   : >> { %3092 = vrot.lane.b32.xlu0 %v4944_v31, %s3843_s27  ;;  %2373 = vrot.lane.b32.xlu1 %v2095_v55, %s3840_s22  ;;  %v2147_v55 = vsel %vm2083_vm0, %v4987_v26, %v4979_v47 }
 0x2cf   : >> { %v5099_v57 = vpop.permute.xlu1 %2548  ;;  %v5101_v27 = vpop.permute.xlu0 %2936 }
 0x2d1   : >> { %3108 = vrot.lane.b32.xlu0 %v4946_v49, %s3843_s27  ;;  %2329 = vrot.lane.b32.xlu1 %v2148_v59, %s3840_s22  ;;  %v2516_v49 = vsel %vm2083_vm0, %v5002_v50, %v4906_v60 }
 0x2d3   : >> { %v5109_v39 = vpop.permute.xlu0 %2946  ;;  %v5111_v35 = vpop.permute.xlu1 %2939 }
 0x2d5   : >> { %2136 = vrot.lane.b32.xlu0 %v2086_v10, %s3839_s19  ;;  %2216 = vrot.lane.b32.xlu1 %v2152_v4, %s3842_s24 }
 0x2d7   : >> { %v5118_v43 = vpop.permute.xlu0 %2950  ;;  %v5120_v19 = vpop.permute.xlu1 %2948 }
 0x2d9   : >> { %2210 = vrot.lane.b32.xlu0 %v2086_v10, %s3842_s24  ;;  %2228 = vrot.lane.b32.xlu1 %v2149_v51, %s3842_s24 }
 0x2db   : >> { %v5127_v30 = vpop.permute.xlu0 %2958  ;;  %v5129_v52 = vpop.permute.xlu1 %2952 }
 0x2dd   : >> { %2327 = vrot.lane.b32.xlu0 %v2144_v2, %s3840_s22  ;;  %2345 = vrot.lane.b32.xlu1 %v2149_v51, %s3840_s22 }
 0x2df   : >> { %v5133_v48 = vpop.permute.xlu1 %2960  ;;  %v5135_v31 = vpop.permute.xlu0 %2120 }
 0x2e1   : >> { %2226 = vrot.lane.b32.xlu0 %v2145_v23, %s3842_s24  ;;  %2755 = vrot.lane.b32.xlu1 %v2516_v49, %s3841_s23 }
 0x2e3   : >> { %v5145_v28 = vpop.permute.xlu0 %2128  ;;  %v5147_v58 = vpop.permute.xlu1 %2122 }
 0x2e5   : >> { %2343 = vrot.lane.b32.xlu0 %v2145_v23, %s3840_s22  ;;  %2642 = vrot.lane.b32.xlu1 %v2574_v0, %s3844_s25  ;;  %v2154_v23 = vsel %vm2083_vm0, %v5024_v11, %v5015_v8 }
 0x2e7   : >> { %v5154_v56 = vpop.permute.xlu0 %2323  ;;  %v5156_v60 = vpop.permute.xlu1 %2130 }
 0x2e9   : >> { %2140 = vrot.lane.b32.xlu0 %v2092_v14, %s3839_s19  ;;  %2568 = vrot.lane.b32.xlu1 %v2519_v63, %s3839_s19 }
 0x2eb   : >> { %v5163_v33 = vpop.permute.xlu0 %2339  ;;  %v5165_v50 = vpop.permute.xlu1 %2956 }
 0x2ec   : >> { %6712 = vst [vmem:[#allocation36_spill] sm:$0xff] %v5163_v33 }
 0x2ed   : >> { %2238 = vrot.lane.b32.xlu0 %v2092_v14, %s3842_s24  ;;  %2654 = vrot.lane.b32.xlu1 %v2519_v63, %s3844_s25  ;;  %v2150_v14 = vsel %vm2083_vm0, %v5015_v8, %v4977_v24  ;;  %v2151_v24 = vsel %vm2083_vm0, %v5026_v1, %v4987_v26  ;;  %v2522_v26 = vsel %vm2083_vm0, %v5035_v42, %v4904_v44 }
 0x2ee   : >> { %v2153_v44 = vsel %vm2083_vm0, %v5000_v34, %v4994_v22 }
 0x2ef   : >> { %v5169_v10 = vpop.permute.xlu0 %2954  ;;  %v5171_v2 = vpop.permute.xlu1 %2964 }
 0x2f0   : >> { %6713 = vst [vmem:[#allocation37_spill] sm:$0xff] %v5171_v2 }
 0x2f1   : >> { %2359 = vrot.lane.b32.xlu0 %v2146_v36, %s3840_s22  ;;  %2771 = vrot.lane.b32.xlu1 %v2519_v63, %s3841_s23 }
 0x2f3   : >> { %v5175_v32 = vpop.permute.xlu0 %2962  ;;  %v5177_v3 = vpop.permute.xlu1 %2126 }
 0x2f5   : >> { %2254 = vrot.lane.b32.xlu0 %v2147_v55, %s3842_s24  ;;  %2361 = vrot.lane.b32.xlu1 %v2150_v14, %s3840_s22 }
 0x2f7   : >> { %v5187_v51 = vpop.permute.xlu0 %2124  ;;  %v5189_v36 = vpop.permute.xlu1 %2134 }
 0x2f8   : >> { %6714 = vst [vmem:[#allocation39_spill] sm:$0xff] %v5189_v36 }
 0x2f9   : >> { %2375 = vrot.lane.b32.xlu0 %v2147_v55, %s3840_s22  ;;  %2244 = vrot.lane.b32.xlu1 %v2154_v23, %s3842_s24 }
 0x2fb   : >> { %v5196_v47 = vpop.permute.xlu0 %2132  ;;  %v5198_v63 = vpop.permute.xlu1 %2552 }
 0x2fd   : >> { %2214 = vrot.lane.b32.xlu0 %v2148_v59, %s3842_s24  ;;  %2256 = vrot.lane.b32.xlu1 %v2151_v24, %s3842_s24 }
 0x2ff   : >> { %v5205_v36 = vpop.permute.xlu0 %2355  ;;  %v5207_v2 = vpop.permute.xlu1 %2560 }
 0x300   : >> { %6715 = vst [vmem:[#allocation38_spill] sm:$0xff] %v5205_v36  ;;  %6716 = vst [vmem:[#allocation40_spill] sm:$0xff] %v5207_v2 }
 0x301   : >> { %2331 = vrot.lane.b32.xlu0 %v2152_v4, %s3840_s22  ;;  %2377 = vrot.lane.b32.xlu1 %v2151_v24, %s3840_s22  ;;  %v2576_v4 = vsel %vm2083_vm0, %v5043_v40, %v5035_v42 }
 0x303   : >> { %v5211_v8 = vpop.permute.xlu0 %2371  ;;  %v5213_v55 = vpop.permute.xlu1 %2556 }
 0x304   : >> { %6717 = vst [vmem:[#allocation42_spill] sm:$0xff] %v5211_v8 }
 0x305   : >> { %2566 = vrot.lane.b32.xlu0 %v2516_v49, %s3839_s19  ;;  %2787 = vrot.lane.b32.xlu1 %v2522_v26, %s3841_s23 }
 0x307   : >> { %v5220_v59 = vpop.permute.xlu0 %2550  ;;  %v5222_v36 = vpop.permute.xlu1 %2564 }
 0x308   : >> { %6718 = vst [vmem:[#allocation41_spill] sm:$0xff] %v5222_v36  ;;  %v2525_v36 = vsel %vm2083_vm0, %v5045_v6, %v4910_v45 }
 0x309   : >> { %2640 = vrot.lane.b32.xlu0 %v2516_v49, %s3844_s25  ;;  %2670 = vrot.lane.b32.xlu1 %v2576_v4, %s3844_s25 }
 0x30b   : >> { %v5229_v24 = vpop.permute.xlu0 %2558  ;;  %v5231_v8 = vpop.permute.xlu1 %2968 }
 0x30c   : >> { %6719 = vst [vmem:[#allocation43_spill] sm:$0xff] %v5231_v8 }
 0x30d   : >> { %2230 = vrot.lane.b32.xlu0 %v2153_v44, %s3842_s24  ;;  %2572 = vrot.lane.b32.xlu1 %v2525_v36, %s3839_s19 }
 0x30f   : >> { %v5241_v42 = vpop.permute.xlu0 %2753  ;;  %v5243_v49 = vpop.permute.xlu1 %2976 }
 0x310   : >> { %6720 = vst [vmem:[#allocation44_spill] sm:$0xff] %v5243_v49  ;;  %v2575_v49 = vsel %vm2083_vm0, %v5017_v9, %v5009_v7 }
 0x311   : >> { %2347 = vrot.lane.b32.xlu0 %v2153_v44, %s3840_s22  ;;  %2682 = vrot.lane.b32.xlu1 %v2525_v36, %s3844_s25  ;;  %v2578_v44 = vsel %vm2083_vm0, %v5050_v5, %v5007_v62  ;;  %v2579_v62 = vsel %vm2083_vm0, %v5059_v13, %v5017_v9  ;;  %v2932_v9 = vsel %vm2083_vm0, %v5068_v21, %v4924_v20 }
 0x312   : >> { %v2155_v20 = vsel %vm2083_vm0, %v5033_v41, %v5026_v1  ;;  %v2584_v1 = vsel %vm2083_vm0, %v5092_v61, %v5085_v53 }
 0x313   : >> { %v5247_v2 = vpop.permute.xlu0 %2769  ;;  %v5249_v8 = vpop.permute.xlu1 %2972 }
 0x314   : >> { %6721 = vst [vmem:[#allocation46_spill] sm:$0xff] %v5247_v2  ;;  %6722 = vst [vmem:[#allocation45_spill] sm:$0xff] %v5249_v8 }
 0x315   : >> { %2757 = vrot.lane.b32.xlu0 %v2574_v0, %s3841_s23  ;;  %2803 = vrot.lane.b32.xlu1 %v2525_v36, %s3841_s23  ;;  %v2582_v36 = vsel %vm2083_vm0, %v5057_v18, %v5050_v5 }
 0x317   : >> { %v5253_v45 = vpop.permute.xlu0 %2554  ;;  %v5255_v22 = vpop.permute.xlu1 %2980 }
 0x318   : >> { %6723 = vst [vmem:[#allocation47_spill] sm:$0xff] %v5255_v22 }
 0x319   : >> { %2656 = vrot.lane.b32.xlu0 %v2575_v49, %s3844_s25  ;;  %2759 = vrot.lane.b32.xlu1 %v2578_v44, %s3841_s23 }
 0x31b   : >> { %v5265_v8 = vpop.permute.xlu0 %2562  ;;  %v5267_v0 = vpop.permute.xlu1 %2325 }
 0x31c   : >> { %6724 = vst [vmem:[#allocation48_spill] sm:$0xff] %v5265_v8 }
 0x31d   : >> { %2773 = vrot.lane.b32.xlu0 %v2575_v49, %s3841_s23  ;;  %2646 = vrot.lane.b32.xlu1 %v2582_v36, %s3844_s25 }
 0x31f   : >> { %v5274_v7 = vpop.permute.xlu0 %2785  ;;  %v5276_v22 = vpop.permute.xlu1 %2212 }
 0x320   : >> { %6725 = vst [vmem:[#allocation50_spill] sm:$0xff] %v5274_v7 }
 0x321   : >> { %2242 = vrot.lane.b32.xlu0 %v2150_v14, %s3842_s24  ;;  %2658 = vrot.lane.b32.xlu1 %v2579_v62, %s3844_s25 }
 0x323   : >> { %v5283_v2 = vpop.permute.xlu0 %2801  ;;  %v5285_v33 = vpop.permute.xlu1 %2138 }
 0x324   : >> { %6726 = vst [vmem:[#allocation49_spill] sm:$0xff] %v5283_v2  ;;  %6727 = vst [vmem:[#allocation51_spill] sm:$0xff] %v5285_v33 }
 0x325   : >> { %2363 = vrot.lane.b32.xlu0 %v2154_v23, %s3840_s22  ;;  %2775 = vrot.lane.b32.xlu1 %v2579_v62, %s3841_s23  ;;  %v2935_v23 = vsel %vm2083_vm0, %v5077_v12, %v4930_v29  ;;  %v2580_v29 = vsel %vm2083_vm0, %v5085_v53, %v5043_v40  ;;  %v2577_v40 = vsel %vm2083_vm0, %v5052_v37, %v5045_v6 }
 0x326   : >> { %v2938_v6 = vsel %vm2083_vm0, %v5101_v27, %v4922_v46  ;;  %v2583_v46 = vsel %vm2083_vm0, %v5066_v15, %v5059_v13  ;;  %v2156_v13 = vsel %vm2083_vm0, %v5135_v31, %v4992_v16 }
 0x327   : >> { %v5289_v5 = vpop.permute.xlu0 %2966  ;;  %v5291_v49 = vpop.permute.xlu1 %2224 }
 0x329   : >> { %2570 = vrot.lane.b32.xlu0 %v2522_v26, %s3839_s19  ;;  %3062 = vrot.lane.b32.xlu1 %v2932_v9, %s3843_s27 }
 0x32b   : >> { %v5298_v14 = vpop.permute.xlu0 %2974  ;;  %v5300_v2 = vpop.permute.xlu1 %2341 }
 0x32c   : >> { %6728 = vst [vmem:[#allocation52_spill] sm:$0xff] %v5298_v14 }
 0x32d   : >> { %2668 = vrot.lane.b32.xlu0 %v2522_v26, %s3844_s25  ;;  %2984 = vrot.lane.b32.xlu1 %v2935_v23, %s3839_s19 }
 0x32f   : >> { %v5307_v62 = vpop.permute.xlu0 %3060  ;;  %v5309_v7 = vpop.permute.xlu1 %2357 }
 0x330   : >> { %6729 = vst [vmem:[#allocation54_spill] sm:$0xff] %v5309_v7 }
 0x331   : >> { %2258 = vrot.lane.b32.xlu0 %v2155_v20, %s3842_s24  ;;  %3078 = vrot.lane.b32.xlu1 %v2935_v23, %s3843_s27 }
 0x333   : >> { %v5316_v14 = vpop.permute.xlu0 %3076  ;;  %v5318_v33 = vpop.permute.xlu1 %2240 }
 0x334   : >> { %6730 = vst [vmem:[#allocation53_spill] sm:$0xff] %v5318_v33 }
 0x335   : >> { %2379 = vrot.lane.b32.xlu0 %v2155_v20, %s3840_s22  ;;  %2791 = vrot.lane.b32.xlu1 %v2580_v29, %s3841_s23  ;;  %v2581_v20 = vsel %vm2083_vm0, %v5094_v54, %v5052_v37 }
 0x337   : >> { %v5325_v26 = vpop.permute.xlu0 %2970  ;;  %v5327_v7 = vpop.permute.xlu1 %2142 }
 0x338   : >> { %6731 = vst [vmem:[#allocation55_spill] sm:$0xff] %v5327_v7 }
 0x339   : >> { %2789 = vrot.lane.b32.xlu0 %v2576_v4, %s3841_s23  ;;  %2674 = vrot.lane.b32.xlu1 %v2584_v1, %s3844_s25 }
 0x33b   : >> { %v5334_v23 = vpop.permute.xlu0 %2978  ;;  %v5336_v33 = vpop.permute.xlu1 %2252 }
 0x33c   : >> { %6732 = vst [vmem:[#allocation56_spill] sm:$0xff] %v5334_v23  ;;  %6733 = vst [vmem:[#allocation58_spill] sm:$0xff] %v5336_v33 }
 0x33d   : >> { %2684 = vrot.lane.b32.xlu0 %v2577_v40, %s3844_s25  ;;  %2686 = vrot.lane.b32.xlu1 %v2581_v20, %s3844_s25 }
 0x33f   : >> { %v5346_v53 = vpop.permute.xlu0 %3092  ;;  %v5348_v4 = vpop.permute.xlu1 %2373 }
 0x341   : >> { %2805 = vrot.lane.b32.xlu0 %v2577_v40, %s3841_s23  ;;  %2807 = vrot.lane.b32.xlu1 %v2581_v20, %s3841_s23  ;;  %v2941_v40 = vsel %vm2083_vm0, %v5111_v35, %v4928_v25  ;;  %v2994_v25 = vsel %vm2083_vm0, %v5118_v43, %v5075_v17 }
 0x343   : >> { %v5352_v23 = vpop.permute.xlu0 %3108  ;;  %v5354_v7 = vpop.permute.xlu1 %2329 }
 0x344   : >> { %6734 = vst [vmem:[#allocation57_spill] sm:$0xff] %v5354_v7 }
 0x345   : >> { %2644 = vrot.lane.b32.xlu0 %v2578_v44, %s3844_s25  ;;  %3094 = vrot.lane.b32.xlu1 %v2938_v6, %s3843_s27 }
 0x347   : >> { %v5361_v37 = vpop.permute.xlu0 %2136  ;;  %v5363_v33 = vpop.permute.xlu1 %2216 }
 0x348   : >> { %6735 = vst [vmem:[#allocation59_spill] sm:$0xff] %v5363_v33 }
 0x349   : >> { %2761 = vrot.lane.b32.xlu0 %v2582_v36, %s3841_s23  ;;  %2988 = vrot.lane.b32.xlu1 %v2941_v40, %s3839_s19 }
 0x34b   : >> { %v5370_v20 = vpop.permute.xlu0 %2210  ;;  %v5372_v7 = vpop.permute.xlu1 %2228 }
 0x34c   : >> { %6736 = vst [vmem:[#allocation60_spill] sm:$0xff] %v5372_v7 }
 0x34d   : >> { %2660 = vrot.lane.b32.xlu0 %v2583_v46, %s3844_s25  ;;  %3110 = vrot.lane.b32.xlu1 %v2941_v40, %s3843_s27 }
 0x34f   : >> { %v5379_v44 = vpop.permute.xlu0 %2327  ;;  %v5381_v33 = vpop.permute.xlu1 %2345 }
 0x350   : >> { %6737 = vst [vmem:[#allocation61_spill] sm:$0xff] %v5381_v33 }
 0x351   : >> { %2777 = vrot.lane.b32.xlu0 %v2583_v46, %s3841_s23  ;;  %3066 = vrot.lane.b32.xlu1 %v2994_v25, %s3843_s27  ;;  %v2990_v46 = vsel %vm2083_vm0, %v5075_v17, %v5068_v21  ;;  %v2995_v25 = vsel %vm2083_vm0, %v5129_v52, %v5087_v38  ;;  %v2160_v21 = vsel %vm2083_vm0, %v5145_v28, %v5135_v31 }
 0x353   : >> { %v5388_v36 = vpop.permute.xlu0 %2226  ;;  %v5390_v7 = vpop.permute.xlu1 %2755 }
 0x355   : >> { %2982 = vrot.lane.b32.xlu0 %v2932_v9, %s3839_s19  ;;  %2333 = vrot.lane.b32.xlu1 %v2156_v13, %s3840_s22 }
 0x357   : >> { %v5397_v40 = vpop.permute.xlu0 %2343  ;;  %v5399_v33 = vpop.permute.xlu1 %2642 }
 0x358   : >> { %6738 = vst [vmem:[#allocation62_spill] sm:$0xff] %v5397_v40  ;;  %v2991_v40 = vsel %vm2083_vm0, %v5087_v38, %v5077_v12 }
 0x359   : >> { %3064 = vrot.lane.b32.xlu0 %v2990_v46, %s3843_s27  ;;  %3082 = vrot.lane.b32.xlu1 %v2995_v25, %s3843_s27  ;;  %v2157_v25 = vsel %vm2083_vm0, %v5147_v58, %v5000_v34  ;;  %v2585_v34 = vsel %vm2083_vm0, %v5099_v57, %v5094_v54 }
 0x35b   : >> { %v5409_v16 = vpop.permute.xlu0 %2140  ;;  %v5411_v9 = vpop.permute.xlu1 %2568 }
 0x35d   : >> { %3080 = vrot.lane.b32.xlu0 %v2991_v40, %s3843_s27  ;;  %2220 = vrot.lane.b32.xlu1 %v2160_v21, %s3842_s24 }
 0x35f   : >> { %v5421_v17 = vpop.permute.xlu0 %2238  ;;  %v5423_v46 = vpop.permute.xlu1 %2654 }
 0x361   : >> { %2672 = vrot.lane.b32.xlu0 %v2580_v29, %s3844_s25  ;;  %2232 = vrot.lane.b32.xlu1 %v2157_v25, %s3842_s24  ;;  %v2996_v29 = vsel %vm2083_vm0, %v5169_v10, %v5109_v39 }
 0x363   : >> { %v5430_v12 = vpop.permute.xlu0 %2359  ;;  %v5432_v38 = vpop.permute.xlu1 %2771 }
 0x364   : >> { %6739 = vst [vmem:[#allocation63_spill] sm:$0xff] %v5430_v12 }
 0x365   : >> { %2793 = vrot.lane.b32.xlu0 %v2584_v1, %s3841_s23  ;;  %2349 = vrot.lane.b32.xlu1 %v2157_v25, %s3840_s22  ;;  %v5455_v25 = vsel %vm2083_vm0, %v5187_v51, %v5024_v11 }
 0x367   : >> { %v5436_v31 = vpop.permute.xlu0 %2254  ;;  %v5438_v40 = vpop.permute.xlu1 %2361 }
 0x368   : >> { %6740 = vst [vmem:[#allocation64_spill] sm:$0xff] %v5438_v40 }
 0x369   : >> { %2688 = vrot.lane.b32.xlu0 %v2585_v34, %s3844_s25  ;;  %3098 = vrot.lane.b32.xlu1 %v2996_v29, %s3843_s27  ;;  %v2997_v29 = vsel %vm2083_vm0, %v5165_v50, %v5120_v19 }
 0x36b   : >> { %v5448_v12 = vpop.permute.xlu0 %2375  ;;  %v5450_v1 = vpop.permute.xlu1 %2244 }
 0x36c   : >> { %6741 = vst [vmem:[#allocation65_spill] sm:$0xff] %v5448_v12  ;;  %6742 = vst [vmem:[#allocation66_spill] sm:$0xff] %v5450_v1 }
 0x36d   : >> { %2809 = vrot.lane.b32.xlu0 %v2585_v34, %s3841_s23  ;;  %2365 = vrot.lane.b32.xlu1 %v5455_v25, %s3840_s22  ;;  %v2992_v34 = vsel %vm2083_vm0, %v5109_v39, %v5101_v27  ;;  %v2159_v27 = vsel %vm2083_vm0, %v5177_v3, %v5033_v41  ;;  %v5510_v41 = vsel %vm2083_vm0, %v5220_v59, %v5057_v18 }
 0x36f   : >> { %v5460_v54 = vpop.permute.xlu0 %2214  ;;  %v5462_v40 = vpop.permute.xlu1 %2256 }
 0x370   : >> { %6743 = vst [vmem:[#allocation67_spill] sm:$0xff] %v5462_v40  ;;  %v5479_v40 = vsel %vm2083_vm0, %v5196_v47, %v5187_v51 }
 0x371   : >> { %2986 = vrot.lane.b32.xlu0 %v2938_v6, %s3839_s19  ;;  %3114 = vrot.lane.b32.xlu1 %v2997_v29, %s3843_s27 }
 0x373   : >> { %v5469_v12 = vpop.permute.xlu0 %2331  ;;  %v5471_v11 = vpop.permute.xlu1 %2377 }
 0x374   : >> { %6744 = vst [vmem:[#allocation68_spill] sm:$0xff] %v5469_v12  ;;  %6745 = vst [vmem:[#allocation69_spill] sm:$0xff] %v5471_v11  ;;  %v2993_v12 = vsel %vm2083_vm0, %v5120_v19, %v5111_v35  ;;  %v2161_v11 = vsel %vm2083_vm0, %v5156_v60, %v5147_v58 }
 0x375   : >> { %3096 = vrot.lane.b32.xlu0 %v2992_v34, %s3843_s27  ;;  %2248 = vrot.lane.b32.xlu1 %v5479_v40, %s3842_s24  ;;  %v2998_v34 = vsel %vm2083_vm0, %v5127_v30, %v5118_v43 }
 0x377   : >> { %v5484_v6 = vpop.permute.xlu0 %2566  ;;  %v5486_v29 = vpop.permute.xlu1 %2787 }
 0x379   : >> { %3112 = vrot.lane.b32.xlu0 %v2993_v12, %s3843_s27  ;;  %2260 = vrot.lane.b32.xlu1 %v2159_v27, %s3842_s24 }
 0x37b   : >> { %v2641_v39 = vpop.permute.xlu0 %2640  ;;  %v5496_v51 = vpop.permute.xlu1 %2670 }
 0x37d   : >> { %3068 = vrot.lane.b32.xlu0 %v2998_v34, %s3843_s27  ;;  %2381 = vrot.lane.b32.xlu1 %v2159_v27, %s3840_s22  ;;  %v5522_v27 = vsel %vm2083_vm0, %v5229_v24, %v5220_v59  ;;  %v2999_v34 = vsel %vm2083_vm0, %v5133_v48, %v5129_v52 }
 0x37f   : >> { %v5503_v35 = vpop.permute.xlu0 %2230  ;;  %v5505_v19 = vpop.permute.xlu1 %2572 }
 0x380   : >> { %6746 = vst [vmem:[#allocation70_spill] sm:$0xff] %v5505_v19 }
 0x381   : >> { %2218 = vrot.lane.b32.xlu0 %v2156_v13, %s3842_s24  ;;  %2763 = vrot.lane.b32.xlu1 %v5510_v41, %s3841_s23 }
 0x383   : >> { %v5515_v12 = vpop.permute.xlu0 %2347  ;;  %v5517_v43 = vpop.permute.xlu1 %2682 }
 0x384   : >> { %6747 = vst [vmem:[#allocation71_spill] sm:$0xff] %v5515_v12  ;;  %v2587_v12 = vsel %vm2083_vm0, %v5198_v63, %v5066_v15  ;;  %v5555_v15 = vsel %vm2083_vm0, %v5253_v45, %v5092_v61  ;;  %v5570_v61 = vsel %vm2083_vm0, %v5265_v8, %v5253_v45  ;;  %v6751_v8 = vld [vmem:[#allocation29_spill] sm:$0xff] }
 0x385   : >> { %2335 = vrot.lane.b32.xlu0 %v2160_v21, %s3840_s22  ;;  %2650 = vrot.lane.b32.xlu1 %v5522_v27, %s3844_s25  ;;  %vm6752_vm8 = vcmp.lt.s32.totalorder %v6751_v8, 2  ;;  %vm6753_vm9 = vcmp.lt.s32.totalorder %v6751_v8, 1  ;;  %vm6754_vm6 = vcmp.lt.s32.totalorder %v6751_v8, 27  ;;  %v6784_v8 = vld [vmem:[#allocation30_spill] sm:$0xff] }
 0x386   : >> { %vm6791_vm4 = vcmp.lt.s32.totalorder %v6784_v8, 27 }
 0x387   : >> { %v5527_v18 = vpop.permute.xlu0 %2757  ;;  %v5529_v13 = vpop.permute.xlu1 %2803 }
 0x389   : >> { %3084 = vrot.lane.b32.xlu0 %v2999_v34, %s3843_s27  ;;  %2662 = vrot.lane.b32.xlu1 %v2587_v12, %s3844_s25 }
 0x38b   : >> { %v5539_v59 = vpop.permute.xlu0 %2656  ;;  %v5541_v21 = vpop.permute.xlu1 %2759 }
 0x38d   : >> { %2234 = vrot.lane.b32.xlu0 %v2161_v11, %s3842_s24  ;;  %2779 = vrot.lane.b32.xlu1 %v2587_v12, %s3841_s23  ;;  %v3000_v12 = vsel %vm2083_vm0, %v5175_v32, %v5169_v10  ;;  %v2388_v10 = vsel %vm2387_vm1, %v5154_v56, %v5267_v0 }
 0x38f   : >> { %v5548_v52 = vpop.permute.xlu0 %2773  ;;  %v5550_v1 = vpop.permute.xlu1 %2646 }
 0x390   : >> { %6748 = vst [vmem:[#allocation72_spill] sm:$0xff] %v5548_v52 }
 0x391   : >> { %2351 = vrot.lane.b32.xlu0 %v2161_v11, %s3840_s22  ;;  %2795 = vrot.lane.b32.xlu1 %v5555_v15, %s3841_s23  ;;  %v2267_v11 = vsel %vm2266_vm7, %v5370_v20, %v5276_v22 }
 0x392   : >> { %v2444_v20 = vsel %vm6752_vm8, %v2267_v11, %v2388_v10 }
 0x393   : >> { %v5560_v58 = vpop.permute.xlu0 %2242  ;;  %v5562_v34 = vpop.permute.xlu1 %2658  ;;  %v2486_v56 = vsel %vm369_vm15, %v2444_v20, 0.0  ;;  %v6755_v20 = vld [vmem:[#allocation36_spill] sm:$0xff] }
 0x394   : >> { %6749 = vst [vmem:[#allocation73_spill] sm:$0xff] %v5560_v58  ;;  %v2697_v58 = vsel %vm2696_vm2, %v2641_v39, %v5399_v33  ;;  %v2589_v39 = vsel %vm2083_vm0, %v5213_v55, %v5099_v57 }
 0x395   : >> { %3100 = vrot.lane.b32.xlu0 %v3000_v12, %s3843_s27  ;;  %2678 = vrot.lane.b32.xlu1 %v5570_v61, %s3844_s25  ;;  %v2818_v12 = vsel %vm2817_vm3, %v5241_v42, %v5390_v7 }
 0x396   : >> { %v2874_v52 = vsel %vm6753_vm9, %v2697_v58, %v2818_v12 }
 0x397   : >> { %v5583_v45 = vpop.permute.xlu0 %2363  ;;  %v5585_v19 = vpop.permute.xlu1 %2775  ;;  %v2902_v10 = vadd.f32 %v2874_v52, %v2486_v56  ;;  %v2703_v52 = vsel %vm2696_vm2, %v5423_v46, %v5539_v59 }
 0x398   : >> { %6750 = vst [vmem:[#allocation74_spill] sm:$0xff] %v5583_v45  ;;  %v6756_v45 = vld [vmem:[#allocation46_spill] sm:$0xff] }
 0x399   : >> { %2246 = vrot.lane.b32.xlu0 %v5455_v25, %s3842_s24  ;;  %2690 = vrot.lane.b32.xlu1 %v2589_v39, %s3844_s25  ;;  %v2273_v25 = vsel %vm2266_vm7, %v5291_v49, %v5388_v36  ;;  %v2395_v49 = vsel %vm2387_vm1, %v6755_v20, %v5300_v2  ;;  %v6759_v20 = vld [vmem:[#allocation39_spill] sm:$0xff] }
 0x39b   : >> { %v5603_v11 = vpop.permute.xlu0 %2570  ;;  %v5605_v42 = vpop.permute.xlu1 %3062 }
 0x39c   : >> { %v3125_v57 = vsel %vm3124_vm12, %v5307_v62, %v5605_v42 }
 0x39d   : >> { %v3181_v58 = vsel %vm6754_vm6, %v3125_v57, 0.0  ;;  %2367 = vrot.lane.b32.xlu0 %v5479_v40, %s3840_s22  ;;  %2811 = vrot.lane.b32.xlu1 %v2589_v39, %s3841_s23  ;;  %v2451_v57 = vsel %vm6752_vm8, %v2273_v25, %v2395_v49  ;;  %v2825_v40 = vsel %vm2817_vm3, %v6756_v45, %v5432_v38  ;;  %v6757_v39 = vld [vmem:[#allocation37_spill] sm:$0xff]  ;;  %v6760_v49 = vld [vmem:[#allocation43_spill] sm:$0xff] }
 0x39e   : >> { %v3209_v62 = vadd.f32 %v3181_v58, %v2902_v10  ;;  %v3001_v46 = vsel %vm2083_vm0, %v6757_v39, %v5165_v50  ;;  %v3002_v10 = vsel %vm2083_vm0, %v5289_v5, %v5127_v30  ;;  %v2881_v58 = vsel %vm6753_vm9, %v2703_v52, %v2825_v40 }
 0x39f   : >> { %v2669_v12 = vpop.permute.xlu0 %2668  ;;  %v5627_v56 = vpop.permute.xlu1 %2984  ;;  %v2493_v45 = vsel %vm369_vm15, %v2451_v57, 0.0  ;;  %v2163_v52 = vsel %vm2083_vm0, %v6759_v20, %v5177_v3  ;;  %v3003_v40 = vsel %vm2083_vm0, %v6760_v49, %v5133_v48  ;;  %v3004_v3 = vsel %vm2083_vm0, %v5325_v26, %v5175_v32 }
 0x3a0   : >> { %3240 = vst [vmem:[%s5614_s15] sm:$0xff] %v3209_v62  ;;  %v2909_v50 = vadd.f32 %v2881_v58, %v2493_v45  ;;  %v6762_v45 = vld [vmem:[#allocation45_spill] sm:$0xff] }
 0x3a1   : >> { %3116 = vrot.lane.b32.xlu0 %v3001_v46, %s3843_s27  ;;  %3070 = vrot.lane.b32.xlu1 %v3002_v10, %s3843_s27 }
 0x3a3   : >> { %v5647_v25 = vpop.permute.xlu0 %2258  ;;  %v5649_v62 = vpop.permute.xlu1 %3078 }
 0x3a4   : >> { %6758 = vst [vmem:[#allocation36_spill] sm:$0xff] %v5647_v25  ;;  %v3132_v30 = vsel %vm3124_vm12, %v5316_v14, %v5649_v62 }
 0x3a5   : >> { %v3188_v57 = vsel %vm6754_vm6, %v3132_v30, 0.0  ;;  %2262 = vrot.lane.b32.xlu0 %v2163_v52, %s3842_s24  ;;  %3086 = vrot.lane.b32.xlu1 %v3003_v40, %s3843_s27  ;;  %v6764_v40 = vld [vmem:[#allocation53_spill] sm:$0xff] }
 0x3a6   : >> { %v3216_v46 = vadd.f32 %v3188_v57, %v2909_v50  ;;  %v3005_v50 = vsel %vm2083_vm0, %v6762_v45, %v6757_v39  ;;  %v2279_v57 = vsel %vm2266_vm7, %v5421_v17, %v6764_v40  ;;  %v6765_v39 = vld [vmem:[#allocation54_spill] sm:$0xff] }
 0x3a7   : >> { %v5664_v10 = vpop.permute.xlu0 %2379  ;;  %v5666_v58 = vpop.permute.xlu1 %2791 }
 0x3a8   : >> { %6761 = vst [vmem:[#allocation46_spill] sm:$0xff] %v5664_v10  ;;  %3248 = vst [vmem:[%s5614_s15 + $0x38] sm:$0xff] %v3216_v46  ;;  %v6766_v46 = vld [vmem:[#allocation38_spill] sm:$0xff] }
 0x3a9   : >> { %2383 = vrot.lane.b32.xlu0 %v2163_v52, %s3840_s22  ;;  %3102 = vrot.lane.b32.xlu1 %v3004_v3, %s3843_s27  ;;  %v5691_v52 = vsel %vm2083_vm0, %v5361_v37, %v5145_v28  ;;  %v2402_v3 = vsel %vm2387_vm1, %v6766_v46, %v6765_v39  ;;  %v6768_v37 = vld [vmem:[#allocation51_spill] sm:$0xff]  ;;  %v6769_v10 = vld [vmem:[#allocation50_spill] sm:$0xff] }
 0x3aa   : >> { %v2165_v17 = vsel %vm2083_vm0, %v6768_v37, %v5156_v60 }
 0x3ab   : >> { %v5674_v48 = vpop.permute.xlu0 %2789  ;;  %v5676_v14 = vpop.permute.xlu1 %2674 }
 0x3ad   : >> { %2648 = vrot.lane.b32.xlu0 %v5510_v41, %s3844_s25  ;;  %3118 = vrot.lane.b32.xlu1 %v3005_v50, %s3843_s27  ;;  %v2709_v41 = vsel %vm2696_vm2, %v2669_v12, %v5496_v51  ;;  %v6770_v12 = vld [vmem:[#allocation40_spill] sm:$0xff] }
 0x3ae   : >> { %v2591_v25 = vsel %vm2083_vm0, %v6770_v12, %v5198_v63  ;;  %v6772_v63 = vld [vmem:[#allocation58_spill] sm:$0xff] }
 0x3af   : >> { %v5684_v30 = vpop.permute.xlu0 %2684  ;;  %v5686_v32 = vpop.permute.xlu1 %2686 }
 0x3b0   : >> { %6763 = vst [vmem:[#allocation37_spill] sm:$0xff] %v5686_v32  ;;  %v2832_v32 = vsel %vm2817_vm3, %v6769_v10, %v5486_v29 }
 0x3b1   : >> { %2765 = vrot.lane.b32.xlu0 %v5522_v27, %s3841_s23  ;;  %2337 = vrot.lane.b32.xlu1 %v5691_v52, %s3840_s22  ;;  %v2458_v27 = vsel %vm6752_vm8, %v2279_v57, %v2402_v3  ;;  %v2888_v46 = vsel %vm6753_vm9, %v2709_v41, %v2832_v32  ;;  %v2285_v32 = vsel %vm2266_vm7, %v6772_v63, %v5436_v31 }
 0x3b2   : >> { %v2500_v60 = vsel %vm369_vm15, %v2458_v27, 0.0  ;;  %v2715_v27 = vsel %vm2696_vm2, %v5517_v43, %v5684_v30 }
 0x3b3   : >> { %v5705_v50 = vpop.permute.xlu0 %2805  ;;  %v5707_v28 = vpop.permute.xlu1 %2807  ;;  %v2916_v3 = vadd.f32 %v2888_v46, %v2500_v60  ;;  %v6773_v60 = vld [vmem:[#allocation42_spill] sm:$0xff] }
 0x3b4   : >> { %6767 = vst [vmem:[#allocation39_spill] sm:$0xff] %v5707_v28 }
 0x3b5   : >> { %2664 = vrot.lane.b32.xlu0 %v2591_v25, %s3844_s25  ;;  %2236 = vrot.lane.b32.xlu1 %v2165_v17, %s3842_s24 }
 0x3b7   : >> { %v2645_v37 = vpop.permute.xlu0 %2644  ;;  %v5726_v57 = vpop.permute.xlu1 %3094 }
 0x3b8   : >> { %6771 = vst [vmem:[#allocation43_spill] sm:$0xff] %v5726_v57  ;;  %v3139_v10 = vsel %vm3124_vm12, %v5346_v53, %v5726_v57  ;;  %v2409_v53 = vsel %vm2387_vm1, %v6773_v60, %v5348_v4 }
 0x3b9   : >> { %v3195_v41 = vsel %vm6754_vm6, %v3139_v10, 0.0  ;;  %2781 = vrot.lane.b32.xlu0 %v2591_v25, %s3841_s23  ;;  %2353 = vrot.lane.b32.xlu1 %v2165_v17, %s3840_s22  ;;  %v5751_v10 = vsel %vm2083_vm0, %v5409_v16, %v5196_v47  ;;  %v2465_v25 = vsel %vm6752_vm8, %v2285_v32, %v2409_v53  ;;  %v6775_v17 = vld [vmem:[#allocation49_spill] sm:$0xff]  ;;  %v6776_v32 = vld [vmem:[#allocation55_spill] sm:$0xff]  ;;  %vm6787_vm8 = vcmp.ge.s32.totalorder %v6784_v8, 1 }
 0x3ba   : >> { %v3223_v46 = vadd.f32 %v3195_v41, %v2916_v3  ;;  %v2839_v43 = vsel %vm2817_vm3, %v6775_v17, %v5529_v13  ;;  %v2507_v47 = vsel %vm369_vm15, %v2465_v25, 0.0  ;;  %v2167_v41 = vsel %vm2083_vm0, %v6776_v32, %v6759_v20  ;;  %v6777_v17 = vld [vmem:[#allocation59_spill] sm:$0xff]  ;;  %v6780_v32 = vld [vmem:[#allocation57_spill] sm:$0xff] }
 0x3bb   : >> { %v5744_v57 = vpop.permute.xlu0 %2761  ;;  %v5746_v28 = vpop.permute.xlu1 %2988  ;;  %v2895_v3 = vsel %vm6753_vm9, %v2715_v27, %v2839_v43  ;;  %v2268_v20 = vsel %vm2266_vm7, %v5276_v22, %v5460_v54  ;;  %v6778_v43 = vld [vmem:[#allocation41_spill] sm:$0xff] }
 0x3bc   : >> { %6774 = vst [vmem:[#allocation45_spill] sm:$0xff] %v5744_v57  ;;  %3255 = vst [vmem:[%s5614_s15 + $0x70] sm:$0xff] %v3223_v46  ;;  %v2923_v46 = vadd.f32 %v2895_v3, %v2507_v47  ;;  %v2389_v3 = vsel %vm2387_vm1, %v5267_v0, %v5379_v44  ;;  %v6779_v47 = vld [vmem:[#allocation52_spill] sm:$0xff]  ;;  %v2699_v0 = vsel %vm2696_vm2, %v2645_v37, %v5550_v1  ;;  %v6785_v57 = vld [vmem:[#allocation31_spill] sm:$0xff] }
 0x3bd   : >> { %2676 = vrot.lane.b32.xlu0 %v5555_v15, %s3844_s25  ;;  %2369 = vrot.lane.b32.xlu1 %v5751_v10, %s3840_s22  ;;  %v3006_v22 = vsel %vm2083_vm0, %v6779_v47, %v5289_v5  ;;  %vm6793_vm9 = vcmp.ge.s32.totalorder %v6785_v57, 1 }
 0x3bf   : >> { %v5767_v16 = vpop.permute.xlu0 %2660  ;;  %v5769_v63 = vpop.permute.xlu1 %3110 }
 0x3c0   : >> { %v3146_v15 = vsel %vm3124_vm12, %v5352_v23, %v5769_v63  ;;  %v2269_v23 = vsel %vm2266_vm7, %v5460_v54, %v6777_v17  ;;  %v2390_v54 = vsel %vm2387_vm1, %v5379_v44, %v6780_v32  ;;  %v2445_v44 = vsel %vm363_vm10, %v2268_v20, %v2389_v3 }
 0x3c1   : >> { %v3202_v27 = vsel %vm6754_vm6, %v3146_v15, 0.0  ;;  %2797 = vrot.lane.b32.xlu0 %v5570_v61, %s3841_s23  ;;  %2264 = vrot.lane.b32.xlu1 %v2167_v41, %s3842_s24  ;;  %v2593_v61 = vsel %vm2083_vm0, %v6778_v43, %v5213_v55  ;;  %v2698_v15 = vsel %vm2696_vm2, %v5399_v33, %v2645_v37  ;;  %v5831_v37 = vsel %vm2083_vm0, %v5484_v6, %v5229_v24 }
 0x3c2   : >> { %v3230_v60 = vadd.f32 %v3202_v27, %v2923_v46  ;;  %v6781_v46 = vld [vmem:[#allocation62_spill] sm:$0xff]  ;;  %v6782_v27 = vld [vmem:[#allocation60_spill] sm:$0xff]  ;;  %v2819_v20 = vsel %vm2817_vm3, %v5390_v7, %v5527_v18  ;;  %vm6786_vm6 = vcmp.lt.s32.totalorder %v6785_v57, 1  ;;  %v2595_v7 = vsel %vm2083_vm0, %v5411_v9, %v6770_v12 }
 0x3c3   : >> { %v5782_v53 = vpop.permute.xlu0 %2777  ;;  %v5784_v25 = vpop.permute.xlu1 %3066  ;;  %v2396_v55 = vsel %vm2387_vm1, %v5300_v2, %v6781_v46  ;;  %v2446_v2 = vsel %vm364_vm11, %v2269_v23, %v2390_v54  ;;  %v2820_v23 = vsel %vm2817_vm3, %v5527_v18, %v5541_v21  ;;  %v2875_v54 = vsel %vm377_vm14, %v2698_v15, %v2819_v20 }
 0x3c4   : >> { %3262 = vst [vmem:[%s5614_s15 + $0xa8] sm:$0xff] %v3230_v60  ;;  %v6783_v60 = vld [vmem:[#allocation61_spill] sm:$0xff]  ;;  %v2876_v24 = vsel %vm6786_vm6, %v2699_v0, %v2820_v23  ;;  %v2704_v6 = vsel %vm2696_vm2, %v5539_v59, %v5562_v34  ;;  %v2487_v18 = vsel %vm6787_vm8, %v2445_v44, 0.0  ;;  %vm6789_vm6 = vcmp.ge.s32.totalorder %v6785_v57, 1 }
 0x3c5   : >> { %2692 = vrot.lane.b32.xlu0 %v2593_v61, %s3844_s25  ;;  %2385 = vrot.lane.b32.xlu1 %v2167_v41, %s3840_s22  ;;  %v2274_v41 = vsel %vm2266_vm7, %v5388_v36, %v6782_v27  ;;  %v2397_v5 = vsel %vm2387_vm1, %v6781_v46, %v6783_v60  ;;  %v2275_v36 = vsel %vm2266_vm7, %v6782_v27, %v5503_v35  ;;  %v2488_v59 = vsel %vm6789_vm6, %v2446_v2, 0.0 }
 0x3c6   : >> { %v2452_v3 = vsel %vm363_vm10, %v2274_v41, %v2396_v55  ;;  %v2705_v46 = vsel %vm2696_vm2, %v5562_v34, %v5767_v16  ;;  %v6788_v55 = vld [vmem:[#allocation72_spill] sm:$0xff]  ;;  %v2903_v27 = vadd.f32 %v2875_v54, %v2487_v18  ;;  %v2904_v41 = vadd.f32 %v2876_v24, %v2488_v59 }
 0x3c7   : >> { %v5824_v32 = vpop.permute.xlu0 %2982  ;;  %v5826_v33 = vpop.permute.xlu1 %2333  ;;  %v2826_v15 = vsel %vm2817_vm3, %v5432_v38, %v6788_v55  ;;  %v2827_v9 = vsel %vm2817_vm3, %v6788_v55, %v5585_v19  ;;  %vm6790_vm8 = vcmp.lt.s32.totalorder %v6785_v57, 1  ;;  %vm6792_vm6 = vcmp.ge.s32.totalorder %v6784_v8, 1  ;;  %v6794_v18 = vld [vmem:[#allocation44_spill] sm:$0xff] }
 0x3c8   : >> { %v2882_v38 = vsel %vm377_vm14, %v2704_v6, %v2826_v15  ;;  %v2883_v44 = vsel %vm6790_vm8, %v2705_v46, %v2827_v9  ;;  %v2494_v23 = vsel %vm6792_vm6, %v2452_v3, 0.0  ;;  %v3007_v46 = vsel %vm2083_vm0, %v6794_v18, %v6760_v49 }
 0x3c9   : >> { %2813 = vrot.lane.b32.xlu0 %v2593_v61, %s3841_s23  ;;  %2767 = vrot.lane.b32.xlu1 %v5831_v37, %s3841_s23  ;;  %v2453_v61 = vsel %vm364_vm11, %v2275_v36, %v2397_v5 }
 0x3ca   : >> { %v2495_v54 = vsel %vm6793_vm9, %v2453_v61, 0.0  ;;  %vm6807_vm9 = vmmov %vm6790_vm8 }
 0x3cb   : >> { %v3065_v12 = vpop.permute.xlu0 %3064  ;;  %v5872_v0 = vpop.permute.xlu1 %3082  ;;  %v2911_v55 = vadd.f32 %v2883_v44, %v2495_v54  ;;  %v6797_v44 = vld [vmem:[#allocation70_spill] sm:$0xff]  ;;  %vm6809_vm8 = vmmov %vm6792_vm6  ;;  %vm6810_vm6 = vcmp.ge.s32.totalorder %v6785_v57, 1 }
 0x3cc   : >> { %v3126_v34 = vsel %vm3124_vm12, %v5605_v42, %v3065_v12  ;;  %v3127_v5 = vsel %vm3124_vm12, %v3065_v12, %v5784_v25 }
 0x3cd   : >> { %v3182_v2 = vsel %vm6791_vm4, %v3126_v34, 0.0  ;;  %v3183_v36 = vsel %vm385_vm5, %v3127_v5, 0.0  ;;  %3072 = vrot.lane.b32.xlu0 %v3006_v22, %s3843_s27  ;;  %2666 = vrot.lane.b32.xlu1 %v2595_v7, %s3844_s25  ;;  %v2910_v22 = vadd.f32 %v2882_v38, %v2494_v23  ;;  %v6796_v34 = vld [vmem:[#allocation56_spill] sm:$0xff] }
 0x3ce   : >> { %v3210_v42 = vadd.f32 %v3182_v2, %v2903_v27  ;;  %v3211_v20 = vadd.f32 %v3183_v36, %v2904_v41  ;;  %v6795_v41 = vld [vmem:[#allocation48_spill] sm:$0xff]  ;;  %v3008_v5 = vsel %vm2083_vm0, %v6796_v34, %v5325_v26  ;;  %v2597_v2 = vsel %vm2083_vm0, %v6797_v44, %v6778_v43 }
 0x3cf   : >> { %v3081_v24 = vpop.permute.xlu0 %3080  ;;  %v5892_v6 = vpop.permute.xlu1 %2220 }
 0x3d0   : >> { %3241 = vst [vmem:[%s5614_s15 + $0x8] sm:$0xff] %v3210_v42  ;;  %3242 = vst [vmem:[%s5614_s15 + $0x10] sm:$0xff] %v3211_v20  ;;  %v3133_v15 = vsel %vm3124_vm12, %v5649_v62, %v3081_v24  ;;  %v3134_v3 = vsel %vm3124_vm12, %v3081_v24, %v5872_v0  ;;  %v2596_v62 = vsel %vm2083_vm0, %v5603_v11, %v6795_v41  ;;  %v6798_v20 = vld [vmem:[#allocation73_spill] sm:$0xff] }
 0x3d1   : >> { %v3189_v61 = vsel %vm6791_vm4, %v3133_v15, 0.0  ;;  %v3190_v9 = vsel %vm385_vm5, %v3134_v3, 0.0  ;;  %3088 = vrot.lane.b32.xlu0 %v3007_v46, %s3843_s27  ;;  %2783 = vrot.lane.b32.xlu1 %v2595_v7, %s3841_s23  ;;  %v2280_v23 = vsel %vm2266_vm7, %v6764_v40, %v6798_v20  ;;  %v3010_v24 = vsel %vm2083_vm0, %v5824_v32, %v6779_v47  ;;  %v6800_v46 = vld [vmem:[#allocation63_spill] sm:$0xff]  ;;  %v6802_v15 = vld [vmem:[#allocation64_spill] sm:$0xff]  ;;  %v6803_v32 = vld [vmem:[#allocation65_spill] sm:$0xff] }
 0x3d2   : >> { %v3217_v49 = vadd.f32 %v3189_v61, %v2910_v22  ;;  %v3218_v59 = vadd.f32 %v3190_v9, %v2911_v55  ;;  %v6801_v40 = vld [vmem:[#allocation47_spill] sm:$0xff]  ;;  %v2404_v47 = vsel %vm2387_vm1, %v6800_v46, %v6802_v15  ;;  %v3011_v9 = vsel %vm2083_vm0, %v5627_v56, %v6794_v18  ;;  %v6806_v18 = vld [vmem:[#allocation69_spill] sm:$0xff] }
 0x3d3   : >> { %v2673_v12 = vpop.permute.xlu0 %2672  ;;  %v5909_v27 = vpop.permute.xlu1 %2232  ;;  %v3009_v22 = vsel %vm2083_vm0, %v6801_v40, %v6762_v45  ;;  %v6804_v3 = vld [vmem:[#allocation67_spill] sm:$0xff]  ;;  %v2834_v41 = vsel %vm2817_vm3, %v5674_v48, %v5666_v58  ;;  %v2411_v44 = vsel %vm2387_vm1, %v6803_v32, %v6806_v18 }
 0x3d4   : >> { %3249 = vst [vmem:[%s5614_s15 + $0x40] sm:$0xff] %v3217_v49  ;;  %3250 = vst [vmem:[%s5614_s15 + $0x48] sm:$0xff] %v3218_v59  ;;  %v2710_v55 = vsel %vm2696_vm2, %v5496_v51, %v2673_v12  ;;  %v2286_v51 = vsel %vm2266_vm7, %v5436_v31, %v6804_v3  ;;  %v6805_v31 = vld [vmem:[#allocation36_spill] sm:$0xff] }
 0x3d5   : >> { %3104 = vrot.lane.b32.xlu0 %v3008_v5, %s3843_s27  ;;  %2799 = vrot.lane.b32.xlu1 %v2596_v62, %s3841_s23  ;;  %v2840_v5 = vsel %vm2817_vm3, %v5529_v13, %v5705_v50 }
 0x3d7   : >> { %v5921_v7 = vpop.permute.xlu0 %2793  ;;  %v5923_v38 = vpop.permute.xlu1 %2349 }
 0x3d8   : >> { %v5931_v11 = vsel %vm2817_vm3, %v5666_v58, %v5921_v7  ;;  %v6808_v58 = vld [vmem:[#allocation37_spill] sm:$0xff] }
 0x3d9   : >> { %2222 = vrot.lane.b32.xlu0 %v5691_v52, %s3842_s24  ;;  %2694 = vrot.lane.b32.xlu1 %v2597_v2, %s3844_s25  ;;  %v6799_v52 = vld [vmem:[#allocation66_spill] sm:$0xff]  ;;  %v2716_v13 = vsel %vm2696_vm2, %v5684_v30, %v6808_v58 }
 0x3da   : >> { %v2281_v54 = vsel %vm2266_vm7, %v6798_v20, %v6799_v52 }
 0x3db   : >> { %v5936_v26 = vpop.permute.xlu0 %2688  ;;  %v5938_v36 = vpop.permute.xlu1 %3098  ;;  %v2460_v45 = vsel %vm364_vm11, %v2281_v54, %v2404_v47 }
 0x3dc   : >> { %v2502_v20 = vsel %vm6810_vm6, %v2460_v45, 0.0 }
 0x3dd   : >> { %2250 = vrot.lane.b32.xlu0 %v5751_v10, %s3842_s24  ;;  %2815 = vrot.lane.b32.xlu1 %v2597_v2, %s3841_s23  ;;  %v2403_v10 = vsel %vm2387_vm1, %v6765_v39, %v6800_v46  ;;  %v2410_v39 = vsel %vm2387_vm1, %v5348_v4, %v6803_v32  ;;  %v2833_v4 = vsel %vm2817_vm3, %v5486_v29, %v5674_v48 }
 0x3de   : >> { %v2459_v61 = vsel %vm363_vm10, %v2280_v23, %v2403_v10  ;;  %v2889_v56 = vsel %vm377_vm14, %v2710_v55, %v2833_v4  ;;  %v2466_v29 = vsel %vm363_vm10, %v2286_v51, %v2410_v39  ;;  %v2717_v23 = vsel %vm2696_vm2, %v6808_v58, %v5936_v26  ;;  %v6812_v39 = vld [vmem:[#allocation43_spill] sm:$0xff] }
 0x3df   : >> { %v5943_v43 = vpop.permute.xlu0 %2809  ;;  %v5945_v42 = vpop.permute.xlu1 %2365  ;;  %v2501_v48 = vsel %vm6809_vm8, %v2459_v61, 0.0 }
 0x3e0   : >> { %v2917_v46 = vadd.f32 %v2889_v56, %v2501_v48 }
 0x3e1   : >> { %2652 = vrot.lane.b32.xlu0 %v5831_v37, %s3844_s25  ;;  %3074 = vrot.lane.b32.xlu1 %v3010_v24, %s3843_s27  ;;  %v2711_v37 = vsel %vm2696_vm2, %v2673_v12, %v5676_v14  ;;  %v2287_v12 = vsel %vm2266_vm7, %v6804_v3, %v6805_v31  ;;  %v6811_v24 = vld [vmem:[#allocation39_spill] sm:$0xff] }
 0x3e2   : >> { %v2890_v2 = vsel %vm6807_vm9, %v2711_v37, %v2834_v41  ;;  %v2467_v54 = vsel %vm364_vm11, %v2287_v12, %v2411_v44  ;;  %v2841_v30 = vsel %vm2817_vm3, %v5705_v50, %v6811_v24 }
 0x3e3   : >> { %v2987_v49 = vpop.permute.xlu0 %2986  ;;  %v5988_v59 = vpop.permute.xlu1 %3114  ;;  %v2918_v47 = vadd.f32 %v2890_v2, %v2502_v20  ;;  %v2897_v37 = vsel %vm6807_vm9, %v2717_v23, %v2841_v30  ;;  %v2509_v4 = vsel %vm6810_vm6, %v2467_v54, 0.0  ;;  %v2276_v20 = vsel %vm2266_vm7, %v5503_v35, %v5909_v27  ;;  %v6813_v30 = vld [vmem:[#allocation71_spill] sm:$0xff] }
 0x3e4   : >> { %v3012_v32 = vsel %vm2083_vm0, %v2987_v49, %v6796_v34  ;;  %v2508_v34 = vsel %vm6809_vm8, %v2466_v29, 0.0 }
 0x3e5   : >> { %2680 = vrot.lane.b32.xlu0 %v2596_v62, %s3844_s25  ;;  %3090 = vrot.lane.b32.xlu1 %v3011_v9, %s3843_s27  ;;  %v2896_v62 = vsel %vm377_vm14, %v2716_v13, %v2840_v5  ;;  %v2925_v5 = vadd.f32 %v2897_v37, %v2509_v4 }
 0x3e6   : >> { %v2924_v49 = vadd.f32 %v2896_v62, %v2508_v34 }
 0x3e7   : >> { %v3097_v10 = vpop.permute.xlu0 %3096  ;;  %v6027_v55 = vpop.permute.xlu1 %2248 }
 0x3e8   : >> { %v3140_v3 = vsel %vm3124_vm12, %v6812_v39, %v3097_v10  ;;  %v3141_v51 = vsel %vm3124_vm12, %v3097_v10, %v5938_v36  ;;  %v6814_v10 = vld [vmem:[#allocation32_spill] sm:$0xff]  ;;  %v2828_v39 = vsel %vm2817_vm3, %v5585_v19, %v5782_v53 }
 0x3e9   : >> { %v3196_v50 = vsel %vm6791_vm4, %v3140_v3, 0.0  ;;  %v3197_v61 = vsel %vm385_vm5, %v3141_v51, 0.0  ;;  %3120 = vrot.lane.b32.xlu0 %v3009_v22, %s3843_s27  ;;  %3106 = vrot.lane.b32.xlu1 %v3012_v32, %s3843_s27  ;;  %v3013_v22 = vsel %vm2083_vm0, %v5746_v28, %v6801_v40  ;;  %vm6815_vm0 = vcmp.lt.s32.totalorder %v6814_v10, 2 }
 0x3ea   : >> { %v3224_v45 = vadd.f32 %v3196_v50, %v2917_v46  ;;  %v3225_v9 = vadd.f32 %v3197_v61, %v2918_v47  ;;  %v2398_v46 = vsel %vm2387_vm1, %v6783_v60, %v6813_v30  ;;  %vm6816_vm9 = vcmp.ge.s32.totalorder %v6814_v10, 1 }
 0x3eb   : >> { %v3113_v12 = vpop.permute.xlu0 %3112  ;;  %v6047_v41 = vpop.permute.xlu1 %2260  ;;  %v2454_v47 = vsel %vm6815_vm0, %v2276_v20, %v2398_v46  ;;  %vm6817_vm8 = vcmp.lt.s32.totalorder %v6814_v10, 1 }
 0x3ec   : >> { %3256 = vst [vmem:[%s5614_s15 + $0x78] sm:$0xff] %v3224_v45  ;;  %3257 = vst [vmem:[%s5614_s15 + $0x80] sm:$0xff] %v3225_v9  ;;  %v3147_v56 = vsel %vm3124_vm12, %v5769_v63, %v3113_v12  ;;  %v3148_v29 = vsel %vm3124_vm12, %v3113_v12, %v5988_v59  ;;  %v2496_v51 = vsel %vm6816_vm9, %v2454_v47, 0.0  ;;  %v6818_v9 = vld [vmem:[#allocation33_spill] sm:$0xff] }
 0x3ed   : >> { %v3203_v44 = vsel %vm6791_vm4, %v3147_v56, 0.0  ;;  %v3204_v2 = vsel %vm385_vm5, %v3148_v29, 0.0  ;;  %3122 = vrot.lane.b32.xlu1 %v3013_v22, %s3843_s27  ;;  %vm6819_vm6 = vcmp.lt.s32.totalorder %v6818_v9, 2  ;;  %vm6821_vm9 = vmmov %vm6817_vm8  ;;  %vm6830_vm4 = vcmp.lt.s32.totalorder %v6818_v9, 27 }
 0x3ee   : >> { %v3231_v58 = vadd.f32 %v3203_v44, %v2924_v49  ;;  %v3232_v13 = vadd.f32 %v3204_v2, %v2925_v5  ;;  %v6820_v2 = vld [vmem:[#allocation46_spill] sm:$0xff] }
 0x3ef   : >> { %v6063_v28 = vpop.permute.xlu0 %3068  ;;  %v6065_v40 = vpop.permute.xlu1 %2381 }
 0x3f0   : >> { %3263 = vst [vmem:[%s5614_s15 + $0xb0] sm:$0xff] %v3231_v58  ;;  %3264 = vst [vmem:[%s5614_s15 + $0xb8] sm:$0xff] %v3232_v13  ;;  %v2412_v58 = vsel %vm2387_vm1, %v6806_v18, %v6820_v2 }
 0x3f3   : >> { %v2219_v63 = vpop.permute.xlu0 %2218  ;;  %v6069_v48 = vpop.permute.xlu1 %2763 }
 0x3f7   : >> { %v6074_v23 = vpop.permute.xlu0 %2335  ;;  %v6076_v54 = vpop.permute.xlu1 %2650 }
 0x3f8   : >> { %v6081_v62 = vsel %vm2387_vm1, %v5826_v33, %v6074_v23 }
 0x3fb   : >> { %v6088_v32 = vpop.permute.xlu0 %3084  ;;  %v6090_v35 = vpop.permute.xlu1 %2662 }
 0x3fc   : >> { %v3135_v3 = vsel %vm3124_vm12, %v5872_v0, %v6088_v32  ;;  %v2706_v60 = vsel %vm2696_vm2, %v5767_v16, %v6090_v35  ;;  %v2399_v0 = vsel %vm2387_vm1, %v6813_v30, %v5923_v38  ;;  %v2842_v30 = vsel %vm2817_vm3, %v6811_v24, %v5943_v43 }
 0x3fd   : >> { %v2884_v37 = vsel %vm6817_vm8, %v2706_v60, %v2828_v39  ;;  %v3191_v61 = vsel %vm386_vm13, %v3135_v3, 0.0  ;;  %vm6822_vm8 = vcmp.ge.s32.totalorder %v6814_v10, 1 }
 0x3fe   : >> { %v2912_v50 = vadd.f32 %v2884_v37, %v2496_v51 }
 0x3ff   : >> { %v6107_v34 = vpop.permute.xlu0 %2234  ;;  %v6109_v19 = vpop.permute.xlu1 %2779 }
 0x400   : >> { %v3219_v45 = vadd.f32 %v3191_v61, %v2912_v50  ;;  %v2277_v16 = vsel %vm2266_vm7, %v5909_v27, %v6107_v34  ;;  %v2288_v27 = vsel %vm2266_vm7, %v6805_v31, %v6047_v41  ;;  %v2413_v61 = vsel %vm2387_vm1, %v6820_v2, %v6065_v40  ;;  %v6823_v2 = vld [vmem:[#allocation68_spill] sm:$0xff] }
 0x401   : >> { %v6119_v4 = vsel %vm6819_vm6, %v2277_v16, %v2399_v0  ;;  %v2468_v31 = vsel %vm6815_vm0, %v2288_v27, %v2412_v58  ;;  %v2271_v16 = vsel %vm2266_vm7, %v2219_v63, %v5892_v6  ;;  %v6824_v58 = vld [vmem:[#allocation57_spill] sm:$0xff] }
 0x402   : >> { %3251 = vst [vmem:[%s5614_s15 + $0x50] sm:$0xff] %v3219_v45  ;;  %v2510_v46 = vsel %vm6822_vm8, %v2468_v31, 0.0  ;;  %v2270_v45 = vsel %vm2266_vm7, %v6777_v17, %v2219_v63 }
 0x403   : >> { %v6122_v49 = vpop.permute.xlu0 %2351  ;;  %v6124_v12 = vpop.permute.xlu1 %2795 }
 0x407   : >> { %v6126_v22 = vpop.permute.xlu0 %3100  ;;  %v6128_v5 = vpop.permute.xlu1 %2678 }
 0x40b   : >> { %v6130_v56 = vpop.permute.xlu0 %2246  ;;  %v6132_v29 = vpop.permute.xlu1 %2690 }
 0x40c   : >> { %v2718_v44 = vsel %vm2696_vm2, %v5936_v26, %v6132_v29 }
 0x40d   : >> { %v2898_v18 = vsel %vm6821_vm9, %v2718_v44, %v2842_v30  ;;  %v2391_v30 = vsel %vm2387_vm1, %v6824_v58, %v6823_v2  ;;  %vm6825_vm9 = vmmov %vm6819_vm6 }
 0x40e   : >> { %v2926_v3 = vadd.f32 %v2898_v18, %v2510_v46  ;;  %v2447_v31 = vsel %vm6815_vm0, %v2270_v45, %v2391_v30  ;;  %v6826_v18 = vld [vmem:[#allocation45_spill] sm:$0xff]  ;;  %v3128_v46 = vsel %vm3124_vm12, %v5784_v25, %v6063_v28  ;;  %vm6828_vm0 = vcmp.lt.s32.totalorder %v6814_v10, 1 }
 0x40f   : >> { %v6143_v13 = vpop.permute.xlu0 %2367  ;;  %v6145_v20 = vpop.permute.xlu1 %2811  ;;  %v2821_v63 = vsel %vm2817_vm3, %v5541_v21, %v6826_v18  ;;  %v2489_v25 = vsel %vm6822_vm8, %v2447_v31, 0.0 }
 0x410   : >> { %v6155_v26 = vsel %vm2387_vm1, %v5945_v42, %v6143_v13 }
 0x413   : >> { %v6161_v47 = vpop.permute.xlu0 %3116  ;;  %v6163_v39 = vpop.permute.xlu1 %3070 }
 0x414   : >> { %v3149_v24 = vsel %vm3124_vm12, %v5988_v59, %v6161_v47 }
 0x415   : >> { %v3205_v60 = vsel %vm386_vm13, %v3149_v24, 0.0 }
 0x416   : >> { %v3233_v51 = vadd.f32 %v3205_v60, %v2926_v3  ;;  %v3129_v60 = vsel %vm3124_vm12, %v6063_v28, %v6163_v39 }
 0x417   : >> { %v6170_v37 = vpop.permute.xlu0 %2262  ;;  %v6172_v50 = vpop.permute.xlu1 %3086 }
 0x418   : >> { %3265 = vst [vmem:[%s5614_s15 + $0xc0] sm:$0xff] %v3233_v51  ;;  %v2289_v0 = vsel %vm2266_vm7, %v6047_v41, %v6170_v37  ;;  %v2392_v41 = vsel %vm2387_vm1, %v6823_v2, %v5826_v33  ;;  %v2822_v33 = vsel %vm2817_vm3, %v6826_v18, %v6069_v48  ;;  %v3185_v2 = vsel %vm6830_vm4, %v3129_v60, 0.0 }
 0x419   : >> { %v6183_v59 = vsel %vm6819_vm6, %v2289_v0, %v2413_v61  ;;  %v2448_v17 = vsel %vm6825_vm9, %v2271_v16, %v2392_v41  ;;  %vm6827_vm6 = vcmp.ge.s32.totalorder %v6818_v9, 1  ;;  %vm6829_vm9 = vcmp.lt.s32.totalorder %v6818_v9, 1 }
 0x41a   : >> { %v2490_v61 = vsel %vm6827_vm6, %v2448_v17, 0.0  ;;  %v2829_v17 = vsel %vm2817_vm3, %v5782_v53, %v6109_v19  ;;  %vm6831_vm4 = vmmov %vm6827_vm6 }
 0x41b   : >> { %v6189_v27 = vpop.permute.xlu0 %2383  ;;  %v6191_v44 = vpop.permute.xlu1 %3102  ;;  %v2497_v53 = vsel %vm6831_vm4, %v6119_v4, 0.0  ;;  %vm6832_vm8 = vmmov %vm6829_vm9  ;;  %vm6838_vm4 = vcmp.lt.s32.totalorder %v6818_v9, 2 }
 0x41f   : >> { %v2649_v3 = vpop.permute.xlu0 %2648  ;;  %v6209_v24 = vpop.permute.xlu1 %3118 }
 0x420   : >> { %v2700_v21 = vsel %vm2696_vm2, %v5550_v1, %v2649_v3  ;;  %v2701_v51 = vsel %vm2696_vm2, %v2649_v3, %v6076_v54  ;;  %v3184_v1 = vsel %vm386_vm13, %v3128_v46, 0.0  ;;  %v2400_v46 = vsel %vm2387_vm1, %v5923_v38, %v6122_v49  ;;  %v6833_v38 = vld [vmem:[#allocation34_spill] sm:$0xff] }
 0x421   : >> { %v2877_v0 = vsel %vm6828_vm0, %v2700_v21, %v2821_v63  ;;  %v2878_v45 = vsel %vm6829_vm9, %v2701_v51, %v2822_v33  ;;  %v3136_v3 = vsel %vm3124_vm12, %v6088_v32, %v6172_v50  ;;  %vm6834_vm6 = vcmp.lt.s32.totalorder %v6833_v38, 2 }
 0x422   : >> { %v2905_v28 = vadd.f32 %v2877_v0, %v2489_v25  ;;  %v2906_v16 = vadd.f32 %v2878_v45, %v2490_v61  ;;  %v2282_v32 = vsel %vm2266_vm7, %v6799_v52, %v6130_v56  ;;  %vm6835_vm0 = vcmp.lt.s32.totalorder %v6818_v9, 27  ;;  %v6836_v45 = vld [vmem:[#allocation74_spill] sm:$0xff] }
 0x423   : >> { %v6233_v58 = vpop.permute.xlu0 %2765  ;;  %v6235_v30 = vpop.permute.xlu1 %2337  ;;  %vm6837_vm9 = vcmp.lt.s32.totalorder %v6814_v10, 2 }
 0x424   : >> { %v3212_v41 = vadd.f32 %v3184_v1, %v2905_v28  ;;  %v3213_v31 = vadd.f32 %v3185_v2, %v2906_v16  ;;  %v2405_v28 = vsel %vm2387_vm1, %v6802_v15, %v6836_v45  ;;  %v2406_v16 = vsel %vm2387_vm1, %v6836_v45, %v5945_v42 }
 0x425   : >> { %v2461_v52 = vsel %vm6837_vm9, %v2282_v32, %v2405_v28  ;;  %v2836_v1 = vsel %vm2817_vm3, %v5921_v7, %v6124_v12  ;;  %v3142_v15 = vsel %vm3124_vm12, %v5938_v36, %v6126_v22  ;;  %v3143_v42 = vsel %vm3124_vm12, %v6126_v22, %v6191_v44 }
 0x426   : >> { %3243 = vst [vmem:[%s5614_s15 + $0x18] sm:$0xff] %v3212_v41  ;;  %3244 = vst [vmem:[%s5614_s15 + $0x20] sm:$0xff] %v3213_v31  ;;  %vm6842_vm9 = vcmp.lt.s32.totalorder %v6818_v9, 1  ;;  %v2843_v28 = vsel %vm2817_vm3, %v5943_v43, %v6145_v20 }
 0x427   : >> { %v2665_v18 = vpop.permute.xlu0 %2664  ;;  %v6242_v63 = vpop.permute.xlu1 %2236 }
 0x428   : >> { %v2707_v33 = vsel %vm2696_vm2, %v6090_v35, %v2665_v18  ;;  %v2278_v60 = vsel %vm2266_vm7, %v6107_v34, %v6242_v63  ;;  %v2283_v35 = vsel %vm2266_vm7, %v6130_v56, %v6027_v55  ;;  %v3192_v34 = vsel %vm6835_vm0, %v3136_v3, 0.0 }
 0x429   : >> { %v2885_v21 = vsel %vm6832_vm8, %v2707_v33, %v2829_v17  ;;  %v2456_v51 = vsel %vm6834_vm6, %v2278_v60, %v2400_v46  ;;  %v2462_v56 = vsel %vm6838_vm4, %v2283_v35, %v2406_v16  ;;  %vm6839_vm8 = vcmp.ge.s32.totalorder %v6814_v10, 1 }
 0x42a   : >> { %v2913_v25 = vadd.f32 %v2885_v21, %v2497_v53  ;;  %v2503_v7 = vsel %vm6839_vm8, %v2461_v52, 0.0  ;;  %vm6840_vm6 = vcmp.ge.s32.totalorder %v6818_v9, 1  ;;  %vm6841_vm0 = vcmp.lt.s32.totalorder %v6814_v10, 1 }
 0x42b   : >> { %v6270_v61 = vpop.permute.xlu0 %2781  ;;  %v2354_v4 = vpop.permute.xlu1 %2353  ;;  %v2504_v46 = vsel %vm6840_vm6, %v2462_v56, 0.0  ;;  %v3198_v33 = vsel %vm386_vm13, %v3142_v15, 0.0  ;;  %vm6843_vm4 = vcmp.lt.s32.totalorder %v6818_v9, 27  ;;  %vm6844_vm8 = vcmp.lt.s32.totalorder %v6833_v38, 2 }
 0x42c   : >> { %v3220_v0 = vadd.f32 %v3192_v34, %v2913_v25  ;;  %v3199_v60 = vsel %vm6843_vm4, %v3143_v42, 0.0  ;;  %v2414_v25 = vsel %vm2387_vm1, %v6065_v40, %v6189_v27  ;;  %v3150_v40 = vsel %vm3124_vm12, %v6161_v47, %v6209_v24 }
 0x42d   : >> { %v2511_v16 = vsel %vm6840_vm6, %v6183_v59, 0.0  ;;  %vm6849_vm6 = vcmp.lt.s32.totalorder %v6833_v38, 27 }
 0x42e   : >> { %3252 = vst [vmem:[%s5614_s15 + $0x58] sm:$0xff] %v3220_v0 }
 0x42f   : >> { %v2677_v2 = vpop.permute.xlu0 %2676  ;;  %v6286_v41 = vpop.permute.xlu1 %2369 }
 0x430   : >> { %v2712_v31 = vsel %vm2696_vm2, %v5676_v14, %v2677_v2  ;;  %v2713_v17 = vsel %vm2696_vm2, %v2677_v2, %v6128_v5 }
 0x431   : >> { %v2891_v36 = vsel %vm6841_vm0, %v2712_v31, %v5931_v11  ;;  %v2892_v22 = vsel %vm6842_vm9, %v2713_v17, %v2836_v1  ;;  %vm6845_vm0 = vmmov %vm6842_vm9 }
 0x432   : >> { %v2919_v3 = vadd.f32 %v2891_v36, %v2503_v7  ;;  %v2920_v14 = vadd.f32 %v2892_v22, %v2504_v46  ;;  %vm6846_vm9 = vmmov %vm6843_vm4  ;;  %vm6847_vm4 = vcmp.ge.s32.totalorder %v6833_v38, 1 }
 0x433   : >> { %v6311_v53 = vpop.permute.xlu0 %2797  ;;  %v6313_v21 = vpop.permute.xlu1 %2264  ;;  %v3206_v1 = vsel %vm6846_vm9, %v3150_v40, 0.0  ;;  %v2498_v31 = vsel %vm6847_vm4, %v2456_v51, 0.0  ;;  %v2401_v51 = vsel %vm2387_vm1, %v6122_v49, %v2354_v4 }
 0x434   : >> { %v3226_v11 = vadd.f32 %v3198_v33, %v2919_v3  ;;  %v3227_v32 = vadd.f32 %v3199_v60, %v2920_v14  ;;  %v2290_v35 = vsel %vm2266_vm7, %v6170_v37, %v6313_v21 }
 0x435   : >> { %v2470_v34 = vsel %vm6844_vm8, %v2290_v35, %v2414_v25  ;;  %vm6848_vm8 = vcmp.lt.s32.totalorder %v6833_v38, 1 }
 0x436   : >> { %3258 = vst [vmem:[%s5614_s15 + $0x88] sm:$0xff] %v3226_v11  ;;  %3259 = vst [vmem:[%s5614_s15 + $0x90] sm:$0xff] %v3227_v32 }
 0x437   : >> { %v2693_v0 = vpop.permute.xlu0 %2692  ;;  %v6325_v45 = vpop.permute.xlu1 %2385  ;;  %vm6851_vm9 = vmmov %vm6848_vm8 }
 0x438   : >> { %v2719_v37 = vsel %vm2696_vm2, %v6132_v29, %v2693_v0  ;;  %v2830_v29 = vsel %vm2817_vm3, %v6109_v19, %v6270_v61 }
 0x439   : >> { %v2899_v52 = vsel %vm6845_vm0, %v2719_v37, %v2843_v28  ;;  %vm6850_vm0 = vmmov %vm6847_vm4  ;;  %v6852_v28 = vld [vmem:[#allocation35_spill] sm:$0xff]  ;;  %v2823_v37 = vsel %vm2817_vm3, %v6069_v48, %v6233_v58 }
 0x43a   : >> { %v2927_v56 = vadd.f32 %v2899_v52, %v2511_v16  ;;  %v2512_v11 = vsel %vm6850_vm0, %v2470_v34, 0.0  ;;  %vm6853_vm4 = vcmp.lt.s32.totalorder %v6852_v28, 2  ;;  %vm6855_vm0 = vcmp.ge.s32.totalorder %v6852_v28, 1 }
 0x43b   : >> { %v6342_v2 = vpop.permute.xlu0 %2813  ;;  %v2768_v43 = vpop.permute.xlu1 %2767  ;;  %v2457_v40 = vsel %vm6853_vm4, %v6242_v63, %v2401_v51  ;;  %v2408_v63 = vsel %vm2387_vm1, %v6143_v13, %v6286_v41 }
 0x43c   : >> { %v3234_v15 = vadd.f32 %v3206_v1, %v2927_v56  ;;  %v2844_v25 = vsel %vm2817_vm3, %v6145_v20, %v6342_v2  ;;  %v2824_v48 = vsel %vm2817_vm3, %v6233_v58, %v2768_v43 }
 0x43e   : >> { %3266 = vst [vmem:[%s5614_s15 + $0xc8] sm:$0xff] %v3234_v15 }
 0x43f   : >> { %v3073_v47 = vpop.permute.xlu0 %3072  ;;  %v2667_v42 = vpop.permute.xlu1 %2666 }
 0x440   : >> { %v2708_v59 = vsel %vm2696_vm2, %v2665_v18, %v2667_v42 }
 0x441   : >> { %v2886_v17 = vsel %vm6848_vm8, %v2708_v59, %v2830_v29  ;;  %vm6854_vm8 = vmmov %vm6853_vm4  ;;  %vm6857_vm4 = vcmp.lt.s32.totalorder %v6852_v28, 1 }
 0x442   : >> { %v2914_v7 = vadd.f32 %v2886_v17, %v2498_v31 }
 0x443   : >> { %v3089_v46 = vpop.permute.xlu0 %3088  ;;  %v2784_v36 = vpop.permute.xlu1 %2783 }
 0x444   : >> { %v3137_v22 = vsel %vm3124_vm12, %v6172_v50, %v3089_v46  ;;  %v2831_v34 = vsel %vm2817_vm3, %v6270_v61, %v2784_v36  ;;  %v3130_v61 = vsel %vm3124_vm12, %v6163_v39, %v3073_v47 }
 0x445   : >> { %v3193_v3 = vsel %vm6849_vm6, %v3137_v22, 0.0  ;;  %vm3246_vm6 = vcmask 130048   ;;  %v2887_v52 = vsel %vm6857_vm4, %v2667_v42, %v2831_v34 }
 0x446   : >> { %v3221_v14 = vadd.f32 %v3193_v3, %v2914_v7 }
 0x447   : >> { %v6357_v33 = vpop.permute.xlu0 %3104  ;;  %v2800_v19 = vpop.permute.xlu1 %2799 }
 0x448   : >> { %3253 = vst [vmem:[%s5614_s15 + $0x60] sm:$0xff] %v3221_v14  ;;  %v3144_v31 = vsel %vm3124_vm12, %v6191_v44, %v6357_v33  ;;  %v2838_v17 = vsel %vm2817_vm3, %v6311_v53, %v2800_v19 }
 0x44b   : >> { %v2223_v18 = vpop.permute.xlu0 %2222  ;;  %v6360_v60 = vpop.permute.xlu1 %2694 }
 0x44c   : >> { %v2720_v50 = vsel %vm2696_vm2, %v2693_v0, %v6360_v60  ;;  %v2272_v49 = vsel %vm2266_vm7, %v5892_v6, %v2223_v18  ;;  %v2394_v0 = vsel %vm2387_vm1, %v6074_v23, %v6235_v30  ;;  %v2499_v6 = vsel %vm6855_vm0, %v2457_v40, 0.0 }
 0x44d   : >> { %v2900_v32 = vsel %vm6851_vm9, %v2720_v50, %v2844_v25  ;;  %v2450_v16 = vsel %vm6854_vm8, %v2223_v18, %v2394_v0  ;;  %v2837_v23 = vsel %vm2817_vm3, %v6124_v12, %v6311_v53  ;;  %vm6856_vm9 = vcmp.lt.s32.totalorder %v6833_v38, 2  ;;  %vm6858_vm8 = vmmov %vm6855_vm0 }
 0x44e   : >> { %v6373_v35 = vadd.f32 %v2900_v32, %v2512_v11  ;;  %v2449_v30 = vsel %vm6856_vm9, %v2272_v49, %v6081_v62  ;;  %v2492_v12 = vsel %vm6858_vm8, %v2450_v16, 0.0  ;;  %vm6859_vm0 = vmmov %vm6857_vm4  ;;  %vm6860_vm9 = vcmp.ge.s32.totalorder %v6833_v38, 1 }
 0x44f   : >> { %v2251_v4 = vpop.permute.xlu0 %2250  ;;  %v2816_v20 = vpop.permute.xlu1 %2815  ;;  %v2491_v39 = vsel %vm6860_vm9, %v2449_v30, 0.0  ;;  %vm6861_vm4 = vcmp.lt.s32.totalorder %v6833_v38, 1  ;;  %vm6863_vm8 = vcmp.lt.s32.totalorder %v6833_v38, 27  ;;  %v2915_v59 = vadd.f32 %v2887_v52, %v2499_v6 }
 0x450   : >> { %v2284_v13 = vsel %vm2266_vm7, %v6027_v55, %v2251_v4  ;;  %vm6862_vm7 = vcmp.lt.s32.totalorder %v6852_v28, 27  ;;  %v3186_v42 = vsel %vm6863_vm8, %v3130_v61, 0.0  ;;  %vm6867_vm8 = vcmp.lt.s32.totalorder %v6852_v28, 27 }
 0x453   : >> { %v2653_v41 = vpop.permute.xlu0 %2652  ;;  %v3075_v56 = vpop.permute.xlu1 %3074 }
 0x454   : >> { %v2702_v62 = vsel %vm2696_vm2, %v6076_v54, %v2653_v41  ;;  %v2880_v58 = vsel %vm6859_vm0, %v2653_v41, %v2824_v48  ;;  %v3131_v1 = vsel %vm3124_vm12, %v3073_v47, %v3075_v56  ;;  %v2415_v54 = vsel %vm2387_vm1, %v6189_v27, %v6325_v45 }
 0x455   : >> { %v2879_v43 = vsel %vm6861_vm4, %v2702_v62, %v2823_v37  ;;  %v2908_v55 = vadd.f32 %v2880_v58, %v2492_v12  ;;  %v3187_v15 = vsel %vm6862_vm7, %v3131_v1, 0.0  ;;  %vm6864_vm0 = vcmp.lt.s32.totalorder %v6833_v38, 2 }
 0x456   : >> { %v2463_v47 = vsel %vm6864_vm0, %v2284_v13, %v6155_v26  ;;  %v2907_v29 = vadd.f32 %v2879_v43, %v2491_v39  ;;  %vm6865_vm1 = vcmp.lt.s32.totalorder %v6852_v28, 2  ;;  %vm6866_vm7 = vcmp.lt.s32.totalorder %v6852_v28, 1 }
 0x457   : >> { %v3215_v7 = vadd.f32 %v3187_v15, %v2908_v55  ;;  %v2681_v36 = vpop.permute.xlu0 %2680  ;;  %v3091_v27 = vpop.permute.xlu1 %3090  ;;  %v2464_v45 = vsel %vm6865_vm1, %v2251_v4, %v2408_v63  ;;  %v2505_v14 = vsel %vm6860_vm9, %v2463_v47, 0.0  ;;  %vm6869_vm0 = vcmp.lt.s32.totalorder %v6833_v38, 27 }
 0x458   : >> { %v3214_v22 = vadd.f32 %v3186_v42, %v2907_v29  ;;  %v2714_v26 = vsel %vm2696_vm2, %v6128_v5, %v2681_v36  ;;  %v3138_v3 = vsel %vm3124_vm12, %v3089_v46, %v3091_v27  ;;  %v2894_v53 = vsel %vm6866_vm7, %v2681_v36, %v2838_v17  ;;  %vm6868_vm2 = vmmov %vm6865_vm1 }
 0x459   : >> { %3247 = vst.msk [vmem:[%s5614_s15 + $0x30] sm:$0xff] %vm3246_vm6, %v3215_v7  ;;  %v2893_v44 = vsel %vm6861_vm4, %v2714_v26, %v2837_v23  ;;  %v3194_v19 = vsel %vm6867_vm8, %v3138_v3, 0.0  ;;  %v2845_v5 = vsel %vm2817_vm3, %v6342_v2, %v2816_v20  ;;  %v2471_v51 = vsel %vm6868_vm2, %v6313_v21, %v2415_v54  ;;  %vm6871_vm3 = vmmov %vm6866_vm7 }
 0x45a   : >> { %3245 = vst [vmem:[%s5614_s15 + $0x28] sm:$0xff] %v3214_v22  ;;  %v2921_v46 = vadd.f32 %v2893_v44, %v2505_v14  ;;  %v3222_v18 = vadd.f32 %v3194_v19, %v2915_v59  ;;  %v3200_v25 = vsel %vm6869_vm0, %v3144_v31, 0.0  ;;  %vm6870_vm1 = vcmp.ge.s32.totalorder %v6852_v28, 1  ;;  %vm6872_vm9 = vmmov %vm6869_vm0 }
 0x45b   : >> { %v2506_v50 = vsel %vm6870_vm1, %v2464_v45, 0.0  ;;  %v3121_v11 = vpop.permute.xlu0 %3120  ;;  %v3107_v32 = vpop.permute.xlu1 %3106  ;;  %v2901_v4 = vsel %vm6871_vm3, %v6360_v60, %v2845_v5  ;;  %vm6873_vm4 = vmmov %vm6867_vm8 }
 0x45c   : >> { %v2922_v40 = vadd.f32 %v2894_v53, %v2506_v50  ;;  %v3228_v2 = vadd.f32 %v3200_v25, %v2921_v46  ;;  %3254 = vst.msk [vmem:[%s5614_s15 + $0x68] sm:$0xff] %vm3246_vm6, %v3222_v18  ;;  %v3151_v49 = vsel %vm3124_vm12, %v6209_v24, %v3121_v11  ;;  %v3145_v21 = vsel %vm3124_vm12, %v6357_v33, %v3107_v32  ;;  %vm6874_vm7 = vmmov %vm6870_vm1 }
 0x45d   : >> { %v3207_v20 = vsel %vm6872_vm9, %v3151_v49, 0.0  ;;  %v3201_v0 = vsel %vm6873_vm4, %v3145_v21, 0.0  ;;  %v2513_v24 = vsel %vm6874_vm7, %v2471_v51, 0.0  ;;  %vm6875_vm8 = vmmov %vm6873_vm4 }
 0x45e   : >> { %3260 = vst [vmem:[%s5614_s15 + $0x98] sm:$0xff] %v3228_v2  ;;  %v3235_v34 = vadd.f32 %v3207_v20, %v6373_v35  ;;  %v3229_v37 = vadd.f32 %v3201_v0, %v2922_v40  ;;  %v2929_v6 = vadd.f32 %v2901_v4, %v2513_v24  ;;  %394 = sbr.rel (!%p392_p7) target bundleno = 90 (0x5a), region = 81 }
 0x45f   : >> { %v3123_v16 = vpop.permute.xlu1 %3122 }
 0x460   : >> { %3267 = vst [vmem:[%s5614_s15 + $0xd0] sm:$0xff] %v3235_v34  ;;  %3261 = vst.msk [vmem:[%s5614_s15 + $0xa0] sm:$0xff] %vm3246_vm6, %v3229_v37  ;;  %v3152_v33 = vsel %vm3124_vm12, %v3121_v11, %v3123_v16 }
 0x461   : >> { %v3208_v60 = vsel %vm6875_vm8, %v3152_v33, 0.0 }
 0x462   : >> { %v3236_v63 = vadd.f32 %v3208_v60, %v2929_v6 }
 0x464   : >> { %3268 = vst.msk [vmem:[%s5614_s15 + $0xd8] sm:$0xff] %vm3246_vm6, %v3236_v63 }
 0x465 PF: > { %p13_p9 = scmp.ge.s32.totalorder %s3885_s17, 10   ;;  %s6876_s12 = smov %s3820_s13 }
 0x466   : > { %s6877_s13 = smov %s3824_s14  ;;  %s6878_s14 = smov %s3895_s20 }
 0x467   : > { %s6879_s15 = smov %s3885_s17  ;;  %15 = sbr.rel (!%p13_p9) target bundleno = 3 (0x3), region = 92 }
 0x46e   :  { %3293 = vsyncpa [#allocation3], 1 }
 0x46f   :  { %3295 = vsyncpa [#allocation3 + $0x1], 1 }

</bundles_post_ra>
